<compile_context>
chip_gen: v7x
topology: tpu7x:2x2x1
jax: 0.10.0
libtpu: 0.0.40
codegen_flags: <defaults>
</compile_context>

<pallas_src>
import functools
import math

import jax
import jax.numpy as jnp
from jax.experimental import pallas as pl
from jax.experimental.pallas import tpu as pltpu


def _round_up(x, m):
    return (x + m - 1) // m * m


# ----------------------------------------------------------------------------
# Pallas kernel 1: conv GEMM (transposed orientation) + bias + LeakyReLU
#   out (Cout, TN) = W (Cout, K) @ patches (K, TN) + bias (Cout, 1)
# ----------------------------------------------------------------------------
def _conv_gemm_kernel(w_ref, x_ref, b_ref, o_ref, *, slope):
    acc = jnp.dot(w_ref[...], x_ref[...], preferred_element_type=jnp.float32)
    acc = acc + b_ref[...]                       # (Cout,1) broadcast over pixels
    acc = jnp.where(acc >= 0, acc, slope * acc)  # LeakyReLU in f32
    o_ref[...] = acc.astype(o_ref.dtype)


def conv_gemm_bias_lrelu(w, patches, bias, slope, tn=512):
    """w: (Cout, K) bf16, patches: (K, M) bf16, bias: (Cout, 1) f32 -> (Cout, M) bf16."""
    Cout, K = w.shape
    K2, M = patches.shape
    assert K == K2
    tn = min(tn, _round_up(M, 128))              # lane-aligned pixel tile
    Mp = _round_up(M, tn)
    if Mp != M:
        patches = jnp.pad(patches, ((0, 0), (0, Mp - M)))
    out = pl.pallas_call(
        functools.partial(_conv_gemm_kernel, slope=slope),
        out_shape=jax.ShapeDtypeStruct((Cout, Mp), jnp.bfloat16),
        grid=(Mp // tn,),
        in_specs=[
            pl.BlockSpec((Cout, K), lambda i: (0, 0)),   # resident weight
            pl.BlockSpec((K, tn), lambda i: (0, i)),     # pixel tile (pipelined)
            pl.BlockSpec((Cout, 1), lambda i: (0, 0)),   # resident bias
        ],
        out_specs=pl.BlockSpec((Cout, tn), lambda i: (0, i)),
        compiler_params=pltpu.CompilerParams(
            dimension_semantics=("parallel",),
            vmem_limit_bytes=32 * 1024 * 1024,
        ),
    )(w, patches, bias)
    if Mp != M:
        out = out[:, :M]
    return out


# ----------------------------------------------------------------------------
# Pallas kernel 2: fused Linear(3136->512)+LeakyReLU+Linear(512->1)
#   tiled over (padded) batch rows; fc1 weight resident, fc2 as VPU reduce
# ----------------------------------------------------------------------------
def _fc_fused_kernel(a_ref, w1_ref, b1_ref, w2_ref, b2_ref, o_ref, *, slope):
    h = jnp.dot(a_ref[...], w1_ref[...], preferred_element_type=jnp.float32)
    h = h + b1_ref[...]
    h = jnp.where(h >= 0, h, slope * h)                      # LeakyReLU (f32)
    # fc2: (TM,512) . (512,) contraction as multiply + cross-lane reduce.
    out = jnp.sum(h * w2_ref[...], axis=1, keepdims=True) + b2_ref[...]
    o_ref[...] = out.astype(o_ref.dtype)


def fc_fused(a, w1, b1, w2, b2, slope, tm=256):
    """a: (N, Kp) bf16, w1: (Kp, H) bf16, b1: (1,H) f32, w2: (1,H) f32, b2: (1,1) f32 -> (N,) f32."""
    N, Kp = a.shape
    H = w1.shape[1]
    tm = min(tm, _round_up(N, 8))
    Mp = _round_up(N, tm)
    if Mp != N:
        a = jnp.pad(a, ((0, Mp - N), (0, 0)))
    out = pl.pallas_call(
        functools.partial(_fc_fused_kernel, slope=slope),
        out_shape=jax.ShapeDtypeStruct((Mp, 1), jnp.float32),
        grid=(Mp // tm,),
        in_specs=[
            pl.BlockSpec((tm, Kp), lambda i: (i, 0)),    # activation tile
            pl.BlockSpec((Kp, H), lambda i: (0, 0)),     # resident fc1 weight
            pl.BlockSpec((1, H), lambda i: (0, 0)),      # resident fc1 bias
            pl.BlockSpec((1, H), lambda i: (0, 0)),      # resident fc2 weight row
            pl.BlockSpec((1, 1), lambda i: (0, 0)),      # resident fc2 bias
        ],
        out_specs=pl.BlockSpec((tm, 1), lambda i: (i, 0)),
        compiler_params=pltpu.CompilerParams(
            dimension_semantics=("parallel",),
            vmem_limit_bytes=32 * 1024 * 1024,
        ),
    )(a, w1, b1, w2, b2)
    return out[:N, 0]


# ----------------------------------------------------------------------------
# Glue: im2col in (C, N, H, W) layout. K is ordered (c, kh, kw), matching
# torch's weight.reshape(Cout, Cin*k*k), so conv weights need no permutation.
# TODO(synk): patch extraction stays in XLA glue (k*k strided slices + stack);
# in-kernel tap gathering from a resident VMEM row band is not implemented.
# ----------------------------------------------------------------------------
def im2col_cnhw(x, k, s, p):
    """x: (C, N, H, W) -> (C*k*k, N*Ho*Wo), plus (Ho, Wo)."""
    C, N, H, W = x.shape
    xp = jnp.pad(x, ((0, 0), (0, 0), (p, p), (p, p)))
    Ho = (H + 2 * p - k) // s + 1
    Wo = (W + 2 * p - k) // s + 1
    taps = []
    for di in range(k):
        for dj in range(k):
            taps.append(xp[:, :, di:di + s * Ho:s, dj:dj + s * Wo:s])  # (C,N,Ho,Wo)
    pat = jnp.stack(taps, axis=1)                     # (C, k*k, N, Ho, Wo)
    pat = pat.reshape(C * k * k, N * Ho * Wo)
    return pat, Ho, Wo


# ----------------------------------------------------------------------------
# Parameter init (deterministic, PyTorch-like uniform(-1/sqrt(fan_in), ...))
# ----------------------------------------------------------------------------
def init_params(key):
    def uni(key, shape, fan_in):
        bound = 1.0 / math.sqrt(fan_in)
        return jax.random.uniform(key, shape, jnp.float32, -bound, bound)

    ks = jax.random.split(key, 8)
    return {
        "conv1_w": uni(ks[0], (32, 1, 4, 4), 1 * 4 * 4),
        "conv1_b": uni(ks[1], (32,), 1 * 4 * 4),
        "conv2_w": uni(ks[2], (64, 32, 4, 4), 32 * 4 * 4),
        "conv2_b": uni(ks[3], (64,), 32 * 4 * 4),
        "fc1_w": uni(ks[4], (512, 64 * 7 * 7), 64 * 7 * 7),   # torch (out, in)
        "fc1_b": uni(ks[5], (512,), 64 * 7 * 7),
        "fc2_w": uni(ks[6], (1, 512), 512),
        "fc2_b": uni(ks[7], (1,), 512),
    }


_K_FC = 64 * 7 * 7                    # 3136
_K_FC_PAD = _round_up(_K_FC, 128)     # 3200 (lane-aligned contraction dim)


def prepare_params(params):
    """One-time (outside the jitted forward) weight flatten / transpose / cast."""
    wf1 = jnp.pad(params["fc1_w"].T, ((0, _K_FC_PAD - _K_FC), (0, 0)))
    return {
        "w1": params["conv1_w"].reshape(32, 1 * 4 * 4).astype(jnp.bfloat16),
        "b1": params["conv1_b"].reshape(32, 1).astype(jnp.float32),
        "w2": params["conv2_w"].reshape(64, 32 * 4 * 4).astype(jnp.bfloat16),
        "b2": params["conv2_b"].reshape(64, 1).astype(jnp.float32),
        "wf1": wf1.astype(jnp.bfloat16),                       # (3200, 512)
        "bf1": params["fc1_b"].reshape(1, 512).astype(jnp.float32),
        "wf2": params["fc2_w"].reshape(1, 512).astype(jnp.float32),
        "bf2": params["fc2_b"].reshape(1, 1).astype(jnp.float32),
    }


# ----------------------------------------------------------------------------
# Discriminator forward
# ----------------------------------------------------------------------------
def discriminator_forward(prep, x):
    """x: (N, 1, 28, 28) float32 -> (N,) float32."""
    slope = 0.1
    N = x.shape[0]

    # (N,1,H,W) -> (C=1,N,H,W): free relayout since C == 1. bf16 MXU operands.
    xc = jnp.transpose(x, (1, 0, 2, 3)).astype(jnp.bfloat16)

    p1, Ho1, Wo1 = im2col_cnhw(xc, 4, 2, 1)                          # (16,  N*14*14)
    h1 = conv_gemm_bias_lrelu(prep["w1"], p1, prep["b1"], slope)     # (32,  N*14*14)
    h1 = h1.reshape(32, N, Ho1, Wo1)                                 # stays (C,N,H,W)

    p2, Ho2, Wo2 = im2col_cnhw(h1, 4, 2, 1)                          # (512, N*7*7)
    h2 = conv_gemm_bias_lrelu(prep["w2"], p2, prep["b2"], slope)     # (64,  N*7*7)

    # Torch Reshape(64*7*7): flatten per sample in (C, H, W) order.
    flat = h2.reshape(64, N, Ho2 * Wo2).transpose(1, 0, 2).reshape(N, _K_FC)
    flat = jnp.pad(flat, ((0, 0), (0, _K_FC_PAD - _K_FC)))           # K 3136 -> 3200

    # Fused Linear(3136,512)+LeakyReLU+Linear(512,1); trailing Reshape() -> (N,)
    return fc_fused(flat, prep["wf1"], prep["bf1"], prep["wf2"], prep["bf2"], slope)


if __name__ == "__main__":
    key = jax.random.PRNGKey(0)
    pkey, xkey = jax.random.split(key)
    params = init_params(pkey)
    prep = prepare_params(params)

    # Input must be (N, 1, 28, 28): the Reshape(64*7*7) fixes the spatial size.
    batch = 2
    x = jax.random.normal(xkey, (batch, 1, 28, 28), jnp.float32)

    fwd = jax.jit(discriminator_forward)
    out = jax.block_until_ready(fwd(prep, x))
    assert out.shape == (batch,), out.shape
    assert out.dtype == jnp.float32, out.dtype
    assert bool(jnp.all(jnp.isfinite(out)))
    print("KERNEL_OK")
</pallas_src>

<mosaic_0001>
module attributes {stable_mosaic.version = 11 : i64} {
  func.func @_conv_gemm_kernel(%arg0: i32, %arg1: memref<32x16xbf16, #tpu.memory_space<vmem>>, %arg2: memref<16x512xbf16, #tpu.memory_space<vmem>>, %arg3: memref<32x1xf32, #tpu.memory_space<vmem>>, %arg4: memref<32x512xbf16, #tpu.memory_space<vmem>>) attributes {dimension_semantics = [#tpu.dimension_semantics<parallel>], iteration_bounds = array<i64: 1>, scalar_prefetch = 0 : i64, scratch_operands = 0 : i64, tpu.core_type = #tpu.core_type<tc>, window_params = [{pipeline_mode = #tpu.pipeline_mode<synchronous>, transform_indices = @transform_0, window_bounds = array<i64: 32, 16>}, {transform_indices = @transform_1, window_bounds = array<i64: 16, 512>}, {pipeline_mode = #tpu.pipeline_mode<synchronous>, transform_indices = @transform_2, window_bounds = array<i64: 32, 1>}, {transform_indices = @transform_3, window_bounds = array<i64: 32, 512>}]} {
    %c0 = arith.constant 0 : index
    %c0_0 = arith.constant 0 : index
    %0 = vector.load %arg1[%c0, %c0_0] : memref<32x16xbf16, #tpu.memory_space<vmem>>, vector<32x16xbf16>
    %c0_1 = arith.constant 0 : index
    %c0_2 = arith.constant 0 : index
    %1 = vector.load %arg2[%c0_1, %c0_2] : memref<16x512xbf16, #tpu.memory_space<vmem>>, vector<16x512xbf16>
    %cst = arith.constant dense<0.000000e+00> : vector<32x512xf32>
    %2 = tpu.matmul %0, %1, %cst {dimension_numbers = #tpu.dot_dimension_numbers<[1], [0], [0], [1], [0, 0, 1, 1], [], []>} : vector<32x16xbf16>, vector<16x512xbf16>, vector<32x512xf32> -> vector<32x512xf32>
    %c0_3 = arith.constant 0 : index
    %c0_4 = arith.constant 0 : index
    %3 = vector.load %arg3[%c0_3, %c0_4] : memref<32x1xf32, #tpu.memory_space<vmem>>, vector<32x1xf32>
    %4 = vector.broadcast %3 : vector<32x1xf32> to vector<32x512xf32>
    %5 = arith.addf %2, %4 : vector<32x512xf32>
    %cst_5 = arith.constant 0.000000e+00 : f32
    %6 = vector.broadcast %cst_5 : f32 to vector<32x512xf32>
    %7 = arith.cmpf oge, %5, %6 : vector<32x512xf32>
    %cst_6 = arith.constant 1.000000e-01 : f32
    %8 = vector.broadcast %cst_6 : f32 to vector<32x512xf32>
    %9 = arith.mulf %8, %5 : vector<32x512xf32>
    %10 = arith.select %7, %5, %9 : vector<32x512xi1>, vector<32x512xf32>
    %11 = arith.truncf %10 : vector<32x512xf32> to vector<32x512xbf16>
    %c0_7 = arith.constant 0 : index
    %c0_8 = arith.constant 0 : index
    %12 = vector.load %arg4[%c0_7, %c0_8] : memref<32x512xbf16, #tpu.memory_space<vmem>>, vector<32x512xbf16>
    tpu.vector_store %arg4[%c0_7, %c0_8], %11 {strides = array<i32>} : memref<32x512xbf16, #tpu.memory_space<vmem>>, vector<32x512xbf16>,
    return
  }
  func.func @transform_0(%arg0: i32) -> (i32, i32) {
    %c0_i32 = arith.constant 0 : i32
    %c0_i32_0 = arith.constant 0 : i32
    %c0_i32_1 = arith.constant 0 : i32
    return %c0_i32, %c0_i32_0 : i32, i32
  }
  func.func @transform_1(%arg0: i32) -> (i32, i32) {
    %c0_i32 = arith.constant 0 : i32
    %c0_i32_0 = arith.constant 0 : i32
    return %c0_i32, %arg0 : i32, i32
  }
  func.func @transform_2(%arg0: i32) -> (i32, i32) {
    %c0_i32 = arith.constant 0 : i32
    %c0_i32_0 = arith.constant 0 : i32
    %c0_i32_1 = arith.constant 0 : i32
    return %c0_i32, %c0_i32_0 : i32, i32
  }
  func.func @transform_3(%arg0: i32) -> (i32, i32) {
    %c0_i32 = arith.constant 0 : i32
    %c0_i32_0 = arith.constant 0 : i32
    return %c0_i32, %arg0 : i32, i32
  }
}

module attributes {stable_mosaic.version = 11 : i64} {
  func.func @_conv_gemm_kernel(%arg0: i32, %arg1: memref<64x512xbf16, #tpu.memory_space<vmem>>, %arg2: memref<512x128xbf16, #tpu.memory_space<vmem>>, %arg3: memref<64x1xf32, #tpu.memory_space<vmem>>, %arg4: memref<64x128xbf16, #tpu.memory_space<vmem>>) attributes {dimension_semantics = [#tpu.dimension_semantics<parallel>], iteration_bounds = array<i64: 1>, scalar_prefetch = 0 : i64, scratch_operands = 0 : i64, tpu.core_type = #tpu.core_type<tc>, window_params = [{pipeline_mode = #tpu.pipeline_mode<synchronous>, transform_indices = @transform_0, window_bounds = array<i64: 64, 512>}, {transform_indices = @transform_1, window_bounds = array<i64: 512, 128>}, {pipeline_mode = #tpu.pipeline_mode<synchronous>, transform_indices = @transform_2, window_bounds = array<i64: 64, 1>}, {transform_indices = @transform_3, window_bounds = array<i64: 64, 128>}]} {
    %c0 = arith.constant 0 : index
    %c0_0 = arith.constant 0 : index
    %0 = vector.load %arg1[%c0, %c0_0] : memref<64x512xbf16, #tpu.memory_space<vmem>>, vector<64x512xbf16>
    %c0_1 = arith.constant 0 : index
    %c0_2 = arith.constant 0 : index
    %1 = vector.load %arg2[%c0_1, %c0_2] : memref<512x128xbf16, #tpu.memory_space<vmem>>, vector<512x128xbf16>
    %cst = arith.constant dense<0.000000e+00> : vector<64x128xf32>
    %2 = tpu.matmul %0, %1, %cst {dimension_numbers = #tpu.dot_dimension_numbers<[1], [0], [0], [1], [0, 0, 1, 1], [], []>} : vector<64x512xbf16>, vector<512x128xbf16>, vector<64x128xf32> -> vector<64x128xf32>
    %c0_3 = arith.constant 0 : index
    %c0_4 = arith.constant 0 : index
    %3 = vector.load %arg3[%c0_3, %c0_4] : memref<64x1xf32, #tpu.memory_space<vmem>>, vector<64x1xf32>
    %4 = vector.broadcast %3 : vector<64x1xf32> to vector<64x128xf32>
    %5 = arith.addf %2, %4 : vector<64x128xf32>
    %cst_5 = arith.constant 0.000000e+00 : f32
    %6 = vector.broadcast %cst_5 : f32 to vector<64x128xf32>
    %7 = arith.cmpf oge, %5, %6 : vector<64x128xf32>
    %cst_6 = arith.constant 1.000000e-01 : f32
    %8 = vector.broadcast %cst_6 : f32 to vector<64x128xf32>
    %9 = arith.mulf %8, %5 : vector<64x128xf32>
    %10 = arith.select %7, %5, %9 : vector<64x128xi1>, vector<64x128xf32>
    %11 = arith.truncf %10 : vector<64x128xf32> to vector<64x128xbf16>
    %c0_7 = arith.constant 0 : index
    %c0_8 = arith.constant 0 : index
    %12 = vector.load %arg4[%c0_7, %c0_8] : memref<64x128xbf16, #tpu.memory_space<vmem>>, vector<64x128xbf16>
    tpu.vector_store %arg4[%c0_7, %c0_8], %11 {strides = array<i32>} : memref<64x128xbf16, #tpu.memory_space<vmem>>, vector<64x128xbf16>,
    return
  }
  func.func @transform_0(%arg0: i32) -> (i32, i32) {
    %c0_i32 = arith.constant 0 : i32
    %c0_i32_0 = arith.constant 0 : i32
    %c0_i32_1 = arith.constant 0 : i32
    return %c0_i32, %c0_i32_0 : i32, i32
  }
  func.func @transform_1(%arg0: i32) -> (i32, i32) {
    %c0_i32 = arith.constant 0 : i32
    %c0_i32_0 = arith.constant 0 : i32
    return %c0_i32, %arg0 : i32, i32
  }
  func.func @transform_2(%arg0: i32) -> (i32, i32) {
    %c0_i32 = arith.constant 0 : i32
    %c0_i32_0 = arith.constant 0 : i32
    %c0_i32_1 = arith.constant 0 : i32
    return %c0_i32, %c0_i32_0 : i32, i32
  }
  func.func @transform_3(%arg0: i32) -> (i32, i32) {
    %c0_i32 = arith.constant 0 : i32
    %c0_i32_0 = arith.constant 0 : i32
    return %c0_i32, %arg0 : i32, i32
  }
}

module attributes {stable_mosaic.version = 11 : i64} {
  func.func @_fc_fused_kernel(%arg0: i32, %arg1: memref<8x3200xbf16, #tpu.memory_space<vmem>>, %arg2: memref<3200x512xbf16, #tpu.memory_space<vmem>>, %arg3: memref<1x512xf32, #tpu.memory_space<vmem>>, %arg4: memref<1x512xf32, #tpu.memory_space<vmem>>, %arg5: memref<1x1xf32, #tpu.memory_space<vmem>>, %arg6: memref<8x1xf32, #tpu.memory_space<vmem>>) attributes {dimension_semantics = [#tpu.dimension_semantics<parallel>], iteration_bounds = array<i64: 1>, scalar_prefetch = 0 : i64, scratch_operands = 0 : i64, tpu.core_type = #tpu.core_type<tc>, window_params = [{transform_indices = @transform_0, window_bounds = array<i64: 8, 3200>}, {pipeline_mode = #tpu.pipeline_mode<synchronous>, transform_indices = @transform_1, window_bounds = array<i64: 3200, 512>}, {pipeline_mode = #tpu.pipeline_mode<synchronous>, transform_indices = @transform_2, window_bounds = array<i64: 1, 512>}, {pipeline_mode = #tpu.pipeline_mode<synchronous>, transform_indices = @transform_3, window_bounds = array<i64: 1, 512>}, {pipeline_mode = #tpu.pipeline_mode<synchronous>, transform_indices = @transform_4, window_bounds = array<i64: 1, 1>}, {transform_indices = @transform_5, window_bounds = array<i64: 8, 1>}]} {
    %c0 = arith.constant 0 : index
    %c0_0 = arith.constant 0 : index
    %0 = vector.load %arg1[%c0, %c0_0] : memref<8x3200xbf16, #tpu.memory_space<vmem>>, vector<8x3200xbf16>
    %c0_1 = arith.constant 0 : index
    %c0_2 = arith.constant 0 : index
    %1 = vector.load %arg2[%c0_1, %c0_2] : memref<3200x512xbf16, #tpu.memory_space<vmem>>, vector<3200x512xbf16>
    %cst = arith.constant dense<0.000000e+00> : vector<8x512xf32>
    %2 = tpu.matmul %0, %1, %cst {dimension_numbers = #tpu.dot_dimension_numbers<[1], [0], [0], [1], [0, 0, 1, 1], [], []>} : vector<8x3200xbf16>, vector<3200x512xbf16>, vector<8x512xf32> -> vector<8x512xf32>
    %c0_3 = arith.constant 0 : index
    %c0_4 = arith.constant 0 : index
    %3 = vector.load %arg3[%c0_3, %c0_4] : memref<1x512xf32, #tpu.memory_space<vmem>>, vector<1x512xf32>
    %4 = vector.broadcast %3 : vector<1x512xf32> to vector<8x512xf32>
    %5 = arith.addf %2, %4 : vector<8x512xf32>
    %cst_5 = arith.constant 0.000000e+00 : f32
    %6 = vector.broadcast %cst_5 : f32 to vector<8x512xf32>
    %7 = arith.cmpf oge, %5, %6 : vector<8x512xf32>
    %cst_6 = arith.constant 1.000000e-01 : f32
    %8 = vector.broadcast %cst_6 : f32 to vector<8x512xf32>
    %9 = arith.mulf %8, %5 : vector<8x512xf32>
    %10 = arith.select %7, %5, %9 : vector<8x512xi1>, vector<8x512xf32>
    %c0_7 = arith.constant 0 : index
    %c0_8 = arith.constant 0 : index
    %11 = vector.load %arg4[%c0_7, %c0_8] : memref<1x512xf32, #tpu.memory_space<vmem>>, vector<1x512xf32>
    %12 = vector.broadcast %11 : vector<1x512xf32> to vector<8x512xf32>
    %13 = arith.mulf %10, %12 : vector<8x512xf32>
    %cst_9 = arith.constant dense<0.000000e+00> : vector<8xf32>
    %14 = vector.multi_reduction <add>, %13, %cst_9 [1] : vector<8x512xf32> to vector<8xf32>
    %15 = vector.shape_cast %14 : vector<8xf32> to vector<8x1xf32>
    %c0_10 = arith.constant 0 : index
    %c0_11 = arith.constant 0 : index
    %16 = vector.load %arg5[%c0_10, %c0_11] : memref<1x1xf32, #tpu.memory_space<vmem>>, vector<1x1xf32>
    %17 = vector.broadcast %16 : vector<1x1xf32> to vector<8x1xf32>
    %18 = arith.addf %15, %17 : vector<8x1xf32>
    %c0_12 = arith.constant 0 : index
    %c0_13 = arith.constant 0 : index
    %19 = vector.load %arg6[%c0_12, %c0_13] : memref<8x1xf32, #tpu.memory_space<vmem>>, vector<8x1xf32>
    tpu.vector_store %arg6[%c0_12, %c0_13], %18 {strides = array<i32>} : memref<8x1xf32, #tpu.memory_space<vmem>>, vector<8x1xf32>,
    return
  }
  func.func @transform_0(%arg0: i32) -> (i32, i32) {
    %c0_i32 = arith.constant 0 : i32
    %c0_i32_0 = arith.constant 0 : i32
    return %arg0, %c0_i32 : i32, i32
  }
  func.func @transform_1(%arg0: i32) -> (i32, i32) {
    %c0_i32 = arith.constant 0 : i32
    %c0_i32_0 = arith.constant 0 : i32
    %c0_i32_1 = arith.constant 0 : i32
    return %c0_i32, %c0_i32_0 : i32, i32
  }
  func.func @transform_2(%arg0: i32) -> (i32, i32) {
    %c0_i32 = arith.constant 0 : i32
    %c0_i32_0 = arith.constant 0 : i32
    %c0_i32_1 = arith.constant 0 : i32
    return %c0_i32, %c0_i32_0 : i32, i32
  }
  func.func @transform_3(%arg0: i32) -> (i32, i32) {
    %c0_i32 = arith.constant 0 : i32
    %c0_i32_0 = arith.constant 0 : i32
    %c0_i32_1 = arith.constant 0 : i32
    return %c0_i32, %c0_i32_0 : i32, i32
  }
  func.func @transform_4(%arg0: i32) -> (i32, i32) {
    %c0_i32 = arith.constant 0 : i32
    %c0_i32_0 = arith.constant 0 : i32
    %c0_i32_1 = arith.constant 0 : i32
    return %c0_i32, %c0_i32_0 : i32, i32
  }
  func.func @transform_5(%arg0: i32) -> (i32, i32) {
    %c0_i32 = arith.constant 0 : i32
    %c0_i32_0 = arith.constant 0 : i32
    return %arg0, %c0_i32 : i32, i32
  }
}

</mosaic_0001>

<bundles_post_ra>
// kernel: discriminator_forward.3
= control target key start
LH: loop header
LB: loop body
LE: loop exit
PB: predicated region body
PF: predicated region fallthrough
CT: control target
= control target key end

     0   :  { %v335_v1 = vmov 0   ;;  %vm77_vm0 = vcmask 130048   ;;  %s410_s1 = inlined_call_operand.vmem [shape: bf16[16,512], index: 1, kind: input, shape index: {}]   ;;  %s411_s0 = inlined_call_operand.vmem [shape: bf16[32,16], index: 0, kind: input, shape index: {}]   ;;  %s412_s2 = inlined_call_operand.vmem [shape: f32[32,1], index: 2, kind: input, shape index: {}]   ;;  %s413_s3 = inlined_call_operand.vmem [shape: bf16[32,512], index: 3, kind: output, shape index: {}]  }
   0x1   :  { %v327_v0 = vld [vmem:[%s410_s1 + $0x4] ss:$16 sps:$4 sm:$0xff]   ;;  %116 = vmatprep.mubr.bf16.mxu0 %v335_v1  ;;  %169 = vmatprep.mubr.bf16.mxu1 %v335_v1  ;;  %v329_v2 = vld [vmem:[%s410_s1 + $0xc] ss:$16 sps:$4 sm:$0xff]   ;;  %v331_v3 = vld [vmem:[%s410_s1] ss:$16 sps:$4 sm:$0xff]  }
   0x2   :  { %325 = vset.pattern.permute.xlu0 %v335_v1  ;;  %326 = vset.pattern.permute.xlu1 %v335_v1  ;;  %v332_v4 = vld [vmem:[%s410_s1 + $0x8] ss:$16 sps:$4 sm:$0xff]   ;;  %v333_v5 = vld [vmem:[%s411_s0] sm:$0xff]   ;;  %v25_v7 = vld [vmem:[%s412_s2 + $0x10] sm:$0xff] }
   0x3   :  { %84 = vmatprep.subr.bf16.mxu0 %v327_v0  ;;  %137 = vmatprep.subr.bf16.mxu1 %v329_v2  ;;  %v23_v6 = vld [vmem:[%s412_s2] sm:$0xff]  ;;  %v24_v8 = vld [vmem:[%s412_s2 + $0x8] sm:$0xff]  ;;  %v26_v9 = vld [vmem:[%s412_s2 + $0x18] sm:$0xff] }
   0x4   :  { %85 = vmatpush1.bf16.msra.mxu0 %v331_v3  ;;  %138 = vmatpush1.bf16.msra.mxu1 %v332_v4  ;;  %v334_v10 = vld [vmem:[%s411_s0 + $0x8] sm:$0xff]  }
   0x5   :  { %29 = vperm.xlu0 %325, %v23_v6   ;;  %39 = vperm.xlu1 %326, %v25_v7  }
   0x7   :  { %304 = vmatmul.mubr.msk.bf16.vlgmr.msra.gmra.mrb[0].mxu0 %vm77_vm0, %v333_v5  ;;  %306 = vmatmul.mubr.msk.bf16.vlgmr.msra.gmra.mrb[0].mxu1 %vm77_vm0, %v333_v5 }
   0x8   :  { %126 = vmatprep.mubr.bf16.mxu0 %v335_v1  ;;  %179 = vmatprep.mubr.bf16.mxu1 %v335_v1 }
   0x9   :  { %34 = vperm.xlu0 %325, %v24_v8   ;;  %44 = vperm.xlu1 %326, %v26_v9  }
   0xf   :  { %305 = vmatmul.mubr.msk.bf16.gmra.mrb[4].mxu0 %vm77_vm0, %v334_v10  ;;  %307 = vmatmul.mubr.msk.bf16.gmra.mrb[4].mxu1 %vm77_vm0, %v334_v10 }
  0x84   :  { %v30_v11 = vpop.permute.xlu0 %29  ;;  %v40_v40 = vpop.permute.xlu1 %39 }
  0x88   :  { %v35_v12 = vpop.permute.xlu0 %34  ;;  %v45_v63 = vpop.permute.xlu1 %44 }
  0xda   :  { %v118_v13 = vpop.f32.mrb[0].mxu0  ;;  %v171_v14 = vpop.f32.mrb[0].mxu1 }
  0xdb   :  { %v119_v15 = vadd.f32 %v118_v13, %v30_v11  ;;  %v172_v16 = vadd.f32 %v171_v14, %v30_v11  ;;  %v120_v17 = vpop.f32.mrb[1].mxu0  ;;  %v173_v18 = vpop.f32.mrb[1].mxu1 }
  0xdc   :  { %v121_v19 = vadd.f32 %v120_v17, %v30_v11  ;;  %v174_v20 = vadd.f32 %v173_v18, %v30_v11  ;;  %v122_v21 = vpop.f32.mrb[2].mxu0  ;;  %v175_v22 = vpop.f32.mrb[2].mxu1 }
  0xdd   :  { %vm190_vm1 = vcmp.ge.f32.partialorder %v119_v15, 0.0  ;;  %v206_v23 = vmul.f32 0.1, %v119_v15  ;;  %vm192_vm2 = vcmp.ge.f32.partialorder %v172_v16, 0.0  ;;  %v208_v24 = vmul.f32 0.1, %v172_v16 }
  0xde   :  { %vm191_vm3 = vcmp.ge.f32.partialorder %v121_v19, 0.0  ;;  %v207_v25 = vmul.f32 0.1, %v121_v19  ;;  %vm193_vm4 = vcmp.ge.f32.partialorder %v174_v20, 0.0  ;;  %v209_v26 = vmul.f32 0.1, %v174_v20 }
  0xdf   :  { %v222_v27 = vsel %vm190_vm1, %v119_v15, %v206_v23  ;;  %v224_v28 = vsel %vm192_vm2, %v172_v16, %v208_v24  ;;  %v123_v29 = vadd.f32 %v122_v21, %v35_v12  ;;  %v176_v30 = vadd.f32 %v175_v22, %v35_v12  ;;  %v124_v31 = vpop.f32.mrb[3].mxu0  ;;  %v177_v32 = vpop.f32.mrb[3].mxu1 }
  0xe0   :  { %v223_v33 = vsel %vm191_vm3, %v121_v19, %v207_v25  ;;  %v225_v34 = vsel %vm193_vm4, %v174_v20, %v209_v26  ;;  %v125_v35 = vadd.f32 %v124_v31, %v35_v12  ;;  %v178_v36 = vadd.f32 %v177_v32, %v35_v12 }
  0xe1   :  { %v316_v37 = vpack.c.bf16 %v223_v33, %v222_v27  ;;  %v317_v38 = vpack.c.bf16 %v225_v34, %v224_v28  ;;  %vm194_vm5 = vcmp.ge.f32.partialorder %v123_v29, 0.0  ;;  %v210_v39 = vmul.f32 0.1, %v123_v29 }
  0xe2   :  { %vm196_vm6 = vcmp.ge.f32.partialorder %v176_v30, 0.0  ;;  %v212_v41 = vmul.f32 0.1, %v176_v30  ;;  %vm195_vm7 = vcmp.ge.f32.partialorder %v125_v35, 0.0  ;;  %v211_v42 = vmul.f32 0.1, %v125_v35 }
  0xe3   :  { %286 = vst [vmem:[%s413_s3] sm:$0xff] %v316_v37  ;;  %287 = vst [vmem:[%s413_s3 + $0x8] sm:$0xff] %v317_v38  ;;  %v226_v43 = vsel %vm194_vm5, %v123_v29, %v210_v39  ;;  %vm197_vm8 = vcmp.ge.f32.partialorder %v178_v36, 0.0  ;;  %v213_v44 = vmul.f32 0.1, %v178_v36  ;;  %v128_v45 = vpop.f32.mrb[4].mxu0  ;;  %v181_v46 = vpop.f32.mrb[4].mxu1 }
  0xe4   :  { %v228_v47 = vsel %vm196_vm6, %v176_v30, %v212_v41  ;;  %v227_v48 = vsel %vm195_vm7, %v125_v35, %v211_v42  ;;  %v129_v49 = vadd.f32 %v128_v45, %v40_v40  ;;  %v182_v50 = vadd.f32 %v181_v46, %v40_v40  ;;  %v130_v51 = vpop.f32.mrb[5].mxu0  ;;  %v183_v52 = vpop.f32.mrb[5].mxu1 }
  0xe5   :  { %v318_v53 = vpack.c.bf16 %v227_v48, %v226_v43  ;;  %v229_v54 = vsel %vm197_vm8, %v178_v36, %v213_v44  ;;  %v131_v55 = vadd.f32 %v130_v51, %v40_v40  ;;  %v184_v56 = vadd.f32 %v183_v52, %v40_v40  ;;  %v132_v57 = vpop.f32.mrb[6].mxu0  ;;  %v185_v58 = vpop.f32.mrb[6].mxu1 }
  0xe6   :  { %v319_v59 = vpack.c.bf16 %v229_v54, %v228_v47  ;;  %vm198_vm9 = vcmp.ge.f32.partialorder %v129_v49, 0.0  ;;  %v214_v60 = vmul.f32 0.1, %v129_v49  ;;  %vm200_vm10 = vcmp.ge.f32.partialorder %v182_v50, 0.0  ;;  %v134_v61 = vpop.f32.mrb[7].mxu0  ;;  %v187_v62 = vpop.f32.mrb[7].mxu1 }
  0xe7   :  { %288 = vst [vmem:[%s413_s3 + $0x10] sm:$0xff] %v318_v53  ;;  %v216_v0 = vmul.f32 0.1, %v182_v50  ;;  %vm199_vm11 = vcmp.ge.f32.partialorder %v131_v55, 0.0  ;;  %v215_v1 = vmul.f32 0.1, %v131_v55  ;;  %v133_v4 = vadd.f32 %v132_v57, %v45_v63 }
  0xe8   :  { %vm201_vm12 = vcmp.ge.f32.partialorder %v184_v56, 0.0  ;;  %289 = vst [vmem:[%s413_s3 + $0x18] sm:$0xff] %v319_v59  ;;  %v230_v2 = vsel %vm198_vm9, %v129_v49, %v214_v60  ;;  %v217_v3 = vmul.f32 0.1, %v184_v56  ;;  %v186_v5 = vadd.f32 %v185_v58, %v45_v63 }
  0xe9   :  { %v232_v6 = vsel %vm200_vm10, %v182_v50, %v216_v0  ;;  %v231_v7 = vsel %vm199_vm11, %v131_v55, %v215_v1  ;;  %v135_v8 = vadd.f32 %v134_v61, %v45_v63  ;;  %v188_v9 = vadd.f32 %v187_v62, %v45_v63 }
  0xea   :  { %v320_v10 = vpack.c.bf16 %v231_v7, %v230_v2  ;;  %v233_v11 = vsel %vm201_vm12, %v184_v56, %v217_v3  ;;  %vm202_vm13 = vcmp.ge.f32.partialorder %v133_v4, 0.0  ;;  %v218_v12 = vmul.f32 0.1, %v133_v4 }
  0xeb   :  { %v321_v13 = vpack.c.bf16 %v233_v11, %v232_v6  ;;  %vm204_vm14 = vcmp.ge.f32.partialorder %v186_v5, 0.0  ;;  %v220_v14 = vmul.f32 0.1, %v186_v5  ;;  %vm203_vm15 = vcmp.ge.f32.partialorder %v135_v8, 0.0 }
  0xec   :  { %290 = vst [vmem:[%s413_s3 + $0x20] sm:$0xff] %v320_v10  ;;  %v234_v15 = vsel %vm202_vm13, %v133_v4, %v218_v12  ;;  %v219_v16 = vmul.f32 0.1, %v135_v8  ;;  %vm205_vm0 = vcmp.ge.f32.partialorder %v188_v9, 0.0  ;;  %v221_v17 = vmul.f32 0.1, %v188_v9 }
  0xed   :  { %291 = vst [vmem:[%s413_s3 + $0x28] sm:$0xff] %v321_v13  ;;  %v236_v18 = vsel %vm204_vm14, %v186_v5, %v220_v14 }
  0xee   :  { %v235_v19 = vsel %vm203_vm15, %v135_v8, %v219_v16  ;;  %v237_v20 = vsel %vm205_vm0, %v188_v9, %v221_v17 }
  0xef   :  { %v322_v21 = vpack.c.bf16 %v235_v19, %v234_v15  ;;  %v323_v22 = vpack.c.bf16 %v237_v20, %v236_v18 }
  0xf1   :  { %292 = vst [vmem:[%s413_s3 + $0x30] sm:$0xff] %v322_v21  ;;  %293 = vst [vmem:[%s413_s3 + $0x38] sm:$0xff] %v323_v22 }

// kernel: discriminator_forward.4
= control target key start
LH: loop header
LB: loop body
LE: loop exit
PB: predicated region body
PF: predicated region fallthrough
CT: control target
= control target key end

     0   :  { %v839_v1 = vmov 0   ;;  %s1040_s1 = inlined_call_operand.vmem [shape: bf16[512,128], index: 1, kind: input, shape index: {}]   ;;  %s1041_s0 = inlined_call_operand.vmem [shape: bf16[64,512], index: 0, kind: input, shape index: {}]   ;;  %s1042_s2 = inlined_call_operand.vmem [shape: f32[64,1], index: 2, kind: input, shape index: {}]   ;;  %s1043_s3 = inlined_call_operand.vmem [shape: bf16[64,128], index: 3, kind: output, shape index: {}]  }
   0x1   :  { %v783_v0 = vld [vmem:[%s1040_s1 + $0x40] sm:$0xff]   ;;  %781 = vset.pattern.permute.xlu0 %v839_v1  ;;  %782 = vset.pattern.permute.xlu1 %v839_v1  ;;  %v787_v5 = vld [vmem:[%s1040_s1 + $0x48] sm:$0xff]   ;;  %v791_v9 = vld [vmem:[%s1040_s1 + $0x50] sm:$0xff]  }
   0x2   :  { %v784_v2 = vld [vmem:[%s1040_s1 + $0xc0] sm:$0xff]   ;;  %700 = vmatprep.subr.bf16.mxu0 %v783_v0  ;;  %v788_v6 = vld [vmem:[%s1040_s1 + $0xc8] sm:$0xff]   ;;  %v792_v10 = vld [vmem:[%s1040_s1 + $0xd0] sm:$0xff]  }
   0x3   :  { %v785_v3 = vld [vmem:[%s1040_s1] sm:$0xff]   ;;  %740 = vmatprep.subr.bf16.mxu1 %v784_v2  ;;  %v789_v7 = vld [vmem:[%s1040_s1 + $0x8] sm:$0xff]   ;;  %v793_v11 = vld [vmem:[%s1040_s1 + $0x10] sm:$0xff]  }
   0x4   :  { %v786_v4 = vld [vmem:[%s1040_s1 + $0x80] sm:$0xff]   ;;  %701 = vmatpush3.bf16.msra.mxu0 %v785_v3  ;;  %v790_v8 = vld [vmem:[%s1040_s1 + $0x88] sm:$0xff]   ;;  %v794_v12 = vld [vmem:[%s1040_s1 + $0x90] sm:$0xff]  }
   0x5   :  { %741 = vmatpush3.bf16.msra.mxu1 %v786_v4  ;;  %702 = vmatprep.subr.bf16.mxu0 %v787_v5  ;;  %v795_v13 = vld [vmem:[%s1040_s1 + $0x58] sm:$0xff]   ;;  %v799_v17 = vld [vmem:[%s1040_s1 + $0x60] sm:$0xff]   ;;  %v803_v21 = vld [vmem:[%s1040_s1 + $0x68] sm:$0xff]  }
   0x6   :  { %742 = vmatprep.subr.bf16.mxu1 %v788_v6  ;;  %v796_v14 = vld [vmem:[%s1040_s1 + $0xd8] sm:$0xff]   ;;  %v800_v18 = vld [vmem:[%s1040_s1 + $0xe0] sm:$0xff]   ;;  %v804_v22 = vld [vmem:[%s1040_s1 + $0xe8] sm:$0xff]  }
   0x7   :  { %v797_v15 = vld [vmem:[%s1040_s1 + $0x18] sm:$0xff]   ;;  %v801_v19 = vld [vmem:[%s1040_s1 + $0x20] sm:$0xff]   ;;  %v805_v23 = vld [vmem:[%s1040_s1 + $0x28] sm:$0xff]  }
   0x8   :  { %703 = vmatpush3.bf16.msra.mxu0 %v789_v7  ;;  %v798_v16 = vld [vmem:[%s1040_s1 + $0x98] sm:$0xff]   ;;  %v802_v20 = vld [vmem:[%s1040_s1 + $0xa0] sm:$0xff]   ;;  %v806_v24 = vld [vmem:[%s1040_s1 + $0xa8] sm:$0xff]  }
   0x9   :  { %743 = vmatpush3.bf16.msra.mxu1 %v790_v8  ;;  %704 = vmatprep.subr.bf16.mxu0 %v791_v9  ;;  %v807_v25 = vld [vmem:[%s1040_s1 + $0x70] sm:$0xff]   ;;  %v811_v29 = vld [vmem:[%s1040_s1 + $0x78] sm:$0xff]   ;;  %v95_v43 = vld [vmem:[%s1042_s2] sm:$0xff] }
   0xa   :  { %744 = vmatprep.subr.bf16.mxu1 %v792_v10  ;;  %v808_v26 = vld [vmem:[%s1040_s1 + $0xf0] sm:$0xff]   ;;  %v812_v30 = vld [vmem:[%s1040_s1 + $0xf8] sm:$0xff]   ;;  %105 = vperm.xlu0 %781, %v95_v43   ;;  %v96_v45 = vld [vmem:[%s1042_s2 + $0x8] sm:$0xff] }
   0xb   :  { %v809_v27 = vld [vmem:[%s1040_s1 + $0x30] sm:$0xff]   ;;  %v813_v31 = vld [vmem:[%s1040_s1 + $0x38] sm:$0xff]   ;;  %v99_v48 = vld [vmem:[%s1042_s2 + $0x20] sm:$0xff] }
   0xc   :  { %705 = vmatpush3.bf16.msra.mxu0 %v793_v11  ;;  %v810_v28 = vld [vmem:[%s1040_s1 + $0xb0] sm:$0xff]   ;;  %v814_v32 = vld [vmem:[%s1040_s1 + $0xb8] sm:$0xff]   ;;  %v100_v51 = vld [vmem:[%s1042_s2 + $0x28] sm:$0xff] }
   0xd   :  { %745 = vmatpush3.bf16.msra.mxu1 %v794_v12  ;;  %706 = vmatprep.subr.bf16.mxu0 %v795_v13  ;;  %v815_v33 = vld [vmem:[%s1041_s0] ss:$16 sps:$4 sm:$0xff]   ;;  %v817_v34 = vld [vmem:[%s1041_s0 + $0x4] ss:$16 sps:$4 sm:$0xff]   ;;  %v818_v35 = vld [vmem:[%s1041_s0 + $0x8] ss:$16 sps:$4 sm:$0xff]  }
   0xe   :  { %746 = vmatprep.subr.bf16.mxu1 %v796_v14  ;;  %v820_v36 = vld [vmem:[%s1041_s0 + $0xc] ss:$16 sps:$4 sm:$0xff]   ;;  %447 = vmatprep.mubr.bf16.mxu0 %v817_v34  ;;  %v821_v37 = vld [vmem:[%s1041_s0 + $0x24] ss:$16 sps:$4 sm:$0xff]   ;;  %v825_v39 = vld [vmem:[%s1041_s0 + $0x20] ss:$16 sps:$4 sm:$0xff]  }
   0xf   :  { %512 = vmatprep.mubr.bf16.mxu1 %v820_v36  ;;  %v823_v38 = vld [vmem:[%s1041_s0 + $0x2c] ss:$16 sps:$4 sm:$0xff]   ;;  %v826_v40 = vld [vmem:[%s1041_s0 + $0x28] ss:$16 sps:$4 sm:$0xff]   ;;  %v827_v41 = vld [vmem:[%s1041_s0 + $0x44] ss:$16 sps:$4 sm:$0xff]   ;;  %110 = vperm.xlu0 %781, %v96_v45  }
  0x10   :  { %707 = vmatpush3.bf16.msra.mxu0 %v797_v15  ;;  %v829_v42 = vld [vmem:[%s1041_s0 + $0x4c] ss:$16 sps:$4 sm:$0xff]   ;;  %v97_v44 = vld [vmem:[%s1042_s2 + $0x10] sm:$0xff]  ;;  %v832_v49 = vld [vmem:[%s1041_s0 + $0x48] ss:$16 sps:$4 sm:$0xff]  }
  0x11   :  { %747 = vmatpush3.bf16.msra.mxu1 %v798_v16  ;;  %708 = vmatprep.subr.bf16.mxu0 %v799_v17  ;;  %v98_v46 = vld [vmem:[%s1042_s2 + $0x18] sm:$0xff]  ;;  %v831_v47 = vld [vmem:[%s1041_s0 + $0x40] ss:$16 sps:$4 sm:$0xff]   ;;  %v833_v50 = vld [vmem:[%s1041_s0 + $0x64] ss:$16 sps:$4 sm:$0xff]  }
  0x12   :  { %748 = vmatprep.subr.bf16.mxu1 %v800_v18  ;;  %115 = vperm.xlu1 %782, %v97_v44   ;;  %v835_v52 = vld [vmem:[%s1041_s0 + $0x6c] ss:$16 sps:$4 sm:$0xff]   ;;  %v101_v53 = vld [vmem:[%s1042_s2 + $0x30] sm:$0xff]  ;;  %v838_v56 = vld [vmem:[%s1041_s0 + $0x68] ss:$16 sps:$4 sm:$0xff]  }
  0x13   :  { %125 = vperm.xlu0 %781, %v99_v48   ;;  %v102_v54 = vld [vmem:[%s1042_s2 + $0x38] sm:$0xff]  ;;  %v837_v55 = vld [vmem:[%s1041_s0 + $0x60] ss:$16 sps:$4 sm:$0xff]  }
  0x14   :  { %709 = vmatpush3.bf16.msra.mxu0 %v801_v19 }
  0x15   :  { %749 = vmatpush3.bf16.msra.mxu1 %v802_v20  ;;  %710 = vmatprep.subr.bf16.mxu0 %v803_v21 }
  0x16   :  { %750 = vmatprep.subr.bf16.mxu1 %v804_v22  ;;  %120 = vperm.xlu1 %782, %v98_v46  }
  0x17   :  { %135 = vperm.xlu0 %781, %v101_v53  }
  0x18   :  { %711 = vmatpush3.bf16.msra.mxu0 %v805_v23 }
  0x19   :  { %751 = vmatpush3.bf16.msra.mxu1 %v806_v24  ;;  %712 = vmatprep.subr.bf16.mxu0 %v807_v25 }
  0x1a   :  { %752 = vmatprep.subr.bf16.mxu1 %v808_v26  ;;  %130 = vperm.xlu1 %782, %v100_v51  }
  0x1c   :  { %713 = vmatpush3.bf16.msra.mxu0 %v809_v27 }
  0x1d   :  { %753 = vmatpush3.bf16.msra.mxu1 %v810_v28  ;;  %714 = vmatprep.subr.bf16.mxu0 %v811_v29 }
  0x1e   :  { %754 = vmatprep.subr.bf16.mxu1 %v812_v30  ;;  %140 = vperm.xlu1 %782, %v102_v54  }
  0x20   :  { %715 = vmatpush3.bf16.msra.mxu0 %v813_v31 }
  0x21   :  { %755 = vmatpush3.bf16.msra.mxu1 %v814_v32 }
  0x23   :  { %448 = vmatmul.mubr.bf16.vlgmr.msra.gmra.mrb[0].mxu0 %v815_v33 }
  0x24   :  { %513 = vmatmul.mubr.bf16.vlgmr.msra.gmra.mrb[0].mxu1 %v818_v35  ;;  %455 = vmatprep.mubr.bf16.mxu0 %v821_v37 }
  0x25   :  { %520 = vmatprep.mubr.bf16.mxu1 %v823_v38 }
  0x2b   :  { %456 = vmatmul.mubr.bf16.gmra.mrb[4].mxu0 %v825_v39 }
  0x2c   :  { %521 = vmatmul.mubr.bf16.gmra.mrb[4].mxu1 %v826_v40  ;;  %463 = vmatprep.mubr.bf16.mxu0 %v827_v41 }
  0x2d   :  { %528 = vmatprep.mubr.bf16.mxu1 %v829_v42 }
  0x33   :  { %464 = vmatmul.mubr.bf16.gmra.mrb[8].mxu0 %v831_v47 }
  0x34   :  { %529 = vmatmul.mubr.bf16.gmra.mrb[8].mxu1 %v832_v49  ;;  %471 = vmatprep.mubr.bf16.mxu0 %v833_v50 }
  0x35   :  { %536 = vmatprep.mubr.bf16.mxu1 %v835_v52 }
  0x3b   :  { %472 = vmatmul.mubr.bf16.gmra.mrb[12].mxu0 %v837_v55 }
  0x3c   :  { %537 = vmatmul.mubr.bf16.gmra.mrb[12].mxu1 %v838_v56 }
  0x89   :  { %v106_v57 = vpop.permute.xlu0 %105 }
  0x8e   :  { %v111_v59 = vpop.permute.xlu0 %110 }
  0x91   :  { %v116_v10 = vpop.permute.xlu1 %115 }
  0x92   :  { %v126_v35 = vpop.permute.xlu0 %125 }
  0x95   :  { %v121_v29 = vpop.permute.xlu1 %120 }
  0x96   :  { %v136_v56 = vpop.permute.xlu0 %135 }
  0x99   :  { %v131_v52 = vpop.permute.xlu1 %130 }
  0xf6   :  { %v716_v58 = vpop.f32.mrb[0].mxu0 }
  0xf7   :  { %v756_v60 = vpop.f32.mrb[0].mxu1  ;;  %v717_v61 = vpop.f32.mrb[1].mxu0 }
  0xf8   :  { %v718_v62 = vadd.f32 %v717_v61, %v716_v58  ;;  %v757_v63 = vpop.f32.mrb[1].mxu1  ;;  %v719_v0 = vpop.f32.mrb[2].mxu0 }
  0xf9   :  { %v758_v1 = vadd.f32 %v757_v63, %v756_v60  ;;  %v759_v2 = vpop.f32.mrb[2].mxu1  ;;  %v720_v3 = vpop.f32.mrb[3].mxu0 }
  0xfa   :  { %v450_v4 = vadd.f32 %v718_v62, %v106_v57  ;;  %v721_v5 = vadd.f32 %v720_v3, %v719_v0  ;;  %v760_v6 = vpop.f32.mrb[3].mxu1 }
  0xfb   :  { %v761_v7 = vadd.f32 %v760_v6, %v759_v2 }
  0xfc   :  { %v515_v8 = vadd.f32 %v758_v1, %v450_v4  ;;  %v453_v9 = vadd.f32 %v721_v5, %v111_v59 }
  0xfe   :  { %v553_v11 = vmul.f32 0.1, %v515_v8  ;;  %v518_v12 = vadd.f32 %v761_v7, %v453_v9  ;;  %v722_v13 = vpop.f32.mrb[4].mxu0  ;;  %vm545_vm0 = vcmp.ge.f32.partialorder %v515_v8, 0.0 }
  0xff   :  { %v762_v14 = vpop.f32.mrb[4].mxu1  ;;  %v723_v15 = vpop.f32.mrb[5].mxu0 }
 0x100   :  { %vm546_vm1 = vcmp.ge.f32.partialorder %v518_v12, 0.0  ;;  %v554_v16 = vmul.f32 0.1, %v518_v12  ;;  %v724_v17 = vadd.f32 %v723_v15, %v722_v13  ;;  %v763_v18 = vpop.f32.mrb[5].mxu1  ;;  %v725_v19 = vpop.f32.mrb[6].mxu0  ;;  %v561_v23 = vsel %vm545_vm0, %v515_v8, %v553_v11 }
 0x101   :  { %v764_v20 = vadd.f32 %v763_v18, %v762_v14  ;;  %v765_v21 = vpop.f32.mrb[6].mxu1  ;;  %v726_v22 = vpop.f32.mrb[7].mxu0 }
 0x102   :  { %v562_v24 = vsel %vm546_vm1, %v518_v12, %v554_v16  ;;  %v458_v25 = vadd.f32 %v724_v17, %v116_v10  ;;  %v727_v26 = vadd.f32 %v726_v22, %v725_v19  ;;  %v766_v27 = vpop.f32.mrb[7].mxu1  ;;  %v141_v10 = vpop.permute.xlu1 %140 }
 0x103   :  { %v680_v28 = vpack.c.bf16 %v562_v24, %v561_v23  ;;  %v767_v30 = vadd.f32 %v766_v27, %v765_v21 }
 0x104   :  { %v523_v31 = vadd.f32 %v764_v20, %v458_v25  ;;  %v461_v32 = vadd.f32 %v727_v26, %v121_v29 }
 0x105   :  { %681 = vst [vmem:[%s1043_s3] sm:$0xff] %v680_v28  }
 0x106   :  { %v555_v33 = vmul.f32 0.1, %v523_v31  ;;  %v526_v34 = vadd.f32 %v767_v30, %v461_v32  ;;  %v728_v36 = vpop.f32.mrb[8].mxu0  ;;  %vm547_vm2 = vcmp.ge.f32.partialorder %v523_v31, 0.0 }
 0x107   :  { %v768_v37 = vpop.f32.mrb[8].mxu1  ;;  %v729_v38 = vpop.f32.mrb[9].mxu0 }
 0x108   :  { %vm548_vm3 = vcmp.ge.f32.partialorder %v526_v34, 0.0  ;;  %v556_v39 = vmul.f32 0.1, %v526_v34  ;;  %v730_v40 = vadd.f32 %v729_v38, %v728_v36  ;;  %v769_v41 = vpop.f32.mrb[9].mxu1  ;;  %v731_v42 = vpop.f32.mrb[10].mxu0  ;;  %v563_v46 = vsel %vm547_vm2, %v523_v31, %v555_v33 }
 0x109   :  { %v770_v43 = vadd.f32 %v769_v41, %v768_v37  ;;  %v771_v44 = vpop.f32.mrb[10].mxu1  ;;  %v732_v45 = vpop.f32.mrb[11].mxu0 }
 0x10a   :  { %v564_v47 = vsel %vm548_vm3, %v526_v34, %v556_v39  ;;  %v466_v48 = vadd.f32 %v730_v40, %v126_v35  ;;  %v733_v49 = vadd.f32 %v732_v45, %v731_v42  ;;  %v772_v50 = vpop.f32.mrb[11].mxu1 }
 0x10b   :  { %v685_v51 = vpack.c.bf16 %v564_v47, %v563_v46  ;;  %v773_v53 = vadd.f32 %v772_v50, %v771_v44 }
 0x10c   :  { %v531_v54 = vadd.f32 %v770_v43, %v466_v48  ;;  %v469_v55 = vadd.f32 %v733_v49, %v131_v52 }
 0x10d   :  { %697 = vst [vmem:[%s1043_s3 + $0x8] sm:$0xff] %v685_v51  }
 0x10e   :  { %v557_v57 = vmul.f32 0.1, %v531_v54  ;;  %v534_v58 = vadd.f32 %v773_v53, %v469_v55  ;;  %v734_v59 = vpop.f32.mrb[12].mxu0  ;;  %vm549_vm4 = vcmp.ge.f32.partialorder %v531_v54, 0.0 }
 0x10f   :  { %v774_v60 = vpop.f32.mrb[12].mxu1  ;;  %v735_v61 = vpop.f32.mrb[13].mxu0 }
 0x110   :  { %vm550_vm5 = vcmp.ge.f32.partialorder %v534_v58, 0.0  ;;  %v558_v62 = vmul.f32 0.1, %v534_v58  ;;  %v736_v63 = vadd.f32 %v735_v61, %v734_v59  ;;  %v775_v0 = vpop.f32.mrb[13].mxu1  ;;  %v737_v1 = vpop.f32.mrb[14].mxu0  ;;  %v565_v5 = vsel %vm549_vm4, %v531_v54, %v557_v57 }
 0x111   :  { %v776_v2 = vadd.f32 %v775_v0, %v774_v60  ;;  %v777_v3 = vpop.f32.mrb[14].mxu1  ;;  %v738_v4 = vpop.f32.mrb[15].mxu0 }
 0x112   :  { %v566_v6 = vsel %vm550_vm5, %v534_v58, %v558_v62  ;;  %v474_v7 = vadd.f32 %v736_v63, %v136_v56  ;;  %v739_v8 = vadd.f32 %v738_v4, %v737_v1  ;;  %v778_v9 = vpop.f32.mrb[15].mxu1 }
 0x113   :  { %v690_v11 = vpack.c.bf16 %v566_v6, %v565_v5  ;;  %v779_v12 = vadd.f32 %v778_v9, %v777_v3 }
 0x114   :  { %v539_v13 = vadd.f32 %v776_v2, %v474_v7  ;;  %v477_v14 = vadd.f32 %v739_v8, %v141_v10 }
 0x115   :  { %698 = vst [vmem:[%s1043_s3 + $0x10] sm:$0xff] %v690_v11  }
 0x116   :  { %v559_v15 = vmul.f32 0.1, %v539_v13  ;;  %v542_v16 = vadd.f32 %v779_v12, %v477_v14  ;;  %vm551_vm6 = vcmp.ge.f32.partialorder %v539_v13, 0.0 }
 0x118   :  { %vm552_vm7 = vcmp.ge.f32.partialorder %v542_v16, 0.0  ;;  %v560_v17 = vmul.f32 0.1, %v542_v16  ;;  %v567_v18 = vsel %vm551_vm6, %v539_v13, %v559_v15 }
 0x11a   :  { %v568_v19 = vsel %vm552_vm7, %v542_v16, %v560_v17 }
 0x11b   :  { %v695_v20 = vpack.c.bf16 %v568_v19, %v567_v18 }
 0x11d   :  { %699 = vst [vmem:[%s1043_s3 + $0x18] sm:$0xff] %v695_v20  }

// kernel: discriminator_forward.5
= control target key start
LH: loop header
LB: loop body
LE: loop exit
PB: predicated region body
PF: predicated region fallthrough
CT: control target
= control target key end

     0   :  { %vm6063_vm4 = vcmask 7168   ;;  %s10769_s1 = inlined_call_operand.vmem [shape: bf16[3200,512], index: 1, kind: input, shape index: {}]   ;;  %s10770_s0 = inlined_call_operand.vmem [shape: bf16[8,3200], index: 0, kind: input, shape index: {}]   ;;  %s10771_s4 = inlined_call_operand.<no memory space> [shape: f32[1,1], index: 4, kind: input, shape index: {}]   ;;  %s10772_s2 = inlined_call_operand.vmem [shape: f32[1,512], index: 2, kind: input, shape index: {}]   ;;  %s10773_s3 = inlined_call_operand.vmem [shape: f32[1,512], index: 3, kind: input, shape index: {}]   ;;  %s10774_s5 = inlined_call_operand.vmem [shape: f32[8,1], index: 5, kind: output, shape index: {}]  }
   0x1   :  { %v6996_v0 = vld [vmem:[%s10769_s1 + $0x4] ss:$16 sps:$4 sm:$0xff]   ;;  %v6998_v1 = vld [vmem:[%s10769_s1 + $0xc] ss:$16 sps:$4 sm:$0xff]   ;;  %v7000_v2 = vld [vmem:[%s10769_s1] ss:$16 sps:$4 sm:$0xff]  }
   0x2   :  { %4946 = vmatprep.subr.bf16.mxu0 %v6996_v0  ;;  %v7001_v3 = vld [vmem:[%s10769_s1 + $0x8] ss:$16 sps:$4 sm:$0xff]   ;;  %5479 = vmatprep.subr.bf16.mxu1 %v6998_v1  ;;  %v7002_v4 = vld [vmem:[%s10769_s1 + $0x24] ss:$16 sps:$4 sm:$0xff]   ;;  %v7004_v5 = vld [vmem:[%s10769_s1 + $0x2c] ss:$16 sps:$4 sm:$0xff]  }
   0x3   :  { %4947 = vmatpush1.bf16.msra.mxu0 %v7000_v2  ;;  %5480 = vmatpush1.bf16.msra.mxu1 %v7001_v3  ;;  %v7006_v6 = vld [vmem:[%s10769_s1 + $0x20] ss:$16 sps:$4 sm:$0xff]   ;;  %v7007_v7 = vld [vmem:[%s10769_s1 + $0x28] ss:$16 sps:$4 sm:$0xff]   ;;  %v7008_v8 = vld [vmem:[%s10769_s1 + $0x44] ss:$16 sps:$4 sm:$0xff]  }
   0x4   :  { %4948 = vmatprep.subr.bf16.mxu0 %v7002_v4  ;;  %5481 = vmatprep.subr.bf16.mxu1 %v7004_v5  ;;  %v7010_v9 = vld [vmem:[%s10769_s1 + $0x4c] ss:$16 sps:$4 sm:$0xff]   ;;  %v7012_v10 = vld [vmem:[%s10769_s1 + $0x40] ss:$16 sps:$4 sm:$0xff]   ;;  %v7013_v11 = vld [vmem:[%s10769_s1 + $0x48] ss:$16 sps:$4 sm:$0xff]  }
   0x5   :  { %v7014_v12 = vld [vmem:[%s10769_s1 + $0x64] ss:$16 sps:$4 sm:$0xff]   ;;  %v7016_v13 = vld [vmem:[%s10769_s1 + $0x6c] ss:$16 sps:$4 sm:$0xff]   ;;  %v7018_v14 = vld [vmem:[%s10769_s1 + $0x60] ss:$16 sps:$4 sm:$0xff]  }
   0x6   :  { %v7019_v15 = vld [vmem:[%s10769_s1 + $0x68] ss:$16 sps:$4 sm:$0xff]   ;;  %v7020_v16 = vld [vmem:[%s10769_s1 + $0x84] ss:$16 sps:$4 sm:$0xff]   ;;  %v7022_v17 = vld [vmem:[%s10769_s1 + $0x8c] ss:$16 sps:$4 sm:$0xff]  }
   0x7   :  { %4949 = vmatpush1.bf16.msra.mxu0 %v7006_v6  ;;  %5482 = vmatpush1.bf16.msra.mxu1 %v7007_v7  ;;  %v7024_v18 = vld [vmem:[%s10769_s1 + $0x80] ss:$16 sps:$4 sm:$0xff]   ;;  %v7025_v19 = vld [vmem:[%s10769_s1 + $0x88] ss:$16 sps:$4 sm:$0xff]   ;;  %v7026_v20 = vld [vmem:[%s10769_s1 + $0xa4] ss:$16 sps:$4 sm:$0xff]  }
   0x8   :  { %4950 = vmatprep.subr.bf16.mxu0 %v7008_v8  ;;  %5483 = vmatprep.subr.bf16.mxu1 %v7010_v9  ;;  %v7028_v21 = vld [vmem:[%s10769_s1 + $0xac] ss:$16 sps:$4 sm:$0xff]   ;;  %v7030_v22 = vld [vmem:[%s10769_s1 + $0xa0] ss:$16 sps:$4 sm:$0xff]   ;;  %v7031_v23 = vld [vmem:[%s10769_s1 + $0xa8] ss:$16 sps:$4 sm:$0xff]  }
   0x9   :  { %v7032_v24 = vld [vmem:[%s10769_s1 + $0xc4] ss:$16 sps:$4 sm:$0xff]   ;;  %v7034_v25 = vld [vmem:[%s10769_s1 + $0xcc] ss:$16 sps:$4 sm:$0xff]   ;;  %v7036_v26 = vld [vmem:[%s10769_s1 + $0xc0] ss:$16 sps:$4 sm:$0xff]  }
   0xa   :  { %v7037_v27 = vld [vmem:[%s10769_s1 + $0xc8] ss:$16 sps:$4 sm:$0xff]   ;;  %v7038_v28 = vld [vmem:[%s10769_s1 + $0xe4] ss:$16 sps:$4 sm:$0xff]   ;;  %v7040_v29 = vld [vmem:[%s10769_s1 + $0xec] ss:$16 sps:$4 sm:$0xff]  }
   0xb   :  { %4951 = vmatpush1.bf16.msra.mxu0 %v7012_v10  ;;  %5484 = vmatpush1.bf16.msra.mxu1 %v7013_v11  ;;  %v7042_v30 = vld [vmem:[%s10769_s1 + $0xe0] ss:$16 sps:$4 sm:$0xff]   ;;  %v7043_v31 = vld [vmem:[%s10769_s1 + $0xe8] ss:$16 sps:$4 sm:$0xff]   ;;  %v7044_v32 = vld [vmem:[%s10769_s1 + $0x104] ss:$16 sps:$4 sm:$0xff]  }
   0xc   :  { %4952 = vmatprep.subr.bf16.mxu0 %v7014_v12  ;;  %5485 = vmatprep.subr.bf16.mxu1 %v7016_v13  ;;  %v7046_v33 = vld [vmem:[%s10769_s1 + $0x10c] ss:$16 sps:$4 sm:$0xff]   ;;  %v7048_v34 = vld [vmem:[%s10769_s1 + $0x100] ss:$16 sps:$4 sm:$0xff]   ;;  %v7049_v35 = vld [vmem:[%s10769_s1 + $0x108] ss:$16 sps:$4 sm:$0xff]  }
   0xd   :  { %v7050_v36 = vld [vmem:[%s10769_s1 + $0x124] ss:$16 sps:$4 sm:$0xff]   ;;  %v7052_v37 = vld [vmem:[%s10769_s1 + $0x12c] ss:$16 sps:$4 sm:$0xff]   ;;  %v7054_v38 = vld [vmem:[%s10769_s1 + $0x120] ss:$16 sps:$4 sm:$0xff]  }
   0xe   :  { %v7055_v39 = vld [vmem:[%s10769_s1 + $0x128] ss:$16 sps:$4 sm:$0xff]   ;;  %v7056_v40 = vld [vmem:[%s10769_s1 + $0x144] ss:$16 sps:$4 sm:$0xff]   ;;  %v7058_v41 = vld [vmem:[%s10769_s1 + $0x14c] ss:$16 sps:$4 sm:$0xff]  }
   0xf   :  { %4953 = vmatpush1.bf16.msra.mxu0 %v7018_v14  ;;  %5486 = vmatpush1.bf16.msra.mxu1 %v7019_v15  ;;  %v7060_v42 = vld [vmem:[%s10769_s1 + $0x140] ss:$16 sps:$4 sm:$0xff]   ;;  %v7061_v43 = vld [vmem:[%s10769_s1 + $0x148] ss:$16 sps:$4 sm:$0xff]   ;;  %v7062_v44 = vld [vmem:[%s10769_s1 + $0x164] ss:$16 sps:$4 sm:$0xff]  }
  0x10   :  { %4954 = vmatprep.subr.bf16.mxu0 %v7020_v16  ;;  %5487 = vmatprep.subr.bf16.mxu1 %v7022_v17  ;;  %v7064_v45 = vld [vmem:[%s10769_s1 + $0x16c] ss:$16 sps:$4 sm:$0xff]   ;;  %v23_v46 = vld [vmem:[%s10770_s0] sm:$0xff]  ;;  %v7067_v49 = vld [vmem:[%s10769_s1 + $0x168] ss:$16 sps:$4 sm:$0xff]  }
  0x11   :  { %v7066_v47 = vld [vmem:[%s10769_s1 + $0x160] ss:$16 sps:$4 sm:$0xff]   ;;  %v6070_v48 = vcombine.high %v23_v46, %v23_v46  ;;  %v7068_v50 = vld [vmem:[%s10769_s1 + $0x184] ss:$16 sps:$4 sm:$0xff]   ;;  %v7070_v51 = vld [vmem:[%s10769_s1 + $0x18c] ss:$16 sps:$4 sm:$0xff]   ;;  %v6069_v4 = vcombine.low %v23_v46, %v23_v46 }
  0x12   :  { %v7072_v52 = vld [vmem:[%s10769_s1 + $0x180] ss:$16 sps:$4 sm:$0xff]   ;;  %v7073_v53 = vld [vmem:[%s10769_s1 + $0x188] ss:$16 sps:$4 sm:$0xff]   ;;  %v7074_v54 = vld [vmem:[%s10769_s1 + $0x1a4] ss:$16 sps:$4 sm:$0xff]  }
  0x13   :  { %4955 = vmatpush1.bf16.msra.mxu0 %v7024_v18  ;;  %5488 = vmatpush1.bf16.msra.mxu1 %v7025_v19  ;;  %v7076_v55 = vld [vmem:[%s10769_s1 + $0x1ac] ss:$16 sps:$4 sm:$0xff]   ;;  %v7078_v56 = vld [vmem:[%s10769_s1 + $0x1a0] ss:$16 sps:$4 sm:$0xff]   ;;  %v7079_v57 = vld [vmem:[%s10769_s1 + $0x1a8] ss:$16 sps:$4 sm:$0xff]  }
  0x14   :  { %4956 = vmatprep.subr.bf16.mxu0 %v7026_v20  ;;  %5489 = vmatprep.subr.bf16.mxu1 %v7028_v21  ;;  %v7080_v58 = vld [vmem:[%s10769_s1 + $0x1c4] ss:$16 sps:$4 sm:$0xff]   ;;  %v7082_v59 = vld [vmem:[%s10769_s1 + $0x1cc] ss:$16 sps:$4 sm:$0xff]   ;;  %v7084_v60 = vld [vmem:[%s10769_s1 + $0x1c0] ss:$16 sps:$4 sm:$0xff]  }
  0x15   :  { %4978 = vmatprep.mubr.bf16.mxu0 %v6070_v48  ;;  %5511 = vmatprep.mubr.bf16.mxu1 %v6070_v48  ;;  %v7085_v61 = vld [vmem:[%s10769_s1 + $0x1c8] ss:$16 sps:$4 sm:$0xff]   ;;  %v7086_v62 = vld [vmem:[%s10769_s1 + $0x1e4] ss:$16 sps:$4 sm:$0xff]   ;;  %v7088_v63 = vld [vmem:[%s10769_s1 + $0x1ec] ss:$16 sps:$4 sm:$0xff]  }
  0x16   :  { %v7090_v0 = vld [vmem:[%s10769_s1 + $0x1e0] ss:$16 sps:$4 sm:$0xff]   ;;  %v7091_v1 = vld [vmem:[%s10769_s1 + $0x1e8] ss:$16 sps:$4 sm:$0xff]   ;;  %v7096_v2 = vld [vmem:[%s10769_s1 + $0x204] ss:$16 sps:$4 sm:$0xff]  }
  0x17   :  { %4957 = vmatpush1.bf16.msra.mxu0 %v7030_v22  ;;  %5490 = vmatpush1.bf16.msra.mxu1 %v7031_v23  ;;  %v7099_v3 = vld [vmem:[%s10769_s1 + $0x20c] ss:$16 sps:$4 sm:$0xff]   ;;  %v7094_v5 = vld [vmem:[%s10769_s1 + $0x200] ss:$16 sps:$4 sm:$0xff]   ;;  %v7097_v6 = vld [vmem:[%s10769_s1 + $0x208] ss:$16 sps:$4 sm:$0xff]  }
  0x18   :  { %4958 = vmatprep.subr.bf16.mxu0 %v7032_v24  ;;  %5491 = vmatprep.subr.bf16.mxu1 %v7034_v25  ;;  %v7102_v7 = vld [vmem:[%s10769_s1 + $0x224] ss:$16 sps:$4 sm:$0xff]   ;;  %v7105_v8 = vld [vmem:[%s10769_s1 + $0x22c] ss:$16 sps:$4 sm:$0xff]   ;;  %v7100_v9 = vld [vmem:[%s10769_s1 + $0x220] ss:$16 sps:$4 sm:$0xff]  }
  0x19   :  { %v7103_v10 = vld [vmem:[%s10769_s1 + $0x228] ss:$16 sps:$4 sm:$0xff]   ;;  %v7108_v11 = vld [vmem:[%s10769_s1 + $0x244] ss:$16 sps:$4 sm:$0xff]   ;;  %v7111_v12 = vld [vmem:[%s10769_s1 + $0x24c] ss:$16 sps:$4 sm:$0xff]  }
  0x1a   :  { %v7106_v13 = vld [vmem:[%s10769_s1 + $0x240] ss:$16 sps:$4 sm:$0xff]   ;;  %v7109_v14 = vld [vmem:[%s10769_s1 + $0x248] ss:$16 sps:$4 sm:$0xff]   ;;  %v7114_v15 = vld [vmem:[%s10769_s1 + $0x264] ss:$16 sps:$4 sm:$0xff]  }
  0x1b   :  { %4959 = vmatpush1.bf16.msra.mxu0 %v7036_v26  ;;  %5492 = vmatpush1.bf16.msra.mxu1 %v7037_v27  ;;  %v7117_v16 = vld [vmem:[%s10769_s1 + $0x26c] ss:$16 sps:$4 sm:$0xff]   ;;  %v7112_v17 = vld [vmem:[%s10769_s1 + $0x260] ss:$16 sps:$4 sm:$0xff]   ;;  %v7115_v18 = vld [vmem:[%s10769_s1 + $0x268] ss:$16 sps:$4 sm:$0xff]  }
  0x1c   :  { %4960 = vmatprep.subr.bf16.mxu0 %v7038_v28  ;;  %5493 = vmatprep.subr.bf16.mxu1 %v7040_v29  ;;  %v7120_v19 = vld [vmem:[%s10769_s1 + $0x284] ss:$16 sps:$4 sm:$0xff]   ;;  %v7123_v20 = vld [vmem:[%s10769_s1 + $0x28c] ss:$16 sps:$4 sm:$0xff]   ;;  %v7118_v21 = vld [vmem:[%s10769_s1 + $0x280] ss:$16 sps:$4 sm:$0xff]  }
  0x1d   :  { %v7121_v22 = vld [vmem:[%s10769_s1 + $0x288] ss:$16 sps:$4 sm:$0xff]   ;;  %v7126_v23 = vld [vmem:[%s10769_s1 + $0x2a4] ss:$16 sps:$4 sm:$0xff]   ;;  %v7129_v24 = vld [vmem:[%s10769_s1 + $0x2ac] ss:$16 sps:$4 sm:$0xff]  }
  0x1e   :  { %v7124_v25 = vld [vmem:[%s10769_s1 + $0x2a0] ss:$16 sps:$4 sm:$0xff]   ;;  %v7127_v26 = vld [vmem:[%s10769_s1 + $0x2a8] ss:$16 sps:$4 sm:$0xff]   ;;  %v7132_v27 = vld [vmem:[%s10769_s1 + $0x2c4] ss:$16 sps:$4 sm:$0xff]  }
  0x1f   :  { %4961 = vmatpush1.bf16.msra.mxu0 %v7042_v30  ;;  %5494 = vmatpush1.bf16.msra.mxu1 %v7043_v31  ;;  %v7135_v28 = vld [vmem:[%s10769_s1 + $0x2cc] ss:$16 sps:$4 sm:$0xff]   ;;  %v7130_v31 = vld [vmem:[%s10769_s1 + $0x2c0] ss:$16 sps:$4 sm:$0xff]   ;;  %v7157_v48 = vld [vmem:[%s10769_s1 + $0x348] ss:$16 sps:$4 sm:$0xff]  }
  0x20   :  { %4962 = vmatprep.subr.bf16.mxu0 %v7044_v32  ;;  %5495 = vmatprep.subr.bf16.mxu1 %v7046_v33  ;;  %v8528_v29 = vld [vmem:[%s10770_s0 + $0x8] sm:$0xff]  ;;  %v7138_v33 = vld [vmem:[%s10769_s1 + $0x2e4] ss:$16 sps:$4 sm:$0xff]  }
  0x21   :  { %v6072_v30 = vcombine.high %v8528_v29, %v8528_v29  ;;  %v7133_v32 = vld [vmem:[%s10769_s1 + $0x2c8] ss:$16 sps:$4 sm:$0xff]   ;;  %v7159_v46 = vld [vmem:[%s10769_s1 + $0x34c] ss:$16 sps:$4 sm:$0xff]  }
  0x23   :  { %4963 = vmatpush1.bf16.msra.mxu0 %v7048_v34  ;;  %5496 = vmatpush1.bf16.msra.mxu1 %v7049_v35  ;;  %v7141_v34 = vld [vmem:[%s10769_s1 + $0x2ec] ss:$16 sps:$4 sm:$0xff]   ;;  %v7136_v35 = vld [vmem:[%s10769_s1 + $0x2e0] ss:$16 sps:$4 sm:$0xff]  }
  0x24   :  { %4964 = vmatprep.subr.bf16.mxu0 %v7050_v36  ;;  %5497 = vmatprep.subr.bf16.mxu1 %v7052_v37  ;;  %v7139_v36 = vld [vmem:[%s10769_s1 + $0x2e8] ss:$16 sps:$4 sm:$0xff]   ;;  %v7144_v37 = vld [vmem:[%s10769_s1 + $0x304] ss:$16 sps:$4 sm:$0xff]  }
  0x27   :  { %4965 = vmatpush1.bf16.msra.mxu0 %v7054_v38  ;;  %5498 = vmatpush1.bf16.msra.mxu1 %v7055_v39  ;;  %v7147_v38 = vld [vmem:[%s10769_s1 + $0x30c] ss:$16 sps:$4 sm:$0xff]   ;;  %v7142_v39 = vld [vmem:[%s10769_s1 + $0x300] ss:$16 sps:$4 sm:$0xff]  }
  0x28   :  { %4966 = vmatprep.subr.bf16.mxu0 %v7056_v40  ;;  %5499 = vmatprep.subr.bf16.mxu1 %v7058_v41  ;;  %v7145_v40 = vld [vmem:[%s10769_s1 + $0x308] ss:$16 sps:$4 sm:$0xff]   ;;  %v7150_v41 = vld [vmem:[%s10769_s1 + $0x324] ss:$16 sps:$4 sm:$0xff]  }
  0x2b   :  { %4967 = vmatpush1.bf16.msra.mxu0 %v7060_v42  ;;  %5500 = vmatpush1.bf16.msra.mxu1 %v7061_v43  ;;  %v7153_v42 = vld [vmem:[%s10769_s1 + $0x32c] ss:$16 sps:$4 sm:$0xff]   ;;  %v7148_v43 = vld [vmem:[%s10769_s1 + $0x320] ss:$16 sps:$4 sm:$0xff]  }
  0x2c   :  { %4968 = vmatprep.subr.bf16.mxu0 %v7062_v44  ;;  %5501 = vmatprep.subr.bf16.mxu1 %v7064_v45  ;;  %v7151_v44 = vld [vmem:[%s10769_s1 + $0x328] ss:$16 sps:$4 sm:$0xff]   ;;  %v7156_v45 = vld [vmem:[%s10769_s1 + $0x344] ss:$16 sps:$4 sm:$0xff]  }
  0x2f   :  { %4969 = vmatpush1.bf16.msra.mxu0 %v7066_v47  ;;  %5502 = vmatpush1.bf16.msra.mxu1 %v7067_v49  ;;  %v7154_v47 = vld [vmem:[%s10769_s1 + $0x340] ss:$16 sps:$4 sm:$0xff]   ;;  %v7162_v49 = vld [vmem:[%s10769_s1 + $0x364] ss:$16 sps:$4 sm:$0xff]  }
  0x30   :  { %4970 = vmatprep.subr.bf16.mxu0 %v7068_v50  ;;  %5503 = vmatprep.subr.bf16.mxu1 %v7070_v51  ;;  %v7165_v50 = vld [vmem:[%s10769_s1 + $0x36c] ss:$16 sps:$4 sm:$0xff]   ;;  %v7160_v51 = vld [vmem:[%s10769_s1 + $0x360] ss:$16 sps:$4 sm:$0xff]  }
  0x33   :  { %4971 = vmatpush1.bf16.msra.mxu0 %v7072_v52  ;;  %5504 = vmatpush1.bf16.msra.mxu1 %v7073_v53  ;;  %v7163_v52 = vld [vmem:[%s10769_s1 + $0x368] ss:$16 sps:$4 sm:$0xff]   ;;  %v7168_v53 = vld [vmem:[%s10769_s1 + $0x384] ss:$16 sps:$4 sm:$0xff]  }
  0x34   :  { %4972 = vmatprep.subr.bf16.mxu0 %v7074_v54  ;;  %5505 = vmatprep.subr.bf16.mxu1 %v7076_v55  ;;  %v7171_v54 = vld [vmem:[%s10769_s1 + $0x38c] ss:$16 sps:$4 sm:$0xff]   ;;  %v7166_v55 = vld [vmem:[%s10769_s1 + $0x380] ss:$16 sps:$4 sm:$0xff]  }
  0x37   :  { %4973 = vmatpush1.bf16.msra.mxu0 %v7078_v56  ;;  %5506 = vmatpush1.bf16.msra.mxu1 %v7079_v57  ;;  %v7169_v56 = vld [vmem:[%s10769_s1 + $0x388] ss:$16 sps:$4 sm:$0xff]   ;;  %v7174_v57 = vld [vmem:[%s10769_s1 + $0x3a4] ss:$16 sps:$4 sm:$0xff]  }
  0x38   :  { %4974 = vmatprep.subr.bf16.mxu0 %v7080_v58  ;;  %5507 = vmatprep.subr.bf16.mxu1 %v7082_v59  ;;  %v7177_v58 = vld [vmem:[%s10769_s1 + $0x3ac] ss:$16 sps:$4 sm:$0xff]   ;;  %v7172_v59 = vld [vmem:[%s10769_s1 + $0x3a0] ss:$16 sps:$4 sm:$0xff]  }
  0x3b   :  { %4975 = vmatpush1.bf16.msra.mxu0 %v7084_v60  ;;  %5508 = vmatpush1.bf16.msra.mxu1 %v7085_v61  ;;  %v7175_v60 = vld [vmem:[%s10769_s1 + $0x3a8] ss:$16 sps:$4 sm:$0xff]   ;;  %v7180_v61 = vld [vmem:[%s10769_s1 + $0x3c4] ss:$16 sps:$4 sm:$0xff]  }
  0x3c   :  { %4976 = vmatprep.subr.bf16.mxu0 %v7086_v62  ;;  %5509 = vmatprep.subr.bf16.mxu1 %v7088_v63  ;;  %v7183_v62 = vld [vmem:[%s10769_s1 + $0x3cc] ss:$16 sps:$4 sm:$0xff]   ;;  %v7178_v63 = vld [vmem:[%s10769_s1 + $0x3c0] ss:$16 sps:$4 sm:$0xff]  }
  0x3f   :  { %4977 = vmatpush1.bf16.msra.mxu0 %v7090_v0  ;;  %5510 = vmatpush1.bf16.msra.mxu1 %v7091_v1  ;;  %v7181_v0 = vld [vmem:[%s10769_s1 + $0x3c8] ss:$16 sps:$4 sm:$0xff]   ;;  %v7186_v1 = vld [vmem:[%s10769_s1 + $0x3e4] ss:$16 sps:$4 sm:$0xff]  }
  0x40   :  { %4987 = vmatprep.subr.bf16.mxu0 %v7096_v2  ;;  %5520 = vmatprep.subr.bf16.mxu1 %v7099_v3  ;;  %v7189_v2 = vld [vmem:[%s10769_s1 + $0x3ec] ss:$16 sps:$4 sm:$0xff]   ;;  %v7184_v3 = vld [vmem:[%s10769_s1 + $0x3e0] ss:$16 sps:$4 sm:$0xff]  }
  0x42   :  { %4979 = vmatmul.mubr.bf16.vlgmr.msra.gmra.mrb[0].mxu0 %v6069_v4  ;;  %5512 = vmatmul.mubr.bf16.vlgmr.msra.gmra.mrb[0].mxu1 %v6069_v4  ;;  %v7187_v4 = vld [vmem:[%s10769_s1 + $0x3e8] ss:$16 sps:$4 sm:$0xff]  }
  0x43   :  { %4988 = vmatpush1.bf16.msra.mxu0 %v7094_v5  ;;  %5521 = vmatpush1.bf16.msra.mxu1 %v7097_v6  ;;  %v7194_v5 = vld [vmem:[%s10769_s1 + $0x404] ss:$16 sps:$4 sm:$0xff]   ;;  %v7197_v6 = vld [vmem:[%s10769_s1 + $0x40c] ss:$16 sps:$4 sm:$0xff]  }
  0x44   :  { %4989 = vmatprep.subr.bf16.mxu0 %v7102_v7  ;;  %5522 = vmatprep.subr.bf16.mxu1 %v7105_v8  ;;  %v6071_v7 = vcombine.low %v8528_v29, %v8528_v29  ;;  %v7192_v8 = vld [vmem:[%s10769_s1 + $0x400] ss:$16 sps:$4 sm:$0xff]   ;;  %v7227_v29 = vld [vmem:[%s10769_s1 + $0x4ac] ss:$16 sps:$4 sm:$0xff]  }
  0x45   :  { %5019 = vmatprep.mubr.bf16.mxu0 %v6072_v30  ;;  %5552 = vmatprep.mubr.bf16.mxu1 %v6072_v30  ;;  %v7222_v30 = vld [vmem:[%s10769_s1 + $0x4a0] ss:$16 sps:$4 sm:$0xff]  }
  0x47   :  { %4990 = vmatpush1.bf16.msra.mxu0 %v7100_v9  ;;  %5523 = vmatpush1.bf16.msra.mxu1 %v7103_v10  ;;  %v7195_v9 = vld [vmem:[%s10769_s1 + $0x408] ss:$16 sps:$4 sm:$0xff]   ;;  %v7200_v10 = vld [vmem:[%s10769_s1 + $0x424] ss:$16 sps:$4 sm:$0xff]  }
  0x48   :  { %4991 = vmatprep.subr.bf16.mxu0 %v7108_v11  ;;  %5524 = vmatprep.subr.bf16.mxu1 %v7111_v12  ;;  %v8666_v11 = vld [vmem:[%s10770_s0 + $0x10] sm:$0xff]  ;;  %v7203_v12 = vld [vmem:[%s10769_s1 + $0x42c] ss:$16 sps:$4 sm:$0xff]  }
  0x4b   :  { %4992 = vmatpush1.bf16.msra.mxu0 %v7106_v13  ;;  %5525 = vmatpush1.bf16.msra.mxu1 %v7109_v14  ;;  %v6074_v13 = vcombine.high %v8666_v11, %v8666_v11  ;;  %v7198_v14 = vld [vmem:[%s10769_s1 + $0x420] ss:$16 sps:$4 sm:$0xff]  }
  0x4c   :  { %4993 = vmatprep.subr.bf16.mxu0 %v7114_v15  ;;  %5526 = vmatprep.subr.bf16.mxu1 %v7117_v16  ;;  %v7201_v15 = vld [vmem:[%s10769_s1 + $0x428] ss:$16 sps:$4 sm:$0xff]   ;;  %v7206_v16 = vld [vmem:[%s10769_s1 + $0x444] ss:$16 sps:$4 sm:$0xff]  }
  0x4f   :  { %4994 = vmatpush1.bf16.msra.mxu0 %v7112_v17  ;;  %5527 = vmatpush1.bf16.msra.mxu1 %v7115_v18  ;;  %v7209_v17 = vld [vmem:[%s10769_s1 + $0x44c] ss:$16 sps:$4 sm:$0xff]   ;;  %v7204_v18 = vld [vmem:[%s10769_s1 + $0x440] ss:$16 sps:$4 sm:$0xff]  }
  0x50   :  { %4995 = vmatprep.subr.bf16.mxu0 %v7120_v19  ;;  %5528 = vmatprep.subr.bf16.mxu1 %v7123_v20  ;;  %v7207_v19 = vld [vmem:[%s10769_s1 + $0x448] ss:$16 sps:$4 sm:$0xff]   ;;  %v7212_v20 = vld [vmem:[%s10769_s1 + $0x464] ss:$16 sps:$4 sm:$0xff]  }
  0x53   :  { %4996 = vmatpush1.bf16.msra.mxu0 %v7118_v21  ;;  %5529 = vmatpush1.bf16.msra.mxu1 %v7121_v22  ;;  %v7215_v21 = vld [vmem:[%s10769_s1 + $0x46c] ss:$16 sps:$4 sm:$0xff]   ;;  %v7210_v22 = vld [vmem:[%s10769_s1 + $0x460] ss:$16 sps:$4 sm:$0xff]  }
  0x54   :  { %4997 = vmatprep.subr.bf16.mxu0 %v7126_v23  ;;  %5530 = vmatprep.subr.bf16.mxu1 %v7129_v24  ;;  %v7213_v23 = vld [vmem:[%s10769_s1 + $0x468] ss:$16 sps:$4 sm:$0xff]   ;;  %v7218_v24 = vld [vmem:[%s10769_s1 + $0x484] ss:$16 sps:$4 sm:$0xff]  }
  0x57   :  { %4998 = vmatpush1.bf16.msra.mxu0 %v7124_v25  ;;  %5531 = vmatpush1.bf16.msra.mxu1 %v7127_v26  ;;  %v7221_v25 = vld [vmem:[%s10769_s1 + $0x48c] ss:$16 sps:$4 sm:$0xff]   ;;  %v7216_v26 = vld [vmem:[%s10769_s1 + $0x480] ss:$16 sps:$4 sm:$0xff]  }
  0x58   :  { %4999 = vmatprep.subr.bf16.mxu0 %v7132_v27  ;;  %5532 = vmatprep.subr.bf16.mxu1 %v7135_v28  ;;  %v7219_v27 = vld [vmem:[%s10769_s1 + $0x488] ss:$16 sps:$4 sm:$0xff]   ;;  %v7224_v28 = vld [vmem:[%s10769_s1 + $0x4a4] ss:$16 sps:$4 sm:$0xff]  }
  0x5b   :  { %5000 = vmatpush1.bf16.msra.mxu0 %v7130_v31  ;;  %5533 = vmatpush1.bf16.msra.mxu1 %v7133_v32  ;;  %v7225_v31 = vld [vmem:[%s10769_s1 + $0x4a8] ss:$16 sps:$4 sm:$0xff]   ;;  %v7230_v32 = vld [vmem:[%s10769_s1 + $0x4c4] ss:$16 sps:$4 sm:$0xff]  }
  0x5c   :  { %5001 = vmatprep.subr.bf16.mxu0 %v7138_v33  ;;  %5534 = vmatprep.subr.bf16.mxu1 %v7141_v34  ;;  %v7233_v33 = vld [vmem:[%s10769_s1 + $0x4cc] ss:$16 sps:$4 sm:$0xff]   ;;  %v7228_v34 = vld [vmem:[%s10769_s1 + $0x4c0] ss:$16 sps:$4 sm:$0xff]  }
  0x5f   :  { %5002 = vmatpush1.bf16.msra.mxu0 %v7136_v35  ;;  %5535 = vmatpush1.bf16.msra.mxu1 %v7139_v36  ;;  %v7231_v35 = vld [vmem:[%s10769_s1 + $0x4c8] ss:$16 sps:$4 sm:$0xff]   ;;  %v7236_v36 = vld [vmem:[%s10769_s1 + $0x4e4] ss:$16 sps:$4 sm:$0xff]  }
  0x60   :  { %5003 = vmatprep.subr.bf16.mxu0 %v7144_v37  ;;  %5536 = vmatprep.subr.bf16.mxu1 %v7147_v38  ;;  %v7239_v37 = vld [vmem:[%s10769_s1 + $0x4ec] ss:$16 sps:$4 sm:$0xff]   ;;  %v7234_v38 = vld [vmem:[%s10769_s1 + $0x4e0] ss:$16 sps:$4 sm:$0xff]  }
  0x63   :  { %5004 = vmatpush1.bf16.msra.mxu0 %v7142_v39  ;;  %5537 = vmatpush1.bf16.msra.mxu1 %v7145_v40  ;;  %v7237_v39 = vld [vmem:[%s10769_s1 + $0x4e8] ss:$16 sps:$4 sm:$0xff]   ;;  %v7242_v40 = vld [vmem:[%s10769_s1 + $0x504] ss:$16 sps:$4 sm:$0xff]  }
  0x64   :  { %5005 = vmatprep.subr.bf16.mxu0 %v7150_v41  ;;  %5538 = vmatprep.subr.bf16.mxu1 %v7153_v42  ;;  %v7245_v41 = vld [vmem:[%s10769_s1 + $0x50c] ss:$16 sps:$4 sm:$0xff]   ;;  %v7240_v42 = vld [vmem:[%s10769_s1 + $0x500] ss:$16 sps:$4 sm:$0xff]  }
  0x67   :  { %5006 = vmatpush1.bf16.msra.mxu0 %v7148_v43  ;;  %5539 = vmatpush1.bf16.msra.mxu1 %v7151_v44  ;;  %v7243_v43 = vld [vmem:[%s10769_s1 + $0x508] ss:$16 sps:$4 sm:$0xff]   ;;  %v7248_v44 = vld [vmem:[%s10769_s1 + $0x524] ss:$16 sps:$4 sm:$0xff]  }
  0x68   :  { %5007 = vmatprep.subr.bf16.mxu0 %v7156_v45  ;;  %5540 = vmatprep.subr.bf16.mxu1 %v7159_v46  ;;  %v7251_v45 = vld [vmem:[%s10769_s1 + $0x52c] ss:$16 sps:$4 sm:$0xff]   ;;  %v7246_v46 = vld [vmem:[%s10769_s1 + $0x520] ss:$16 sps:$4 sm:$0xff]  }
  0x6b   :  { %5008 = vmatpush1.bf16.msra.mxu0 %v7154_v47  ;;  %5541 = vmatpush1.bf16.msra.mxu1 %v7157_v48  ;;  %v7249_v47 = vld [vmem:[%s10769_s1 + $0x528] ss:$16 sps:$4 sm:$0xff]   ;;  %v7254_v48 = vld [vmem:[%s10769_s1 + $0x544] ss:$16 sps:$4 sm:$0xff]  }
  0x6c   :  { %5009 = vmatprep.subr.bf16.mxu0 %v7162_v49  ;;  %5542 = vmatprep.subr.bf16.mxu1 %v7165_v50  ;;  %v7257_v49 = vld [vmem:[%s10769_s1 + $0x54c] ss:$16 sps:$4 sm:$0xff]   ;;  %v7252_v50 = vld [vmem:[%s10769_s1 + $0x540] ss:$16 sps:$4 sm:$0xff]  }
  0x6f   :  { %5010 = vmatpush1.bf16.msra.mxu0 %v7160_v51  ;;  %5543 = vmatpush1.bf16.msra.mxu1 %v7163_v52  ;;  %v7255_v51 = vld [vmem:[%s10769_s1 + $0x548] ss:$16 sps:$4 sm:$0xff]   ;;  %v7260_v52 = vld [vmem:[%s10769_s1 + $0x564] ss:$16 sps:$4 sm:$0xff]  }
  0x70   :  { %5011 = vmatprep.subr.bf16.mxu0 %v7168_v53  ;;  %5544 = vmatprep.subr.bf16.mxu1 %v7171_v54  ;;  %v7263_v53 = vld [vmem:[%s10769_s1 + $0x56c] ss:$16 sps:$4 sm:$0xff]   ;;  %v7258_v54 = vld [vmem:[%s10769_s1 + $0x560] ss:$16 sps:$4 sm:$0xff]  }
  0x73   :  { %5012 = vmatpush1.bf16.msra.mxu0 %v7166_v55  ;;  %5545 = vmatpush1.bf16.msra.mxu1 %v7169_v56  ;;  %v7261_v55 = vld [vmem:[%s10769_s1 + $0x568] ss:$16 sps:$4 sm:$0xff]   ;;  %v7266_v56 = vld [vmem:[%s10769_s1 + $0x584] ss:$16 sps:$4 sm:$0xff]  }
  0x74   :  { %5013 = vmatprep.subr.bf16.mxu0 %v7174_v57  ;;  %5546 = vmatprep.subr.bf16.mxu1 %v7177_v58  ;;  %v7269_v57 = vld [vmem:[%s10769_s1 + $0x58c] ss:$16 sps:$4 sm:$0xff]   ;;  %v7264_v58 = vld [vmem:[%s10769_s1 + $0x580] ss:$16 sps:$4 sm:$0xff]  }
  0x77   :  { %5014 = vmatpush1.bf16.msra.mxu0 %v7172_v59  ;;  %5547 = vmatpush1.bf16.msra.mxu1 %v7175_v60  ;;  %v7267_v59 = vld [vmem:[%s10769_s1 + $0x588] ss:$16 sps:$4 sm:$0xff]   ;;  %v7272_v60 = vld [vmem:[%s10769_s1 + $0x5a4] ss:$16 sps:$4 sm:$0xff]  }
  0x78   :  { %5015 = vmatprep.subr.bf16.mxu0 %v7180_v61  ;;  %5548 = vmatprep.subr.bf16.mxu1 %v7183_v62  ;;  %v7275_v61 = vld [vmem:[%s10769_s1 + $0x5ac] ss:$16 sps:$4 sm:$0xff]   ;;  %v7270_v62 = vld [vmem:[%s10769_s1 + $0x5a0] ss:$16 sps:$4 sm:$0xff]  }
  0x7b   :  { %5016 = vmatpush1.bf16.msra.mxu0 %v7178_v63  ;;  %5549 = vmatpush1.bf16.msra.mxu1 %v7181_v0  ;;  %v7273_v63 = vld [vmem:[%s10769_s1 + $0x5a8] ss:$16 sps:$4 sm:$0xff]   ;;  %v7278_v0 = vld [vmem:[%s10769_s1 + $0x5c4] ss:$16 sps:$4 sm:$0xff]  }
  0x7c   :  { %5017 = vmatprep.subr.bf16.mxu0 %v7186_v1  ;;  %5550 = vmatprep.subr.bf16.mxu1 %v7189_v2  ;;  %v7281_v1 = vld [vmem:[%s10769_s1 + $0x5cc] ss:$16 sps:$4 sm:$0xff]   ;;  %v7276_v2 = vld [vmem:[%s10769_s1 + $0x5c0] ss:$16 sps:$4 sm:$0xff]  }
  0x7f   :  { %5018 = vmatpush1.bf16.msra.mxu0 %v7184_v3  ;;  %5551 = vmatpush1.bf16.msra.mxu1 %v7187_v4  ;;  %v7279_v3 = vld [vmem:[%s10769_s1 + $0x5c8] ss:$16 sps:$4 sm:$0xff]   ;;  %v7284_v4 = vld [vmem:[%s10769_s1 + $0x5e4] ss:$16 sps:$4 sm:$0xff]  }
  0x80   :  { %5028 = vmatprep.subr.bf16.mxu0 %v7194_v5  ;;  %5561 = vmatprep.subr.bf16.mxu1 %v7197_v6  ;;  %v7287_v5 = vld [vmem:[%s10769_s1 + $0x5ec] ss:$16 sps:$4 sm:$0xff]   ;;  %v7282_v6 = vld [vmem:[%s10769_s1 + $0x5e0] ss:$16 sps:$4 sm:$0xff]  }
  0x82   :  { %5020 = vmatmul.mubr.bf16.vlgmr.msra.gmra.mrb[0].mxu0 %v6071_v7  ;;  %5553 = vmatmul.mubr.bf16.vlgmr.msra.gmra.mrb[0].mxu1 %v6071_v7  ;;  %v7285_v7 = vld [vmem:[%s10769_s1 + $0x5e8] ss:$16 sps:$4 sm:$0xff]  }
  0x83   :  { %5029 = vmatpush1.bf16.msra.mxu0 %v7192_v8  ;;  %5562 = vmatpush1.bf16.msra.mxu1 %v7195_v9  ;;  %v7292_v8 = vld [vmem:[%s10769_s1 + $0x604] ss:$16 sps:$4 sm:$0xff]   ;;  %v7295_v9 = vld [vmem:[%s10769_s1 + $0x60c] ss:$16 sps:$4 sm:$0xff]  }
  0x84   :  { %5030 = vmatprep.subr.bf16.mxu0 %v7200_v10  ;;  %5563 = vmatprep.subr.bf16.mxu1 %v7203_v12  ;;  %v7290_v10 = vld [vmem:[%s10769_s1 + $0x600] ss:$16 sps:$4 sm:$0xff]   ;;  %v6073_v12 = vcombine.low %v8666_v11, %v8666_v11  ;;  %v7301_v11 = vld [vmem:[%s10769_s1 + $0x62c] ss:$16 sps:$4 sm:$0xff]  }
  0x85   :  { %5060 = vmatprep.mubr.bf16.mxu0 %v6074_v13  ;;  %5593 = vmatprep.mubr.bf16.mxu1 %v6074_v13  ;;  %v7293_v13 = vld [vmem:[%s10769_s1 + $0x608] ss:$16 sps:$4 sm:$0xff]  }
  0x87   :  { %5031 = vmatpush1.bf16.msra.mxu0 %v7198_v14  ;;  %5564 = vmatpush1.bf16.msra.mxu1 %v7201_v15  ;;  %v8864_v14 = vld [vmem:[%s10770_s0 + $0x18] sm:$0xff]  ;;  %v7298_v15 = vld [vmem:[%s10769_s1 + $0x624] ss:$16 sps:$4 sm:$0xff]  }
  0x88   :  { %5032 = vmatprep.subr.bf16.mxu0 %v7206_v16  ;;  %5565 = vmatprep.subr.bf16.mxu1 %v7209_v17  ;;  %v6076_v16 = vcombine.high %v8864_v14, %v8864_v14  ;;  %v7296_v17 = vld [vmem:[%s10769_s1 + $0x620] ss:$16 sps:$4 sm:$0xff]  }
  0x8b   :  { %5033 = vmatpush1.bf16.msra.mxu0 %v7204_v18  ;;  %5566 = vmatpush1.bf16.msra.mxu1 %v7207_v19  ;;  %v7299_v18 = vld [vmem:[%s10769_s1 + $0x628] ss:$16 sps:$4 sm:$0xff]   ;;  %v7304_v19 = vld [vmem:[%s10769_s1 + $0x644] ss:$16 sps:$4 sm:$0xff]  }
  0x8c   :  { %5034 = vmatprep.subr.bf16.mxu0 %v7212_v20  ;;  %5567 = vmatprep.subr.bf16.mxu1 %v7215_v21  ;;  %v7307_v20 = vld [vmem:[%s10769_s1 + $0x64c] ss:$16 sps:$4 sm:$0xff]   ;;  %v7302_v21 = vld [vmem:[%s10769_s1 + $0x640] ss:$16 sps:$4 sm:$0xff]  }
  0x8f   :  { %5035 = vmatpush1.bf16.msra.mxu0 %v7210_v22  ;;  %5568 = vmatpush1.bf16.msra.mxu1 %v7213_v23  ;;  %v7305_v22 = vld [vmem:[%s10769_s1 + $0x648] ss:$16 sps:$4 sm:$0xff]   ;;  %v7310_v23 = vld [vmem:[%s10769_s1 + $0x664] ss:$16 sps:$4 sm:$0xff]  }
  0x90   :  { %5036 = vmatprep.subr.bf16.mxu0 %v7218_v24  ;;  %5569 = vmatprep.subr.bf16.mxu1 %v7221_v25  ;;  %v7313_v24 = vld [vmem:[%s10769_s1 + $0x66c] ss:$16 sps:$4 sm:$0xff]   ;;  %v7308_v25 = vld [vmem:[%s10769_s1 + $0x660] ss:$16 sps:$4 sm:$0xff]  }
  0x93   :  { %5037 = vmatpush1.bf16.msra.mxu0 %v7216_v26  ;;  %5570 = vmatpush1.bf16.msra.mxu1 %v7219_v27  ;;  %v7311_v26 = vld [vmem:[%s10769_s1 + $0x668] ss:$16 sps:$4 sm:$0xff]   ;;  %v7316_v27 = vld [vmem:[%s10769_s1 + $0x684] ss:$16 sps:$4 sm:$0xff]  }
  0x94   :  { %5038 = vmatprep.subr.bf16.mxu0 %v7224_v28  ;;  %5571 = vmatprep.subr.bf16.mxu1 %v7227_v29  ;;  %v7319_v28 = vld [vmem:[%s10769_s1 + $0x68c] ss:$16 sps:$4 sm:$0xff]   ;;  %v7314_v29 = vld [vmem:[%s10769_s1 + $0x680] ss:$16 sps:$4 sm:$0xff]  }
  0x97   :  { %5039 = vmatpush1.bf16.msra.mxu0 %v7222_v30  ;;  %5572 = vmatpush1.bf16.msra.mxu1 %v7225_v31  ;;  %v7317_v30 = vld [vmem:[%s10769_s1 + $0x688] ss:$16 sps:$4 sm:$0xff]   ;;  %v7322_v31 = vld [vmem:[%s10769_s1 + $0x6a4] ss:$16 sps:$4 sm:$0xff]  }
  0x98   :  { %5040 = vmatprep.subr.bf16.mxu0 %v7230_v32  ;;  %5573 = vmatprep.subr.bf16.mxu1 %v7233_v33  ;;  %v7325_v32 = vld [vmem:[%s10769_s1 + $0x6ac] ss:$16 sps:$4 sm:$0xff]   ;;  %v7320_v33 = vld [vmem:[%s10769_s1 + $0x6a0] ss:$16 sps:$4 sm:$0xff]  }
  0x9b   :  { %5041 = vmatpush1.bf16.msra.mxu0 %v7228_v34  ;;  %5574 = vmatpush1.bf16.msra.mxu1 %v7231_v35  ;;  %v7323_v34 = vld [vmem:[%s10769_s1 + $0x6a8] ss:$16 sps:$4 sm:$0xff]   ;;  %v7328_v35 = vld [vmem:[%s10769_s1 + $0x6c4] ss:$16 sps:$4 sm:$0xff]  }
  0x9c   :  { %5042 = vmatprep.subr.bf16.mxu0 %v7236_v36  ;;  %5575 = vmatprep.subr.bf16.mxu1 %v7239_v37  ;;  %v7331_v36 = vld [vmem:[%s10769_s1 + $0x6cc] ss:$16 sps:$4 sm:$0xff]   ;;  %v7326_v37 = vld [vmem:[%s10769_s1 + $0x6c0] ss:$16 sps:$4 sm:$0xff]  }
  0x9f   :  { %5043 = vmatpush1.bf16.msra.mxu0 %v7234_v38  ;;  %5576 = vmatpush1.bf16.msra.mxu1 %v7237_v39  ;;  %v7329_v38 = vld [vmem:[%s10769_s1 + $0x6c8] ss:$16 sps:$4 sm:$0xff]   ;;  %v7334_v39 = vld [vmem:[%s10769_s1 + $0x6e4] ss:$16 sps:$4 sm:$0xff]  }
  0xa0   :  { %5044 = vmatprep.subr.bf16.mxu0 %v7242_v40  ;;  %5577 = vmatprep.subr.bf16.mxu1 %v7245_v41  ;;  %v7337_v40 = vld [vmem:[%s10769_s1 + $0x6ec] ss:$16 sps:$4 sm:$0xff]   ;;  %v7332_v41 = vld [vmem:[%s10769_s1 + $0x6e0] ss:$16 sps:$4 sm:$0xff]  }
  0xa3   :  { %5045 = vmatpush1.bf16.msra.mxu0 %v7240_v42  ;;  %5578 = vmatpush1.bf16.msra.mxu1 %v7243_v43  ;;  %v7335_v42 = vld [vmem:[%s10769_s1 + $0x6e8] ss:$16 sps:$4 sm:$0xff]   ;;  %v7340_v43 = vld [vmem:[%s10769_s1 + $0x704] ss:$16 sps:$4 sm:$0xff]  }
  0xa4   :  { %5046 = vmatprep.subr.bf16.mxu0 %v7248_v44  ;;  %5579 = vmatprep.subr.bf16.mxu1 %v7251_v45  ;;  %v7343_v44 = vld [vmem:[%s10769_s1 + $0x70c] ss:$16 sps:$4 sm:$0xff]   ;;  %v7338_v45 = vld [vmem:[%s10769_s1 + $0x700] ss:$16 sps:$4 sm:$0xff]  }
  0xa7   :  { %5047 = vmatpush1.bf16.msra.mxu0 %v7246_v46  ;;  %5580 = vmatpush1.bf16.msra.mxu1 %v7249_v47  ;;  %v7341_v46 = vld [vmem:[%s10769_s1 + $0x708] ss:$16 sps:$4 sm:$0xff]   ;;  %v7346_v47 = vld [vmem:[%s10769_s1 + $0x724] ss:$16 sps:$4 sm:$0xff]  }
  0xa8   :  { %5048 = vmatprep.subr.bf16.mxu0 %v7254_v48  ;;  %5581 = vmatprep.subr.bf16.mxu1 %v7257_v49  ;;  %v7349_v48 = vld [vmem:[%s10769_s1 + $0x72c] ss:$16 sps:$4 sm:$0xff]   ;;  %v7344_v49 = vld [vmem:[%s10769_s1 + $0x720] ss:$16 sps:$4 sm:$0xff]  }
  0xab   :  { %5049 = vmatpush1.bf16.msra.mxu0 %v7252_v50  ;;  %5582 = vmatpush1.bf16.msra.mxu1 %v7255_v51  ;;  %v7347_v50 = vld [vmem:[%s10769_s1 + $0x728] ss:$16 sps:$4 sm:$0xff]   ;;  %v7352_v51 = vld [vmem:[%s10769_s1 + $0x744] ss:$16 sps:$4 sm:$0xff]  }
  0xac   :  { %5050 = vmatprep.subr.bf16.mxu0 %v7260_v52  ;;  %5583 = vmatprep.subr.bf16.mxu1 %v7263_v53  ;;  %v7355_v52 = vld [vmem:[%s10769_s1 + $0x74c] ss:$16 sps:$4 sm:$0xff]   ;;  %v7350_v53 = vld [vmem:[%s10769_s1 + $0x740] ss:$16 sps:$4 sm:$0xff]  }
  0xaf   :  { %5051 = vmatpush1.bf16.msra.mxu0 %v7258_v54  ;;  %5584 = vmatpush1.bf16.msra.mxu1 %v7261_v55  ;;  %v7353_v54 = vld [vmem:[%s10769_s1 + $0x748] ss:$16 sps:$4 sm:$0xff]   ;;  %v7358_v55 = vld [vmem:[%s10769_s1 + $0x764] ss:$16 sps:$4 sm:$0xff]  }
  0xb0   :  { %5052 = vmatprep.subr.bf16.mxu0 %v7266_v56  ;;  %5585 = vmatprep.subr.bf16.mxu1 %v7269_v57  ;;  %v7361_v56 = vld [vmem:[%s10769_s1 + $0x76c] ss:$16 sps:$4 sm:$0xff]   ;;  %v7356_v57 = vld [vmem:[%s10769_s1 + $0x760] ss:$16 sps:$4 sm:$0xff]  }
  0xb3   :  { %5053 = vmatpush1.bf16.msra.mxu0 %v7264_v58  ;;  %5586 = vmatpush1.bf16.msra.mxu1 %v7267_v59  ;;  %v7359_v58 = vld [vmem:[%s10769_s1 + $0x768] ss:$16 sps:$4 sm:$0xff]   ;;  %v7364_v59 = vld [vmem:[%s10769_s1 + $0x784] ss:$16 sps:$4 sm:$0xff]  }
  0xb4   :  { %5054 = vmatprep.subr.bf16.mxu0 %v7272_v60  ;;  %5587 = vmatprep.subr.bf16.mxu1 %v7275_v61  ;;  %v7367_v60 = vld [vmem:[%s10769_s1 + $0x78c] ss:$16 sps:$4 sm:$0xff]   ;;  %v7362_v61 = vld [vmem:[%s10769_s1 + $0x780] ss:$16 sps:$4 sm:$0xff]  }
  0xb7   :  { %5055 = vmatpush1.bf16.msra.mxu0 %v7270_v62  ;;  %5588 = vmatpush1.bf16.msra.mxu1 %v7273_v63  ;;  %v7365_v62 = vld [vmem:[%s10769_s1 + $0x788] ss:$16 sps:$4 sm:$0xff]   ;;  %v7370_v63 = vld [vmem:[%s10769_s1 + $0x7a4] ss:$16 sps:$4 sm:$0xff]  }
  0xb8   :  { %5056 = vmatprep.subr.bf16.mxu0 %v7278_v0  ;;  %5589 = vmatprep.subr.bf16.mxu1 %v7281_v1  ;;  %v7373_v0 = vld [vmem:[%s10769_s1 + $0x7ac] ss:$16 sps:$4 sm:$0xff]   ;;  %v7368_v1 = vld [vmem:[%s10769_s1 + $0x7a0] ss:$16 sps:$4 sm:$0xff]  }
  0xbb   :  { %5057 = vmatpush1.bf16.msra.mxu0 %v7276_v2  ;;  %5590 = vmatpush1.bf16.msra.mxu1 %v7279_v3  ;;  %v7371_v2 = vld [vmem:[%s10769_s1 + $0x7a8] ss:$16 sps:$4 sm:$0xff]   ;;  %v7376_v3 = vld [vmem:[%s10769_s1 + $0x7c4] ss:$16 sps:$4 sm:$0xff]  }
  0xbc   :  { %5058 = vmatprep.subr.bf16.mxu0 %v7284_v4  ;;  %5591 = vmatprep.subr.bf16.mxu1 %v7287_v5  ;;  %v7379_v4 = vld [vmem:[%s10769_s1 + $0x7cc] ss:$16 sps:$4 sm:$0xff]   ;;  %v7374_v5 = vld [vmem:[%s10769_s1 + $0x7c0] ss:$16 sps:$4 sm:$0xff]  }
  0xbf   :  { %5059 = vmatpush1.bf16.msra.mxu0 %v7282_v6  ;;  %5592 = vmatpush1.bf16.msra.mxu1 %v7285_v7  ;;  %v7377_v6 = vld [vmem:[%s10769_s1 + $0x7c8] ss:$16 sps:$4 sm:$0xff]   ;;  %v7382_v7 = vld [vmem:[%s10769_s1 + $0x7e4] ss:$16 sps:$4 sm:$0xff]  }
  0xc0   :  { %5069 = vmatprep.subr.bf16.mxu0 %v7292_v8  ;;  %5602 = vmatprep.subr.bf16.mxu1 %v7295_v9  ;;  %v7385_v8 = vld [vmem:[%s10769_s1 + $0x7ec] ss:$16 sps:$4 sm:$0xff]   ;;  %v7380_v9 = vld [vmem:[%s10769_s1 + $0x7e0] ss:$16 sps:$4 sm:$0xff]  }
  0xc2   :  { %5061 = vmatmul.mubr.bf16.vlgmr.msra.gmra.mrb[0].mxu0 %v6073_v12  ;;  %5594 = vmatmul.mubr.bf16.vlgmr.msra.gmra.mrb[0].mxu1 %v6073_v12  ;;  %v7390_v12 = vld [vmem:[%s10769_s1 + $0x804] ss:$16 sps:$4 sm:$0xff]  }
  0xc3   :  { %5070 = vmatpush1.bf16.msra.mxu0 %v7290_v10  ;;  %5603 = vmatpush1.bf16.msra.mxu1 %v7293_v13  ;;  %v7383_v10 = vld [vmem:[%s10769_s1 + $0x7e8] ss:$16 sps:$4 sm:$0xff]   ;;  %v7393_v13 = vld [vmem:[%s10769_s1 + $0x80c] ss:$16 sps:$4 sm:$0xff]  }
  0xc4   :  { %5071 = vmatprep.subr.bf16.mxu0 %v7298_v15  ;;  %5604 = vmatprep.subr.bf16.mxu1 %v7301_v11  ;;  %v7388_v15 = vld [vmem:[%s10769_s1 + $0x800] ss:$16 sps:$4 sm:$0xff]   ;;  %v6075_v11 = vcombine.low %v8864_v14, %v8864_v14  ;;  %v7399_v14 = vld [vmem:[%s10769_s1 + $0x82c] ss:$16 sps:$4 sm:$0xff]  }
  0xc5   :  { %5101 = vmatprep.mubr.bf16.mxu0 %v6076_v16  ;;  %5634 = vmatprep.mubr.bf16.mxu1 %v6076_v16  ;;  %v9062_v16 = vld [vmem:[%s10770_s0 + $0x20] sm:$0xff] }
  0xc7   :  { %5072 = vmatpush1.bf16.msra.mxu0 %v7296_v17  ;;  %5605 = vmatpush1.bf16.msra.mxu1 %v7299_v18  ;;  %v7391_v17 = vld [vmem:[%s10769_s1 + $0x808] ss:$16 sps:$4 sm:$0xff]   ;;  %v7396_v18 = vld [vmem:[%s10769_s1 + $0x824] ss:$16 sps:$4 sm:$0xff]  }
  0xc8   :  { %5073 = vmatprep.subr.bf16.mxu0 %v7304_v19  ;;  %5606 = vmatprep.subr.bf16.mxu1 %v7307_v20  ;;  %v6078_v19 = vcombine.high %v9062_v16, %v9062_v16  ;;  %v7394_v20 = vld [vmem:[%s10769_s1 + $0x820] ss:$16 sps:$4 sm:$0xff]  }
  0xcb   :  { %5074 = vmatpush1.bf16.msra.mxu0 %v7302_v21  ;;  %5607 = vmatpush1.bf16.msra.mxu1 %v7305_v22  ;;  %v7397_v21 = vld [vmem:[%s10769_s1 + $0x828] ss:$16 sps:$4 sm:$0xff]   ;;  %v7402_v22 = vld [vmem:[%s10769_s1 + $0x844] ss:$16 sps:$4 sm:$0xff]  }
  0xcc   :  { %5075 = vmatprep.subr.bf16.mxu0 %v7310_v23  ;;  %5608 = vmatprep.subr.bf16.mxu1 %v7313_v24  ;;  %v7405_v23 = vld [vmem:[%s10769_s1 + $0x84c] ss:$16 sps:$4 sm:$0xff]   ;;  %v7400_v24 = vld [vmem:[%s10769_s1 + $0x840] ss:$16 sps:$4 sm:$0xff]  }
  0xcf   :  { %5076 = vmatpush1.bf16.msra.mxu0 %v7308_v25  ;;  %5609 = vmatpush1.bf16.msra.mxu1 %v7311_v26  ;;  %v7403_v25 = vld [vmem:[%s10769_s1 + $0x848] ss:$16 sps:$4 sm:$0xff]   ;;  %v7408_v26 = vld [vmem:[%s10769_s1 + $0x864] ss:$16 sps:$4 sm:$0xff]  }
  0xd0   :  { %5077 = vmatprep.subr.bf16.mxu0 %v7316_v27  ;;  %5610 = vmatprep.subr.bf16.mxu1 %v7319_v28  ;;  %v7411_v27 = vld [vmem:[%s10769_s1 + $0x86c] ss:$16 sps:$4 sm:$0xff]   ;;  %v7406_v28 = vld [vmem:[%s10769_s1 + $0x860] ss:$16 sps:$4 sm:$0xff]  }
  0xd3   :  { %5078 = vmatpush1.bf16.msra.mxu0 %v7314_v29  ;;  %5611 = vmatpush1.bf16.msra.mxu1 %v7317_v30  ;;  %v7409_v29 = vld [vmem:[%s10769_s1 + $0x868] ss:$16 sps:$4 sm:$0xff]   ;;  %v7414_v30 = vld [vmem:[%s10769_s1 + $0x884] ss:$16 sps:$4 sm:$0xff]  }
  0xd4   :  { %5079 = vmatprep.subr.bf16.mxu0 %v7322_v31  ;;  %5612 = vmatprep.subr.bf16.mxu1 %v7325_v32  ;;  %v7417_v31 = vld [vmem:[%s10769_s1 + $0x88c] ss:$16 sps:$4 sm:$0xff]   ;;  %v7412_v32 = vld [vmem:[%s10769_s1 + $0x880] ss:$16 sps:$4 sm:$0xff]  }
  0xd7   :  { %5080 = vmatpush1.bf16.msra.mxu0 %v7320_v33  ;;  %5613 = vmatpush1.bf16.msra.mxu1 %v7323_v34  ;;  %v7415_v33 = vld [vmem:[%s10769_s1 + $0x888] ss:$16 sps:$4 sm:$0xff]   ;;  %v7420_v34 = vld [vmem:[%s10769_s1 + $0x8a4] ss:$16 sps:$4 sm:$0xff]  }
  0xd8   :  { %5081 = vmatprep.subr.bf16.mxu0 %v7328_v35  ;;  %5614 = vmatprep.subr.bf16.mxu1 %v7331_v36  ;;  %v7423_v35 = vld [vmem:[%s10769_s1 + $0x8ac] ss:$16 sps:$4 sm:$0xff]   ;;  %v7418_v36 = vld [vmem:[%s10769_s1 + $0x8a0] ss:$16 sps:$4 sm:$0xff]  }
  0xdb   :  { %5082 = vmatpush1.bf16.msra.mxu0 %v7326_v37  ;;  %5615 = vmatpush1.bf16.msra.mxu1 %v7329_v38  ;;  %v7421_v37 = vld [vmem:[%s10769_s1 + $0x8a8] ss:$16 sps:$4 sm:$0xff]   ;;  %v7426_v38 = vld [vmem:[%s10769_s1 + $0x8c4] ss:$16 sps:$4 sm:$0xff]  }
  0xdc   :  { %5083 = vmatprep.subr.bf16.mxu0 %v7334_v39  ;;  %5616 = vmatprep.subr.bf16.mxu1 %v7337_v40  ;;  %v7429_v39 = vld [vmem:[%s10769_s1 + $0x8cc] ss:$16 sps:$4 sm:$0xff]   ;;  %v7424_v40 = vld [vmem:[%s10769_s1 + $0x8c0] ss:$16 sps:$4 sm:$0xff]  }
  0xdf   :  { %5084 = vmatpush1.bf16.msra.mxu0 %v7332_v41  ;;  %5617 = vmatpush1.bf16.msra.mxu1 %v7335_v42  ;;  %v7427_v41 = vld [vmem:[%s10769_s1 + $0x8c8] ss:$16 sps:$4 sm:$0xff]   ;;  %v7432_v42 = vld [vmem:[%s10769_s1 + $0x8e4] ss:$16 sps:$4 sm:$0xff]  }
  0xe0   :  { %5085 = vmatprep.subr.bf16.mxu0 %v7340_v43  ;;  %5618 = vmatprep.subr.bf16.mxu1 %v7343_v44  ;;  %v7435_v43 = vld [vmem:[%s10769_s1 + $0x8ec] ss:$16 sps:$4 sm:$0xff]   ;;  %v7430_v44 = vld [vmem:[%s10769_s1 + $0x8e0] ss:$16 sps:$4 sm:$0xff]  }
  0xe3   :  { %5086 = vmatpush1.bf16.msra.mxu0 %v7338_v45  ;;  %5619 = vmatpush1.bf16.msra.mxu1 %v7341_v46  ;;  %v7433_v45 = vld [vmem:[%s10769_s1 + $0x8e8] ss:$16 sps:$4 sm:$0xff]   ;;  %v7438_v46 = vld [vmem:[%s10769_s1 + $0x904] ss:$16 sps:$4 sm:$0xff]  }
  0xe4   :  { %5087 = vmatprep.subr.bf16.mxu0 %v7346_v47  ;;  %5620 = vmatprep.subr.bf16.mxu1 %v7349_v48  ;;  %v7441_v47 = vld [vmem:[%s10769_s1 + $0x90c] ss:$16 sps:$4 sm:$0xff]   ;;  %v7436_v48 = vld [vmem:[%s10769_s1 + $0x900] ss:$16 sps:$4 sm:$0xff]  }
  0xe7   :  { %5088 = vmatpush1.bf16.msra.mxu0 %v7344_v49  ;;  %5621 = vmatpush1.bf16.msra.mxu1 %v7347_v50  ;;  %v7439_v49 = vld [vmem:[%s10769_s1 + $0x908] ss:$16 sps:$4 sm:$0xff]   ;;  %v7444_v50 = vld [vmem:[%s10769_s1 + $0x924] ss:$16 sps:$4 sm:$0xff]  }
  0xe8   :  { %5089 = vmatprep.subr.bf16.mxu0 %v7352_v51  ;;  %5622 = vmatprep.subr.bf16.mxu1 %v7355_v52  ;;  %v7447_v51 = vld [vmem:[%s10769_s1 + $0x92c] ss:$16 sps:$4 sm:$0xff]   ;;  %v7442_v52 = vld [vmem:[%s10769_s1 + $0x920] ss:$16 sps:$4 sm:$0xff]  }
  0xeb   :  { %5090 = vmatpush1.bf16.msra.mxu0 %v7350_v53  ;;  %5623 = vmatpush1.bf16.msra.mxu1 %v7353_v54  ;;  %v7445_v53 = vld [vmem:[%s10769_s1 + $0x928] ss:$16 sps:$4 sm:$0xff]   ;;  %v7450_v54 = vld [vmem:[%s10769_s1 + $0x944] ss:$16 sps:$4 sm:$0xff]  }
  0xec   :  { %5091 = vmatprep.subr.bf16.mxu0 %v7358_v55  ;;  %5624 = vmatprep.subr.bf16.mxu1 %v7361_v56  ;;  %v7453_v55 = vld [vmem:[%s10769_s1 + $0x94c] ss:$16 sps:$4 sm:$0xff]   ;;  %v7448_v56 = vld [vmem:[%s10769_s1 + $0x940] ss:$16 sps:$4 sm:$0xff]  }
  0xef   :  { %5092 = vmatpush1.bf16.msra.mxu0 %v7356_v57  ;;  %5625 = vmatpush1.bf16.msra.mxu1 %v7359_v58  ;;  %v7451_v57 = vld [vmem:[%s10769_s1 + $0x948] ss:$16 sps:$4 sm:$0xff]   ;;  %v7456_v58 = vld [vmem:[%s10769_s1 + $0x964] ss:$16 sps:$4 sm:$0xff]  }
  0xf0   :  { %5093 = vmatprep.subr.bf16.mxu0 %v7364_v59  ;;  %5626 = vmatprep.subr.bf16.mxu1 %v7367_v60  ;;  %v7459_v59 = vld [vmem:[%s10769_s1 + $0x96c] ss:$16 sps:$4 sm:$0xff]   ;;  %v7454_v60 = vld [vmem:[%s10769_s1 + $0x960] ss:$16 sps:$4 sm:$0xff]  }
  0xf3   :  { %5094 = vmatpush1.bf16.msra.mxu0 %v7362_v61  ;;  %5627 = vmatpush1.bf16.msra.mxu1 %v7365_v62  ;;  %v7457_v61 = vld [vmem:[%s10769_s1 + $0x968] ss:$16 sps:$4 sm:$0xff]   ;;  %v7462_v62 = vld [vmem:[%s10769_s1 + $0x984] ss:$16 sps:$4 sm:$0xff]  }
  0xf4   :  { %5095 = vmatprep.subr.bf16.mxu0 %v7370_v63  ;;  %5628 = vmatprep.subr.bf16.mxu1 %v7373_v0  ;;  %v7465_v63 = vld [vmem:[%s10769_s1 + $0x98c] ss:$16 sps:$4 sm:$0xff]   ;;  %v7460_v0 = vld [vmem:[%s10769_s1 + $0x980] ss:$16 sps:$4 sm:$0xff]  }
  0xf7   :  { %5096 = vmatpush1.bf16.msra.mxu0 %v7368_v1  ;;  %5629 = vmatpush1.bf16.msra.mxu1 %v7371_v2  ;;  %v7463_v1 = vld [vmem:[%s10769_s1 + $0x988] ss:$16 sps:$4 sm:$0xff]   ;;  %v7468_v2 = vld [vmem:[%s10769_s1 + $0x9a4] ss:$16 sps:$4 sm:$0xff]  }
  0xf8   :  { %5097 = vmatprep.subr.bf16.mxu0 %v7376_v3  ;;  %5630 = vmatprep.subr.bf16.mxu1 %v7379_v4  ;;  %v7471_v3 = vld [vmem:[%s10769_s1 + $0x9ac] ss:$16 sps:$4 sm:$0xff]   ;;  %v7466_v4 = vld [vmem:[%s10769_s1 + $0x9a0] ss:$16 sps:$4 sm:$0xff]  }
  0xfb   :  { %5098 = vmatpush1.bf16.msra.mxu0 %v7374_v5  ;;  %5631 = vmatpush1.bf16.msra.mxu1 %v7377_v6  ;;  %v7469_v5 = vld [vmem:[%s10769_s1 + $0x9a8] ss:$16 sps:$4 sm:$0xff]   ;;  %v7474_v6 = vld [vmem:[%s10769_s1 + $0x9c4] ss:$16 sps:$4 sm:$0xff]  }
  0xfc   :  { %5099 = vmatprep.subr.bf16.mxu0 %v7382_v7  ;;  %5632 = vmatprep.subr.bf16.mxu1 %v7385_v8  ;;  %v7477_v7 = vld [vmem:[%s10769_s1 + $0x9cc] ss:$16 sps:$4 sm:$0xff]   ;;  %v7472_v8 = vld [vmem:[%s10769_s1 + $0x9c0] ss:$16 sps:$4 sm:$0xff]  }
  0xff   :  { %5100 = vmatpush1.bf16.msra.mxu0 %v7380_v9  ;;  %5633 = vmatpush1.bf16.msra.mxu1 %v7383_v10  ;;  %v7475_v9 = vld [vmem:[%s10769_s1 + $0x9c8] ss:$16 sps:$4 sm:$0xff]   ;;  %v7480_v10 = vld [vmem:[%s10769_s1 + $0x9e4] ss:$16 sps:$4 sm:$0xff]  }
 0x100   :  { %5110 = vmatprep.subr.bf16.mxu0 %v7390_v12  ;;  %5643 = vmatprep.subr.bf16.mxu1 %v7393_v13  ;;  %v7483_v12 = vld [vmem:[%s10769_s1 + $0x9ec] ss:$16 sps:$4 sm:$0xff]   ;;  %v7478_v13 = vld [vmem:[%s10769_s1 + $0x9e0] ss:$16 sps:$4 sm:$0xff]  }
 0x102   :  { %5102 = vmatmul.mubr.bf16.vlgmr.msra.gmra.mrb[0].mxu0 %v6075_v11  ;;  %5635 = vmatmul.mubr.bf16.vlgmr.msra.gmra.mrb[0].mxu1 %v6075_v11  ;;  %v7488_v11 = vld [vmem:[%s10769_s1 + $0xa04] ss:$16 sps:$4 sm:$0xff]  }
 0x103   :  { %5111 = vmatpush1.bf16.msra.mxu0 %v7388_v15  ;;  %5644 = vmatpush1.bf16.msra.mxu1 %v7391_v17  ;;  %v7481_v15 = vld [vmem:[%s10769_s1 + $0x9e8] ss:$16 sps:$4 sm:$0xff]   ;;  %v7491_v17 = vld [vmem:[%s10769_s1 + $0xa0c] ss:$16 sps:$4 sm:$0xff]  }
 0x104   :  { %5112 = vmatprep.subr.bf16.mxu0 %v7396_v18  ;;  %5645 = vmatprep.subr.bf16.mxu1 %v7399_v14  ;;  %v9258_v18 = vld [vmem:[%s10770_s0 + $0x28] sm:$0xff]  ;;  %v6077_v14 = vcombine.low %v9062_v16, %v9062_v16 }
 0x105   :  { %5142 = vmatprep.mubr.bf16.mxu0 %v6078_v19  ;;  %5675 = vmatprep.mubr.bf16.mxu1 %v6078_v19  ;;  %v7486_v19 = vld [vmem:[%s10769_s1 + $0xa00] ss:$16 sps:$4 sm:$0xff]   ;;  %v7497_v16 = vld [vmem:[%s10769_s1 + $0xa2c] ss:$16 sps:$4 sm:$0xff]  }
 0x107   :  { %5113 = vmatpush1.bf16.msra.mxu0 %v7394_v20  ;;  %5646 = vmatpush1.bf16.msra.mxu1 %v7397_v21  ;;  %v7489_v20 = vld [vmem:[%s10769_s1 + $0xa08] ss:$16 sps:$4 sm:$0xff]   ;;  %v7494_v21 = vld [vmem:[%s10769_s1 + $0xa24] ss:$16 sps:$4 sm:$0xff]  }
 0x108   :  { %5114 = vmatprep.subr.bf16.mxu0 %v7402_v22  ;;  %5647 = vmatprep.subr.bf16.mxu1 %v7405_v23  ;;  %v6080_v22 = vcombine.high %v9258_v18, %v9258_v18  ;;  %v7492_v23 = vld [vmem:[%s10769_s1 + $0xa20] ss:$16 sps:$4 sm:$0xff]  }
 0x10b   :  { %5115 = vmatpush1.bf16.msra.mxu0 %v7400_v24  ;;  %5648 = vmatpush1.bf16.msra.mxu1 %v7403_v25  ;;  %v7495_v24 = vld [vmem:[%s10769_s1 + $0xa28] ss:$16 sps:$4 sm:$0xff]   ;;  %v7500_v25 = vld [vmem:[%s10769_s1 + $0xa44] ss:$16 sps:$4 sm:$0xff]  }
 0x10c   :  { %5116 = vmatprep.subr.bf16.mxu0 %v7408_v26  ;;  %5649 = vmatprep.subr.bf16.mxu1 %v7411_v27  ;;  %v7503_v26 = vld [vmem:[%s10769_s1 + $0xa4c] ss:$16 sps:$4 sm:$0xff]   ;;  %v7498_v27 = vld [vmem:[%s10769_s1 + $0xa40] ss:$16 sps:$4 sm:$0xff]  }
 0x10f   :  { %5117 = vmatpush1.bf16.msra.mxu0 %v7406_v28  ;;  %5650 = vmatpush1.bf16.msra.mxu1 %v7409_v29  ;;  %v7501_v28 = vld [vmem:[%s10769_s1 + $0xa48] ss:$16 sps:$4 sm:$0xff]   ;;  %v7506_v29 = vld [vmem:[%s10769_s1 + $0xa64] ss:$16 sps:$4 sm:$0xff]  }
 0x110   :  { %5118 = vmatprep.subr.bf16.mxu0 %v7414_v30  ;;  %5651 = vmatprep.subr.bf16.mxu1 %v7417_v31  ;;  %v7509_v30 = vld [vmem:[%s10769_s1 + $0xa6c] ss:$16 sps:$4 sm:$0xff]   ;;  %v7504_v31 = vld [vmem:[%s10769_s1 + $0xa60] ss:$16 sps:$4 sm:$0xff]  }
 0x113   :  { %5119 = vmatpush1.bf16.msra.mxu0 %v7412_v32  ;;  %5652 = vmatpush1.bf16.msra.mxu1 %v7415_v33  ;;  %v7507_v32 = vld [vmem:[%s10769_s1 + $0xa68] ss:$16 sps:$4 sm:$0xff]   ;;  %v7512_v33 = vld [vmem:[%s10769_s1 + $0xa84] ss:$16 sps:$4 sm:$0xff]  }
 0x114   :  { %5120 = vmatprep.subr.bf16.mxu0 %v7420_v34  ;;  %5653 = vmatprep.subr.bf16.mxu1 %v7423_v35  ;;  %v7515_v34 = vld [vmem:[%s10769_s1 + $0xa8c] ss:$16 sps:$4 sm:$0xff]   ;;  %v7510_v35 = vld [vmem:[%s10769_s1 + $0xa80] ss:$16 sps:$4 sm:$0xff]  }
 0x117   :  { %5121 = vmatpush1.bf16.msra.mxu0 %v7418_v36  ;;  %5654 = vmatpush1.bf16.msra.mxu1 %v7421_v37  ;;  %v7513_v36 = vld [vmem:[%s10769_s1 + $0xa88] ss:$16 sps:$4 sm:$0xff]   ;;  %v7518_v37 = vld [vmem:[%s10769_s1 + $0xaa4] ss:$16 sps:$4 sm:$0xff]  }
 0x118   :  { %5122 = vmatprep.subr.bf16.mxu0 %v7426_v38  ;;  %5655 = vmatprep.subr.bf16.mxu1 %v7429_v39  ;;  %v7521_v38 = vld [vmem:[%s10769_s1 + $0xaac] ss:$16 sps:$4 sm:$0xff]   ;;  %v7516_v39 = vld [vmem:[%s10769_s1 + $0xaa0] ss:$16 sps:$4 sm:$0xff]  }
 0x11b   :  { %5123 = vmatpush1.bf16.msra.mxu0 %v7424_v40  ;;  %5656 = vmatpush1.bf16.msra.mxu1 %v7427_v41  ;;  %v7519_v40 = vld [vmem:[%s10769_s1 + $0xaa8] ss:$16 sps:$4 sm:$0xff]   ;;  %v7524_v41 = vld [vmem:[%s10769_s1 + $0xac4] ss:$16 sps:$4 sm:$0xff]  }
 0x11c   :  { %5124 = vmatprep.subr.bf16.mxu0 %v7432_v42  ;;  %5657 = vmatprep.subr.bf16.mxu1 %v7435_v43  ;;  %v7527_v42 = vld [vmem:[%s10769_s1 + $0xacc] ss:$16 sps:$4 sm:$0xff]   ;;  %v7522_v43 = vld [vmem:[%s10769_s1 + $0xac0] ss:$16 sps:$4 sm:$0xff]  }
 0x11f   :  { %5125 = vmatpush1.bf16.msra.mxu0 %v7430_v44  ;;  %5658 = vmatpush1.bf16.msra.mxu1 %v7433_v45  ;;  %v7525_v44 = vld [vmem:[%s10769_s1 + $0xac8] ss:$16 sps:$4 sm:$0xff]   ;;  %v7530_v45 = vld [vmem:[%s10769_s1 + $0xae4] ss:$16 sps:$4 sm:$0xff]  }
 0x120   :  { %5126 = vmatprep.subr.bf16.mxu0 %v7438_v46  ;;  %5659 = vmatprep.subr.bf16.mxu1 %v7441_v47  ;;  %v7533_v46 = vld [vmem:[%s10769_s1 + $0xaec] ss:$16 sps:$4 sm:$0xff]   ;;  %v7528_v47 = vld [vmem:[%s10769_s1 + $0xae0] ss:$16 sps:$4 sm:$0xff]  }
 0x123   :  { %5127 = vmatpush1.bf16.msra.mxu0 %v7436_v48  ;;  %5660 = vmatpush1.bf16.msra.mxu1 %v7439_v49  ;;  %v7531_v48 = vld [vmem:[%s10769_s1 + $0xae8] ss:$16 sps:$4 sm:$0xff]   ;;  %v7536_v49 = vld [vmem:[%s10769_s1 + $0xb04] ss:$16 sps:$4 sm:$0xff]  }
 0x124   :  { %5128 = vmatprep.subr.bf16.mxu0 %v7444_v50  ;;  %5661 = vmatprep.subr.bf16.mxu1 %v7447_v51  ;;  %v7539_v50 = vld [vmem:[%s10769_s1 + $0xb0c] ss:$16 sps:$4 sm:$0xff]   ;;  %v7534_v51 = vld [vmem:[%s10769_s1 + $0xb00] ss:$16 sps:$4 sm:$0xff]  }
 0x127   :  { %5129 = vmatpush1.bf16.msra.mxu0 %v7442_v52  ;;  %5662 = vmatpush1.bf16.msra.mxu1 %v7445_v53  ;;  %v7537_v52 = vld [vmem:[%s10769_s1 + $0xb08] ss:$16 sps:$4 sm:$0xff]   ;;  %v7542_v53 = vld [vmem:[%s10769_s1 + $0xb24] ss:$16 sps:$4 sm:$0xff]  }
 0x128   :  { %5130 = vmatprep.subr.bf16.mxu0 %v7450_v54  ;;  %5663 = vmatprep.subr.bf16.mxu1 %v7453_v55  ;;  %v7545_v54 = vld [vmem:[%s10769_s1 + $0xb2c] ss:$16 sps:$4 sm:$0xff]   ;;  %v7540_v55 = vld [vmem:[%s10769_s1 + $0xb20] ss:$16 sps:$4 sm:$0xff]  }
 0x12b   :  { %5131 = vmatpush1.bf16.msra.mxu0 %v7448_v56  ;;  %5664 = vmatpush1.bf16.msra.mxu1 %v7451_v57  ;;  %v7543_v56 = vld [vmem:[%s10769_s1 + $0xb28] ss:$16 sps:$4 sm:$0xff]   ;;  %v7548_v57 = vld [vmem:[%s10769_s1 + $0xb44] ss:$16 sps:$4 sm:$0xff]  }
 0x12c   :  { %5132 = vmatprep.subr.bf16.mxu0 %v7456_v58  ;;  %5665 = vmatprep.subr.bf16.mxu1 %v7459_v59  ;;  %v7551_v58 = vld [vmem:[%s10769_s1 + $0xb4c] ss:$16 sps:$4 sm:$0xff]   ;;  %v7546_v59 = vld [vmem:[%s10769_s1 + $0xb40] ss:$16 sps:$4 sm:$0xff]  }
 0x12f   :  { %5133 = vmatpush1.bf16.msra.mxu0 %v7454_v60  ;;  %5666 = vmatpush1.bf16.msra.mxu1 %v7457_v61  ;;  %v7549_v60 = vld [vmem:[%s10769_s1 + $0xb48] ss:$16 sps:$4 sm:$0xff]   ;;  %v7554_v61 = vld [vmem:[%s10769_s1 + $0xb64] ss:$16 sps:$4 sm:$0xff]  }
 0x130   :  { %5134 = vmatprep.subr.bf16.mxu0 %v7462_v62  ;;  %5667 = vmatprep.subr.bf16.mxu1 %v7465_v63  ;;  %v7557_v62 = vld [vmem:[%s10769_s1 + $0xb6c] ss:$16 sps:$4 sm:$0xff]   ;;  %v7552_v63 = vld [vmem:[%s10769_s1 + $0xb60] ss:$16 sps:$4 sm:$0xff]  }
 0x133   :  { %5135 = vmatpush1.bf16.msra.mxu0 %v7460_v0  ;;  %5668 = vmatpush1.bf16.msra.mxu1 %v7463_v1  ;;  %v7555_v0 = vld [vmem:[%s10769_s1 + $0xb68] ss:$16 sps:$4 sm:$0xff]   ;;  %v7560_v1 = vld [vmem:[%s10769_s1 + $0xb84] ss:$16 sps:$4 sm:$0xff]  }
 0x134   :  { %5136 = vmatprep.subr.bf16.mxu0 %v7468_v2  ;;  %5669 = vmatprep.subr.bf16.mxu1 %v7471_v3  ;;  %v7563_v2 = vld [vmem:[%s10769_s1 + $0xb8c] ss:$16 sps:$4 sm:$0xff]   ;;  %v7558_v3 = vld [vmem:[%s10769_s1 + $0xb80] ss:$16 sps:$4 sm:$0xff]  }
 0x137   :  { %5137 = vmatpush1.bf16.msra.mxu0 %v7466_v4  ;;  %5670 = vmatpush1.bf16.msra.mxu1 %v7469_v5  ;;  %v7561_v4 = vld [vmem:[%s10769_s1 + $0xb88] ss:$16 sps:$4 sm:$0xff]   ;;  %v7566_v5 = vld [vmem:[%s10769_s1 + $0xba4] ss:$16 sps:$4 sm:$0xff]  }
 0x138   :  { %5138 = vmatprep.subr.bf16.mxu0 %v7474_v6  ;;  %5671 = vmatprep.subr.bf16.mxu1 %v7477_v7  ;;  %v7569_v6 = vld [vmem:[%s10769_s1 + $0xbac] ss:$16 sps:$4 sm:$0xff]   ;;  %v7564_v7 = vld [vmem:[%s10769_s1 + $0xba0] ss:$16 sps:$4 sm:$0xff]  }
 0x13b   :  { %5139 = vmatpush1.bf16.msra.mxu0 %v7472_v8  ;;  %5672 = vmatpush1.bf16.msra.mxu1 %v7475_v9  ;;  %v7567_v8 = vld [vmem:[%s10769_s1 + $0xba8] ss:$16 sps:$4 sm:$0xff]   ;;  %v7572_v9 = vld [vmem:[%s10769_s1 + $0xbc4] ss:$16 sps:$4 sm:$0xff]  }
 0x13c   :  { %5140 = vmatprep.subr.bf16.mxu0 %v7480_v10  ;;  %5673 = vmatprep.subr.bf16.mxu1 %v7483_v12  ;;  %v7575_v10 = vld [vmem:[%s10769_s1 + $0xbcc] ss:$16 sps:$4 sm:$0xff]   ;;  %v7570_v12 = vld [vmem:[%s10769_s1 + $0xbc0] ss:$16 sps:$4 sm:$0xff]  }
 0x13f   :  { %5141 = vmatpush1.bf16.msra.mxu0 %v7478_v13  ;;  %5674 = vmatpush1.bf16.msra.mxu1 %v7481_v15  ;;  %v7573_v13 = vld [vmem:[%s10769_s1 + $0xbc8] ss:$16 sps:$4 sm:$0xff]   ;;  %v7578_v15 = vld [vmem:[%s10769_s1 + $0xbe4] ss:$16 sps:$4 sm:$0xff]  }
 0x140   :  { %5151 = vmatprep.subr.bf16.mxu0 %v7488_v11  ;;  %5684 = vmatprep.subr.bf16.mxu1 %v7491_v17  ;;  %v7581_v11 = vld [vmem:[%s10769_s1 + $0xbec] ss:$16 sps:$4 sm:$0xff]   ;;  %v7576_v17 = vld [vmem:[%s10769_s1 + $0xbe0] ss:$16 sps:$4 sm:$0xff]  }
 0x142   :  { %5143 = vmatmul.mubr.bf16.vlgmr.msra.gmra.mrb[0].mxu0 %v6077_v14  ;;  %5676 = vmatmul.mubr.bf16.vlgmr.msra.gmra.mrb[0].mxu1 %v6077_v14  ;;  %v7579_v14 = vld [vmem:[%s10769_s1 + $0xbe8] ss:$16 sps:$4 sm:$0xff]  }
 0x143   :  { %5152 = vmatpush1.bf16.msra.mxu0 %v7486_v19  ;;  %5685 = vmatpush1.bf16.msra.mxu1 %v7489_v20  ;;  %v7586_v19 = vld [vmem:[%s10769_s1 + $0xc04] ss:$16 sps:$4 sm:$0xff]   ;;  %v7589_v20 = vld [vmem:[%s10769_s1 + $0xc0c] ss:$16 sps:$4 sm:$0xff]  }
 0x144   :  { %5153 = vmatprep.subr.bf16.mxu0 %v7494_v21  ;;  %5686 = vmatprep.subr.bf16.mxu1 %v7497_v16  ;;  %v9459_v21 = vld [vmem:[%s10770_s0 + $0x30] sm:$0xff]  ;;  %v6079_v16 = vcombine.low %v9258_v18, %v9258_v18  ;;  %v7595_v18 = vld [vmem:[%s10769_s1 + $0xc2c] ss:$16 sps:$4 sm:$0xff]  }
 0x145   :  { %5183 = vmatprep.mubr.bf16.mxu0 %v6080_v22  ;;  %5716 = vmatprep.mubr.bf16.mxu1 %v6080_v22  ;;  %v7584_v22 = vld [vmem:[%s10769_s1 + $0xc00] ss:$16 sps:$4 sm:$0xff]  }
 0x147   :  { %5154 = vmatpush1.bf16.msra.mxu0 %v7492_v23  ;;  %5687 = vmatpush1.bf16.msra.mxu1 %v7495_v24  ;;  %v7587_v23 = vld [vmem:[%s10769_s1 + $0xc08] ss:$16 sps:$4 sm:$0xff]   ;;  %v7592_v24 = vld [vmem:[%s10769_s1 + $0xc24] ss:$16 sps:$4 sm:$0xff]  }
 0x148   :  { %5155 = vmatprep.subr.bf16.mxu0 %v7500_v25  ;;  %5688 = vmatprep.subr.bf16.mxu1 %v7503_v26  ;;  %v6082_v25 = vcombine.high %v9459_v21, %v9459_v21  ;;  %v7590_v26 = vld [vmem:[%s10769_s1 + $0xc20] ss:$16 sps:$4 sm:$0xff]  }
 0x14b   :  { %5156 = vmatpush1.bf16.msra.mxu0 %v7498_v27  ;;  %5689 = vmatpush1.bf16.msra.mxu1 %v7501_v28  ;;  %v7593_v27 = vld [vmem:[%s10769_s1 + $0xc28] ss:$16 sps:$4 sm:$0xff]   ;;  %v7598_v28 = vld [vmem:[%s10769_s1 + $0xc44] ss:$16 sps:$4 sm:$0xff]  }
 0x14c   :  { %5157 = vmatprep.subr.bf16.mxu0 %v7506_v29  ;;  %5690 = vmatprep.subr.bf16.mxu1 %v7509_v30  ;;  %v7601_v29 = vld [vmem:[%s10769_s1 + $0xc4c] ss:$16 sps:$4 sm:$0xff]   ;;  %v7596_v30 = vld [vmem:[%s10769_s1 + $0xc40] ss:$16 sps:$4 sm:$0xff]  }
 0x14f   :  { %5158 = vmatpush1.bf16.msra.mxu0 %v7504_v31  ;;  %5691 = vmatpush1.bf16.msra.mxu1 %v7507_v32  ;;  %v7599_v31 = vld [vmem:[%s10769_s1 + $0xc48] ss:$16 sps:$4 sm:$0xff]   ;;  %v7604_v32 = vld [vmem:[%s10769_s1 + $0xc64] ss:$16 sps:$4 sm:$0xff]  }
 0x150   :  { %5159 = vmatprep.subr.bf16.mxu0 %v7512_v33  ;;  %5692 = vmatprep.subr.bf16.mxu1 %v7515_v34  ;;  %v7607_v33 = vld [vmem:[%s10769_s1 + $0xc6c] ss:$16 sps:$4 sm:$0xff]   ;;  %v7602_v34 = vld [vmem:[%s10769_s1 + $0xc60] ss:$16 sps:$4 sm:$0xff]  }
 0x153   :  { %5160 = vmatpush1.bf16.msra.mxu0 %v7510_v35  ;;  %5693 = vmatpush1.bf16.msra.mxu1 %v7513_v36  ;;  %v7605_v35 = vld [vmem:[%s10769_s1 + $0xc68] ss:$16 sps:$4 sm:$0xff]   ;;  %v7610_v36 = vld [vmem:[%s10769_s1 + $0xc84] ss:$16 sps:$4 sm:$0xff]  }
 0x154   :  { %5161 = vmatprep.subr.bf16.mxu0 %v7518_v37  ;;  %5694 = vmatprep.subr.bf16.mxu1 %v7521_v38  ;;  %v7613_v37 = vld [vmem:[%s10769_s1 + $0xc8c] ss:$16 sps:$4 sm:$0xff]   ;;  %v7608_v38 = vld [vmem:[%s10769_s1 + $0xc80] ss:$16 sps:$4 sm:$0xff]  }
 0x157   :  { %5162 = vmatpush1.bf16.msra.mxu0 %v7516_v39  ;;  %5695 = vmatpush1.bf16.msra.mxu1 %v7519_v40  ;;  %v7611_v39 = vld [vmem:[%s10769_s1 + $0xc88] ss:$16 sps:$4 sm:$0xff]   ;;  %v7616_v40 = vld [vmem:[%s10769_s1 + $0xca4] ss:$16 sps:$4 sm:$0xff]  }
 0x158   :  { %5163 = vmatprep.subr.bf16.mxu0 %v7524_v41  ;;  %5696 = vmatprep.subr.bf16.mxu1 %v7527_v42  ;;  %v7619_v41 = vld [vmem:[%s10769_s1 + $0xcac] ss:$16 sps:$4 sm:$0xff]   ;;  %v7614_v42 = vld [vmem:[%s10769_s1 + $0xca0] ss:$16 sps:$4 sm:$0xff]  }
 0x15b   :  { %5164 = vmatpush1.bf16.msra.mxu0 %v7522_v43  ;;  %5697 = vmatpush1.bf16.msra.mxu1 %v7525_v44  ;;  %v7617_v43 = vld [vmem:[%s10769_s1 + $0xca8] ss:$16 sps:$4 sm:$0xff]   ;;  %v7622_v44 = vld [vmem:[%s10769_s1 + $0xcc4] ss:$16 sps:$4 sm:$0xff]  }
 0x15c   :  { %5165 = vmatprep.subr.bf16.mxu0 %v7530_v45  ;;  %5698 = vmatprep.subr.bf16.mxu1 %v7533_v46  ;;  %v7625_v45 = vld [vmem:[%s10769_s1 + $0xccc] ss:$16 sps:$4 sm:$0xff]   ;;  %v7620_v46 = vld [vmem:[%s10769_s1 + $0xcc0] ss:$16 sps:$4 sm:$0xff]  }
 0x15f   :  { %5166 = vmatpush1.bf16.msra.mxu0 %v7528_v47  ;;  %5699 = vmatpush1.bf16.msra.mxu1 %v7531_v48  ;;  %v7623_v47 = vld [vmem:[%s10769_s1 + $0xcc8] ss:$16 sps:$4 sm:$0xff]   ;;  %v7628_v48 = vld [vmem:[%s10769_s1 + $0xce4] ss:$16 sps:$4 sm:$0xff]  }
 0x160   :  { %5167 = vmatprep.subr.bf16.mxu0 %v7536_v49  ;;  %5700 = vmatprep.subr.bf16.mxu1 %v7539_v50  ;;  %v7631_v49 = vld [vmem:[%s10769_s1 + $0xcec] ss:$16 sps:$4 sm:$0xff]   ;;  %v7626_v50 = vld [vmem:[%s10769_s1 + $0xce0] ss:$16 sps:$4 sm:$0xff]  }
 0x163   :  { %5168 = vmatpush1.bf16.msra.mxu0 %v7534_v51  ;;  %5701 = vmatpush1.bf16.msra.mxu1 %v7537_v52  ;;  %v7629_v51 = vld [vmem:[%s10769_s1 + $0xce8] ss:$16 sps:$4 sm:$0xff]   ;;  %v7634_v52 = vld [vmem:[%s10769_s1 + $0xd04] ss:$16 sps:$4 sm:$0xff]  }
 0x164   :  { %5169 = vmatprep.subr.bf16.mxu0 %v7542_v53  ;;  %5702 = vmatprep.subr.bf16.mxu1 %v7545_v54  ;;  %v7637_v53 = vld [vmem:[%s10769_s1 + $0xd0c] ss:$16 sps:$4 sm:$0xff]   ;;  %v7632_v54 = vld [vmem:[%s10769_s1 + $0xd00] ss:$16 sps:$4 sm:$0xff]  }
 0x167   :  { %5170 = vmatpush1.bf16.msra.mxu0 %v7540_v55  ;;  %5703 = vmatpush1.bf16.msra.mxu1 %v7543_v56  ;;  %v7635_v55 = vld [vmem:[%s10769_s1 + $0xd08] ss:$16 sps:$4 sm:$0xff]   ;;  %v7640_v56 = vld [vmem:[%s10769_s1 + $0xd24] ss:$16 sps:$4 sm:$0xff]  }
 0x168   :  { %5171 = vmatprep.subr.bf16.mxu0 %v7548_v57  ;;  %5704 = vmatprep.subr.bf16.mxu1 %v7551_v58  ;;  %v7643_v57 = vld [vmem:[%s10769_s1 + $0xd2c] ss:$16 sps:$4 sm:$0xff]   ;;  %v7638_v58 = vld [vmem:[%s10769_s1 + $0xd20] ss:$16 sps:$4 sm:$0xff]  }
 0x16b   :  { %5172 = vmatpush1.bf16.msra.mxu0 %v7546_v59  ;;  %5705 = vmatpush1.bf16.msra.mxu1 %v7549_v60  ;;  %v7641_v59 = vld [vmem:[%s10769_s1 + $0xd28] ss:$16 sps:$4 sm:$0xff]   ;;  %v7646_v60 = vld [vmem:[%s10769_s1 + $0xd44] ss:$16 sps:$4 sm:$0xff]  }
 0x16c   :  { %5173 = vmatprep.subr.bf16.mxu0 %v7554_v61  ;;  %5706 = vmatprep.subr.bf16.mxu1 %v7557_v62  ;;  %v7649_v61 = vld [vmem:[%s10769_s1 + $0xd4c] ss:$16 sps:$4 sm:$0xff]   ;;  %v7644_v62 = vld [vmem:[%s10769_s1 + $0xd40] ss:$16 sps:$4 sm:$0xff]  }
 0x16f   :  { %5174 = vmatpush1.bf16.msra.mxu0 %v7552_v63  ;;  %5707 = vmatpush1.bf16.msra.mxu1 %v7555_v0  ;;  %v7647_v63 = vld [vmem:[%s10769_s1 + $0xd48] ss:$16 sps:$4 sm:$0xff]   ;;  %v7652_v0 = vld [vmem:[%s10769_s1 + $0xd64] ss:$16 sps:$4 sm:$0xff]  }
 0x170   :  { %5175 = vmatprep.subr.bf16.mxu0 %v7560_v1  ;;  %5708 = vmatprep.subr.bf16.mxu1 %v7563_v2  ;;  %v7655_v1 = vld [vmem:[%s10769_s1 + $0xd6c] ss:$16 sps:$4 sm:$0xff]   ;;  %v7650_v2 = vld [vmem:[%s10769_s1 + $0xd60] ss:$16 sps:$4 sm:$0xff]  }
 0x173   :  { %5176 = vmatpush1.bf16.msra.mxu0 %v7558_v3  ;;  %5709 = vmatpush1.bf16.msra.mxu1 %v7561_v4  ;;  %v7653_v3 = vld [vmem:[%s10769_s1 + $0xd68] ss:$16 sps:$4 sm:$0xff]   ;;  %v7658_v4 = vld [vmem:[%s10769_s1 + $0xd84] ss:$16 sps:$4 sm:$0xff]  }
 0x174   :  { %5177 = vmatprep.subr.bf16.mxu0 %v7566_v5  ;;  %5710 = vmatprep.subr.bf16.mxu1 %v7569_v6  ;;  %v7661_v5 = vld [vmem:[%s10769_s1 + $0xd8c] ss:$16 sps:$4 sm:$0xff]   ;;  %v7656_v6 = vld [vmem:[%s10769_s1 + $0xd80] ss:$16 sps:$4 sm:$0xff]  }
 0x177   :  { %5178 = vmatpush1.bf16.msra.mxu0 %v7564_v7  ;;  %5711 = vmatpush1.bf16.msra.mxu1 %v7567_v8  ;;  %v7659_v7 = vld [vmem:[%s10769_s1 + $0xd88] ss:$16 sps:$4 sm:$0xff]   ;;  %v7664_v8 = vld [vmem:[%s10769_s1 + $0xda4] ss:$16 sps:$4 sm:$0xff]  }
 0x178   :  { %5179 = vmatprep.subr.bf16.mxu0 %v7572_v9  ;;  %5712 = vmatprep.subr.bf16.mxu1 %v7575_v10  ;;  %v7667_v9 = vld [vmem:[%s10769_s1 + $0xdac] ss:$16 sps:$4 sm:$0xff]   ;;  %v7662_v10 = vld [vmem:[%s10769_s1 + $0xda0] ss:$16 sps:$4 sm:$0xff]  }
 0x17b   :  { %5180 = vmatpush1.bf16.msra.mxu0 %v7570_v12  ;;  %5713 = vmatpush1.bf16.msra.mxu1 %v7573_v13  ;;  %v7665_v12 = vld [vmem:[%s10769_s1 + $0xda8] ss:$16 sps:$4 sm:$0xff]   ;;  %v7670_v13 = vld [vmem:[%s10769_s1 + $0xdc4] ss:$16 sps:$4 sm:$0xff]  }
 0x17c   :  { %5181 = vmatprep.subr.bf16.mxu0 %v7578_v15  ;;  %5714 = vmatprep.subr.bf16.mxu1 %v7581_v11  ;;  %v7673_v15 = vld [vmem:[%s10769_s1 + $0xdcc] ss:$16 sps:$4 sm:$0xff]   ;;  %v7668_v11 = vld [vmem:[%s10769_s1 + $0xdc0] ss:$16 sps:$4 sm:$0xff]  }
 0x17f   :  { %5182 = vmatpush1.bf16.msra.mxu0 %v7576_v17  ;;  %5715 = vmatpush1.bf16.msra.mxu1 %v7579_v14  ;;  %v7671_v17 = vld [vmem:[%s10769_s1 + $0xdc8] ss:$16 sps:$4 sm:$0xff]   ;;  %v7676_v14 = vld [vmem:[%s10769_s1 + $0xde4] ss:$16 sps:$4 sm:$0xff]  }
 0x180   :  { %5192 = vmatprep.subr.bf16.mxu0 %v7586_v19  ;;  %5725 = vmatprep.subr.bf16.mxu1 %v7589_v20  ;;  %v7679_v19 = vld [vmem:[%s10769_s1 + $0xdec] ss:$16 sps:$4 sm:$0xff]   ;;  %v7674_v20 = vld [vmem:[%s10769_s1 + $0xde0] ss:$16 sps:$4 sm:$0xff]  }
 0x182   :  { %5184 = vmatmul.mubr.bf16.vlgmr.msra.gmra.mrb[0].mxu0 %v6079_v16  ;;  %5717 = vmatmul.mubr.bf16.vlgmr.msra.gmra.mrb[0].mxu1 %v6079_v16  ;;  %v7677_v16 = vld [vmem:[%s10769_s1 + $0xde8] ss:$16 sps:$4 sm:$0xff]  }
 0x183   :  { %5193 = vmatpush1.bf16.msra.mxu0 %v7584_v22  ;;  %5726 = vmatpush1.bf16.msra.mxu1 %v7587_v23  ;;  %v7684_v22 = vld [vmem:[%s10769_s1 + $0xe04] ss:$16 sps:$4 sm:$0xff]   ;;  %v7687_v23 = vld [vmem:[%s10769_s1 + $0xe0c] ss:$16 sps:$4 sm:$0xff]  }
 0x184   :  { %5194 = vmatprep.subr.bf16.mxu0 %v7592_v24  ;;  %5727 = vmatprep.subr.bf16.mxu1 %v7595_v18  ;;  %v9660_v24 = vld [vmem:[%s10770_s0 + $0x38] sm:$0xff]  ;;  %v6081_v18 = vcombine.low %v9459_v21, %v9459_v21 }
 0x185   :  { %5224 = vmatprep.mubr.bf16.mxu0 %v6082_v25  ;;  %5757 = vmatprep.mubr.bf16.mxu1 %v6082_v25  ;;  %v7682_v25 = vld [vmem:[%s10769_s1 + $0xe00] ss:$16 sps:$4 sm:$0xff]   ;;  %v7693_v21 = vld [vmem:[%s10769_s1 + $0xe2c] ss:$16 sps:$4 sm:$0xff]  }
 0x187   :  { %5195 = vmatpush1.bf16.msra.mxu0 %v7590_v26  ;;  %5728 = vmatpush1.bf16.msra.mxu1 %v7593_v27  ;;  %v7685_v26 = vld [vmem:[%s10769_s1 + $0xe08] ss:$16 sps:$4 sm:$0xff]   ;;  %v7690_v27 = vld [vmem:[%s10769_s1 + $0xe24] ss:$16 sps:$4 sm:$0xff]  }
 0x188   :  { %5196 = vmatprep.subr.bf16.mxu0 %v7598_v28  ;;  %5729 = vmatprep.subr.bf16.mxu1 %v7601_v29  ;;  %v6084_v28 = vcombine.high %v9660_v24, %v9660_v24  ;;  %v7688_v29 = vld [vmem:[%s10769_s1 + $0xe20] ss:$16 sps:$4 sm:$0xff]  }
 0x18b   :  { %5197 = vmatpush1.bf16.msra.mxu0 %v7596_v30  ;;  %5730 = vmatpush1.bf16.msra.mxu1 %v7599_v31  ;;  %v7691_v30 = vld [vmem:[%s10769_s1 + $0xe28] ss:$16 sps:$4 sm:$0xff]   ;;  %v7696_v31 = vld [vmem:[%s10769_s1 + $0xe44] ss:$16 sps:$4 sm:$0xff]  }
 0x18c   :  { %5198 = vmatprep.subr.bf16.mxu0 %v7604_v32  ;;  %5731 = vmatprep.subr.bf16.mxu1 %v7607_v33  ;;  %v7699_v32 = vld [vmem:[%s10769_s1 + $0xe4c] ss:$16 sps:$4 sm:$0xff]   ;;  %v7694_v33 = vld [vmem:[%s10769_s1 + $0xe40] ss:$16 sps:$4 sm:$0xff]  }
 0x18f   :  { %5199 = vmatpush1.bf16.msra.mxu0 %v7602_v34  ;;  %5732 = vmatpush1.bf16.msra.mxu1 %v7605_v35  ;;  %v7697_v34 = vld [vmem:[%s10769_s1 + $0xe48] ss:$16 sps:$4 sm:$0xff]   ;;  %v7702_v35 = vld [vmem:[%s10769_s1 + $0xe64] ss:$16 sps:$4 sm:$0xff]  }
 0x190   :  { %5200 = vmatprep.subr.bf16.mxu0 %v7610_v36  ;;  %5733 = vmatprep.subr.bf16.mxu1 %v7613_v37  ;;  %v7705_v36 = vld [vmem:[%s10769_s1 + $0xe6c] ss:$16 sps:$4 sm:$0xff]   ;;  %v7700_v37 = vld [vmem:[%s10769_s1 + $0xe60] ss:$16 sps:$4 sm:$0xff]  }
 0x193   :  { %5201 = vmatpush1.bf16.msra.mxu0 %v7608_v38  ;;  %5734 = vmatpush1.bf16.msra.mxu1 %v7611_v39  ;;  %v7703_v38 = vld [vmem:[%s10769_s1 + $0xe68] ss:$16 sps:$4 sm:$0xff]   ;;  %v7708_v39 = vld [vmem:[%s10769_s1 + $0xe84] ss:$16 sps:$4 sm:$0xff]  }
 0x194   :  { %5202 = vmatprep.subr.bf16.mxu0 %v7616_v40  ;;  %5735 = vmatprep.subr.bf16.mxu1 %v7619_v41  ;;  %v7711_v40 = vld [vmem:[%s10769_s1 + $0xe8c] ss:$16 sps:$4 sm:$0xff]   ;;  %v7706_v41 = vld [vmem:[%s10769_s1 + $0xe80] ss:$16 sps:$4 sm:$0xff]  }
 0x197   :  { %5203 = vmatpush1.bf16.msra.mxu0 %v7614_v42  ;;  %5736 = vmatpush1.bf16.msra.mxu1 %v7617_v43  ;;  %v7709_v42 = vld [vmem:[%s10769_s1 + $0xe88] ss:$16 sps:$4 sm:$0xff]   ;;  %v7714_v43 = vld [vmem:[%s10769_s1 + $0xea4] ss:$16 sps:$4 sm:$0xff]  }
 0x198   :  { %5204 = vmatprep.subr.bf16.mxu0 %v7622_v44  ;;  %5737 = vmatprep.subr.bf16.mxu1 %v7625_v45  ;;  %v7717_v44 = vld [vmem:[%s10769_s1 + $0xeac] ss:$16 sps:$4 sm:$0xff]   ;;  %v7712_v45 = vld [vmem:[%s10769_s1 + $0xea0] ss:$16 sps:$4 sm:$0xff]  }
 0x19b   :  { %5205 = vmatpush1.bf16.msra.mxu0 %v7620_v46  ;;  %5738 = vmatpush1.bf16.msra.mxu1 %v7623_v47  ;;  %v7715_v46 = vld [vmem:[%s10769_s1 + $0xea8] ss:$16 sps:$4 sm:$0xff]   ;;  %v7720_v47 = vld [vmem:[%s10769_s1 + $0xec4] ss:$16 sps:$4 sm:$0xff]  }
 0x19c   :  { %5206 = vmatprep.subr.bf16.mxu0 %v7628_v48  ;;  %5739 = vmatprep.subr.bf16.mxu1 %v7631_v49  ;;  %v7723_v48 = vld [vmem:[%s10769_s1 + $0xecc] ss:$16 sps:$4 sm:$0xff]   ;;  %v7718_v49 = vld [vmem:[%s10769_s1 + $0xec0] ss:$16 sps:$4 sm:$0xff]  }
 0x19f   :  { %5207 = vmatpush1.bf16.msra.mxu0 %v7626_v50  ;;  %5740 = vmatpush1.bf16.msra.mxu1 %v7629_v51  ;;  %v7721_v50 = vld [vmem:[%s10769_s1 + $0xec8] ss:$16 sps:$4 sm:$0xff]   ;;  %v7726_v51 = vld [vmem:[%s10769_s1 + $0xee4] ss:$16 sps:$4 sm:$0xff]  }
 0x1a0   :  { %5208 = vmatprep.subr.bf16.mxu0 %v7634_v52  ;;  %5741 = vmatprep.subr.bf16.mxu1 %v7637_v53  ;;  %v7729_v52 = vld [vmem:[%s10769_s1 + $0xeec] ss:$16 sps:$4 sm:$0xff]   ;;  %v7724_v53 = vld [vmem:[%s10769_s1 + $0xee0] ss:$16 sps:$4 sm:$0xff]  }
 0x1a3   :  { %5209 = vmatpush1.bf16.msra.mxu0 %v7632_v54  ;;  %5742 = vmatpush1.bf16.msra.mxu1 %v7635_v55  ;;  %v7727_v54 = vld [vmem:[%s10769_s1 + $0xee8] ss:$16 sps:$4 sm:$0xff]   ;;  %v7732_v55 = vld [vmem:[%s10769_s1 + $0xf04] ss:$16 sps:$4 sm:$0xff]  }
 0x1a4   :  { %5210 = vmatprep.subr.bf16.mxu0 %v7640_v56  ;;  %5743 = vmatprep.subr.bf16.mxu1 %v7643_v57  ;;  %v7735_v56 = vld [vmem:[%s10769_s1 + $0xf0c] ss:$16 sps:$4 sm:$0xff]   ;;  %v7730_v57 = vld [vmem:[%s10769_s1 + $0xf00] ss:$16 sps:$4 sm:$0xff]  }
 0x1a7   :  { %5211 = vmatpush1.bf16.msra.mxu0 %v7638_v58  ;;  %5744 = vmatpush1.bf16.msra.mxu1 %v7641_v59  ;;  %v7733_v58 = vld [vmem:[%s10769_s1 + $0xf08] ss:$16 sps:$4 sm:$0xff]   ;;  %v7738_v59 = vld [vmem:[%s10769_s1 + $0xf24] ss:$16 sps:$4 sm:$0xff]  }
 0x1a8   :  { %5212 = vmatprep.subr.bf16.mxu0 %v7646_v60  ;;  %5745 = vmatprep.subr.bf16.mxu1 %v7649_v61  ;;  %v7741_v60 = vld [vmem:[%s10769_s1 + $0xf2c] ss:$16 sps:$4 sm:$0xff]   ;;  %v7736_v61 = vld [vmem:[%s10769_s1 + $0xf20] ss:$16 sps:$4 sm:$0xff]  }
 0x1ab   :  { %5213 = vmatpush1.bf16.msra.mxu0 %v7644_v62  ;;  %5746 = vmatpush1.bf16.msra.mxu1 %v7647_v63  ;;  %v7739_v62 = vld [vmem:[%s10769_s1 + $0xf28] ss:$16 sps:$4 sm:$0xff]   ;;  %v7744_v63 = vld [vmem:[%s10769_s1 + $0xf44] ss:$16 sps:$4 sm:$0xff]  }
 0x1ac   :  { %5214 = vmatprep.subr.bf16.mxu0 %v7652_v0  ;;  %5747 = vmatprep.subr.bf16.mxu1 %v7655_v1  ;;  %v7747_v0 = vld [vmem:[%s10769_s1 + $0xf4c] ss:$16 sps:$4 sm:$0xff]   ;;  %v7742_v1 = vld [vmem:[%s10769_s1 + $0xf40] ss:$16 sps:$4 sm:$0xff]  }
 0x1af   :  { %5215 = vmatpush1.bf16.msra.mxu0 %v7650_v2  ;;  %5748 = vmatpush1.bf16.msra.mxu1 %v7653_v3  ;;  %v7745_v2 = vld [vmem:[%s10769_s1 + $0xf48] ss:$16 sps:$4 sm:$0xff]   ;;  %v7750_v3 = vld [vmem:[%s10769_s1 + $0xf64] ss:$16 sps:$4 sm:$0xff]  }
 0x1b0   :  { %5216 = vmatprep.subr.bf16.mxu0 %v7658_v4  ;;  %5749 = vmatprep.subr.bf16.mxu1 %v7661_v5  ;;  %v7753_v4 = vld [vmem:[%s10769_s1 + $0xf6c] ss:$16 sps:$4 sm:$0xff]   ;;  %v7748_v5 = vld [vmem:[%s10769_s1 + $0xf60] ss:$16 sps:$4 sm:$0xff]  }
 0x1b3   :  { %5217 = vmatpush1.bf16.msra.mxu0 %v7656_v6  ;;  %5750 = vmatpush1.bf16.msra.mxu1 %v7659_v7  ;;  %v7751_v6 = vld [vmem:[%s10769_s1 + $0xf68] ss:$16 sps:$4 sm:$0xff]   ;;  %v7756_v7 = vld [vmem:[%s10769_s1 + $0xf84] ss:$16 sps:$4 sm:$0xff]  }
 0x1b4   :  { %5218 = vmatprep.subr.bf16.mxu0 %v7664_v8  ;;  %5751 = vmatprep.subr.bf16.mxu1 %v7667_v9  ;;  %v7759_v8 = vld [vmem:[%s10769_s1 + $0xf8c] ss:$16 sps:$4 sm:$0xff]   ;;  %v7754_v9 = vld [vmem:[%s10769_s1 + $0xf80] ss:$16 sps:$4 sm:$0xff]  }
 0x1b7   :  { %5219 = vmatpush1.bf16.msra.mxu0 %v7662_v10  ;;  %5752 = vmatpush1.bf16.msra.mxu1 %v7665_v12  ;;  %v7757_v10 = vld [vmem:[%s10769_s1 + $0xf88] ss:$16 sps:$4 sm:$0xff]   ;;  %v7762_v12 = vld [vmem:[%s10769_s1 + $0xfa4] ss:$16 sps:$4 sm:$0xff]  }
 0x1b8   :  { %5220 = vmatprep.subr.bf16.mxu0 %v7670_v13  ;;  %5753 = vmatprep.subr.bf16.mxu1 %v7673_v15  ;;  %v7765_v13 = vld [vmem:[%s10769_s1 + $0xfac] ss:$16 sps:$4 sm:$0xff]   ;;  %v7760_v15 = vld [vmem:[%s10769_s1 + $0xfa0] ss:$16 sps:$4 sm:$0xff]  }
 0x1bb   :  { %5221 = vmatpush1.bf16.msra.mxu0 %v7668_v11  ;;  %5754 = vmatpush1.bf16.msra.mxu1 %v7671_v17  ;;  %v7763_v11 = vld [vmem:[%s10769_s1 + $0xfa8] ss:$16 sps:$4 sm:$0xff]   ;;  %v7768_v17 = vld [vmem:[%s10769_s1 + $0xfc4] ss:$16 sps:$4 sm:$0xff]  }
 0x1bc   :  { %5222 = vmatprep.subr.bf16.mxu0 %v7676_v14  ;;  %5755 = vmatprep.subr.bf16.mxu1 %v7679_v19  ;;  %v7771_v14 = vld [vmem:[%s10769_s1 + $0xfcc] ss:$16 sps:$4 sm:$0xff]   ;;  %v7766_v19 = vld [vmem:[%s10769_s1 + $0xfc0] ss:$16 sps:$4 sm:$0xff]  }
 0x1bf   :  { %5223 = vmatpush1.bf16.msra.mxu0 %v7674_v20  ;;  %5756 = vmatpush1.bf16.msra.mxu1 %v7677_v16  ;;  %v7769_v20 = vld [vmem:[%s10769_s1 + $0xfc8] ss:$16 sps:$4 sm:$0xff]   ;;  %v7774_v16 = vld [vmem:[%s10769_s1 + $0xfe4] ss:$16 sps:$4 sm:$0xff]  }
 0x1c0   :  { %5233 = vmatprep.subr.bf16.mxu0 %v7684_v22  ;;  %5766 = vmatprep.subr.bf16.mxu1 %v7687_v23  ;;  %v7777_v22 = vld [vmem:[%s10769_s1 + $0xfec] ss:$16 sps:$4 sm:$0xff]   ;;  %v7772_v23 = vld [vmem:[%s10769_s1 + $0xfe0] ss:$16 sps:$4 sm:$0xff]  }
 0x1c2   :  { %5225 = vmatmul.mubr.bf16.vlgmr.msra.gmra.mrb[0].mxu0 %v6081_v18  ;;  %5758 = vmatmul.mubr.bf16.vlgmr.msra.gmra.mrb[0].mxu1 %v6081_v18  ;;  %v7775_v18 = vld [vmem:[%s10769_s1 + $0xfe8] ss:$16 sps:$4 sm:$0xff]  }
 0x1c3   :  { %5234 = vmatpush1.bf16.msra.mxu0 %v7682_v25  ;;  %5767 = vmatpush1.bf16.msra.mxu1 %v7685_v26  ;;  %v7782_v25 = vld [vmem:[%s10769_s1 + $0x1004] ss:$16 sps:$4 sm:$0xff]   ;;  %v7785_v26 = vld [vmem:[%s10769_s1 + $0x100c] ss:$16 sps:$4 sm:$0xff]  }
 0x1c4   :  { %5235 = vmatprep.subr.bf16.mxu0 %v7690_v27  ;;  %5768 = vmatprep.subr.bf16.mxu1 %v7693_v21  ;;  %v6083_v27 = vcombine.low %v9660_v24, %v9660_v24  ;;  %v9863_v21 = vld [vmem:[%s10770_s0 + $0x40] sm:$0xff] }
 0x1c5   :  { %5265 = vmatprep.mubr.bf16.mxu0 %v6084_v28  ;;  %5798 = vmatprep.mubr.bf16.mxu1 %v6084_v28  ;;  %v7780_v28 = vld [vmem:[%s10769_s1 + $0x1000] ss:$16 sps:$4 sm:$0xff]   ;;  %v7788_v24 = vld [vmem:[%s10769_s1 + $0x1024] ss:$16 sps:$4 sm:$0xff]  }
 0x1c7   :  { %5236 = vmatpush1.bf16.msra.mxu0 %v7688_v29  ;;  %5769 = vmatpush1.bf16.msra.mxu1 %v7691_v30  ;;  %v7783_v29 = vld [vmem:[%s10769_s1 + $0x1008] ss:$16 sps:$4 sm:$0xff]   ;;  %v7791_v30 = vld [vmem:[%s10769_s1 + $0x102c] ss:$16 sps:$4 sm:$0xff]  }
 0x1c8   :  { %5237 = vmatprep.subr.bf16.mxu0 %v7696_v31  ;;  %5770 = vmatprep.subr.bf16.mxu1 %v7699_v32  ;;  %v6086_v31 = vcombine.high %v9863_v21, %v9863_v21  ;;  %v7786_v32 = vld [vmem:[%s10769_s1 + $0x1020] ss:$16 sps:$4 sm:$0xff]  }
 0x1cb   :  { %5238 = vmatpush1.bf16.msra.mxu0 %v7694_v33  ;;  %5771 = vmatpush1.bf16.msra.mxu1 %v7697_v34  ;;  %v7789_v33 = vld [vmem:[%s10769_s1 + $0x1028] ss:$16 sps:$4 sm:$0xff]   ;;  %v7794_v34 = vld [vmem:[%s10769_s1 + $0x1044] ss:$16 sps:$4 sm:$0xff]  }
 0x1cc   :  { %5239 = vmatprep.subr.bf16.mxu0 %v7702_v35  ;;  %5772 = vmatprep.subr.bf16.mxu1 %v7705_v36  ;;  %v7797_v35 = vld [vmem:[%s10769_s1 + $0x104c] ss:$16 sps:$4 sm:$0xff]   ;;  %v7792_v36 = vld [vmem:[%s10769_s1 + $0x1040] ss:$16 sps:$4 sm:$0xff]  }
 0x1cf   :  { %5240 = vmatpush1.bf16.msra.mxu0 %v7700_v37  ;;  %5773 = vmatpush1.bf16.msra.mxu1 %v7703_v38  ;;  %v7795_v37 = vld [vmem:[%s10769_s1 + $0x1048] ss:$16 sps:$4 sm:$0xff]   ;;  %v7800_v38 = vld [vmem:[%s10769_s1 + $0x1064] ss:$16 sps:$4 sm:$0xff]  }
 0x1d0   :  { %5241 = vmatprep.subr.bf16.mxu0 %v7708_v39  ;;  %5774 = vmatprep.subr.bf16.mxu1 %v7711_v40  ;;  %v7803_v39 = vld [vmem:[%s10769_s1 + $0x106c] ss:$16 sps:$4 sm:$0xff]   ;;  %v7798_v40 = vld [vmem:[%s10769_s1 + $0x1060] ss:$16 sps:$4 sm:$0xff]  }
 0x1d3   :  { %5242 = vmatpush1.bf16.msra.mxu0 %v7706_v41  ;;  %5775 = vmatpush1.bf16.msra.mxu1 %v7709_v42  ;;  %v7801_v41 = vld [vmem:[%s10769_s1 + $0x1068] ss:$16 sps:$4 sm:$0xff]   ;;  %v7806_v42 = vld [vmem:[%s10769_s1 + $0x1084] ss:$16 sps:$4 sm:$0xff]  }
 0x1d4   :  { %5243 = vmatprep.subr.bf16.mxu0 %v7714_v43  ;;  %5776 = vmatprep.subr.bf16.mxu1 %v7717_v44  ;;  %v7809_v43 = vld [vmem:[%s10769_s1 + $0x108c] ss:$16 sps:$4 sm:$0xff]   ;;  %v7804_v44 = vld [vmem:[%s10769_s1 + $0x1080] ss:$16 sps:$4 sm:$0xff]  }
 0x1d7   :  { %5244 = vmatpush1.bf16.msra.mxu0 %v7712_v45  ;;  %5777 = vmatpush1.bf16.msra.mxu1 %v7715_v46  ;;  %v7807_v45 = vld [vmem:[%s10769_s1 + $0x1088] ss:$16 sps:$4 sm:$0xff]   ;;  %v7812_v46 = vld [vmem:[%s10769_s1 + $0x10a4] ss:$16 sps:$4 sm:$0xff]  }
 0x1d8   :  { %5245 = vmatprep.subr.bf16.mxu0 %v7720_v47  ;;  %5778 = vmatprep.subr.bf16.mxu1 %v7723_v48  ;;  %v7815_v47 = vld [vmem:[%s10769_s1 + $0x10ac] ss:$16 sps:$4 sm:$0xff]   ;;  %v7810_v48 = vld [vmem:[%s10769_s1 + $0x10a0] ss:$16 sps:$4 sm:$0xff]  }
 0x1db   :  { %5246 = vmatpush1.bf16.msra.mxu0 %v7718_v49  ;;  %5779 = vmatpush1.bf16.msra.mxu1 %v7721_v50  ;;  %v7813_v49 = vld [vmem:[%s10769_s1 + $0x10a8] ss:$16 sps:$4 sm:$0xff]   ;;  %v7818_v50 = vld [vmem:[%s10769_s1 + $0x10c4] ss:$16 sps:$4 sm:$0xff]  }
 0x1dc   :  { %5247 = vmatprep.subr.bf16.mxu0 %v7726_v51  ;;  %5780 = vmatprep.subr.bf16.mxu1 %v7729_v52  ;;  %v7821_v51 = vld [vmem:[%s10769_s1 + $0x10cc] ss:$16 sps:$4 sm:$0xff]   ;;  %v7816_v52 = vld [vmem:[%s10769_s1 + $0x10c0] ss:$16 sps:$4 sm:$0xff]  }
 0x1df   :  { %5248 = vmatpush1.bf16.msra.mxu0 %v7724_v53  ;;  %5781 = vmatpush1.bf16.msra.mxu1 %v7727_v54  ;;  %v7819_v53 = vld [vmem:[%s10769_s1 + $0x10c8] ss:$16 sps:$4 sm:$0xff]   ;;  %v7824_v54 = vld [vmem:[%s10769_s1 + $0x10e4] ss:$16 sps:$4 sm:$0xff]  }
 0x1e0   :  { %5249 = vmatprep.subr.bf16.mxu0 %v7732_v55  ;;  %5782 = vmatprep.subr.bf16.mxu1 %v7735_v56  ;;  %v7827_v55 = vld [vmem:[%s10769_s1 + $0x10ec] ss:$16 sps:$4 sm:$0xff]   ;;  %v7822_v56 = vld [vmem:[%s10769_s1 + $0x10e0] ss:$16 sps:$4 sm:$0xff]  }
 0x1e3   :  { %5250 = vmatpush1.bf16.msra.mxu0 %v7730_v57  ;;  %5783 = vmatpush1.bf16.msra.mxu1 %v7733_v58  ;;  %v7825_v57 = vld [vmem:[%s10769_s1 + $0x10e8] ss:$16 sps:$4 sm:$0xff]   ;;  %v7830_v58 = vld [vmem:[%s10769_s1 + $0x1104] ss:$16 sps:$4 sm:$0xff]  }
 0x1e4   :  { %5251 = vmatprep.subr.bf16.mxu0 %v7738_v59  ;;  %5784 = vmatprep.subr.bf16.mxu1 %v7741_v60  ;;  %v7833_v59 = vld [vmem:[%s10769_s1 + $0x110c] ss:$16 sps:$4 sm:$0xff]   ;;  %v7828_v60 = vld [vmem:[%s10769_s1 + $0x1100] ss:$16 sps:$4 sm:$0xff]  }
 0x1e7   :  { %5252 = vmatpush1.bf16.msra.mxu0 %v7736_v61  ;;  %5785 = vmatpush1.bf16.msra.mxu1 %v7739_v62  ;;  %v7831_v61 = vld [vmem:[%s10769_s1 + $0x1108] ss:$16 sps:$4 sm:$0xff]   ;;  %v7836_v62 = vld [vmem:[%s10769_s1 + $0x1124] ss:$16 sps:$4 sm:$0xff]  }
 0x1e8   :  { %5253 = vmatprep.subr.bf16.mxu0 %v7744_v63  ;;  %5786 = vmatprep.subr.bf16.mxu1 %v7747_v0  ;;  %v7839_v63 = vld [vmem:[%s10769_s1 + $0x112c] ss:$16 sps:$4 sm:$0xff]   ;;  %v7834_v0 = vld [vmem:[%s10769_s1 + $0x1120] ss:$16 sps:$4 sm:$0xff]  }
 0x1eb   :  { %5254 = vmatpush1.bf16.msra.mxu0 %v7742_v1  ;;  %5787 = vmatpush1.bf16.msra.mxu1 %v7745_v2  ;;  %v7837_v1 = vld [vmem:[%s10769_s1 + $0x1128] ss:$16 sps:$4 sm:$0xff]   ;;  %v7842_v2 = vld [vmem:[%s10769_s1 + $0x1144] ss:$16 sps:$4 sm:$0xff]  }
 0x1ec   :  { %5255 = vmatprep.subr.bf16.mxu0 %v7750_v3  ;;  %5788 = vmatprep.subr.bf16.mxu1 %v7753_v4  ;;  %v7845_v3 = vld [vmem:[%s10769_s1 + $0x114c] ss:$16 sps:$4 sm:$0xff]   ;;  %v7840_v4 = vld [vmem:[%s10769_s1 + $0x1140] ss:$16 sps:$4 sm:$0xff]  }
 0x1ef   :  { %5256 = vmatpush1.bf16.msra.mxu0 %v7748_v5  ;;  %5789 = vmatpush1.bf16.msra.mxu1 %v7751_v6  ;;  %v7843_v5 = vld [vmem:[%s10769_s1 + $0x1148] ss:$16 sps:$4 sm:$0xff]   ;;  %v7848_v6 = vld [vmem:[%s10769_s1 + $0x1164] ss:$16 sps:$4 sm:$0xff]  }
 0x1f0   :  { %5257 = vmatprep.subr.bf16.mxu0 %v7756_v7  ;;  %5790 = vmatprep.subr.bf16.mxu1 %v7759_v8  ;;  %v7851_v7 = vld [vmem:[%s10769_s1 + $0x116c] ss:$16 sps:$4 sm:$0xff]   ;;  %v7846_v8 = vld [vmem:[%s10769_s1 + $0x1160] ss:$16 sps:$4 sm:$0xff]  }
 0x1f3   :  { %5258 = vmatpush1.bf16.msra.mxu0 %v7754_v9  ;;  %5791 = vmatpush1.bf16.msra.mxu1 %v7757_v10  ;;  %v7849_v9 = vld [vmem:[%s10769_s1 + $0x1168] ss:$16 sps:$4 sm:$0xff]   ;;  %v7854_v10 = vld [vmem:[%s10769_s1 + $0x1184] ss:$16 sps:$4 sm:$0xff]  }
 0x1f4   :  { %5259 = vmatprep.subr.bf16.mxu0 %v7762_v12  ;;  %5792 = vmatprep.subr.bf16.mxu1 %v7765_v13  ;;  %v7857_v12 = vld [vmem:[%s10769_s1 + $0x118c] ss:$16 sps:$4 sm:$0xff]   ;;  %v7852_v13 = vld [vmem:[%s10769_s1 + $0x1180] ss:$16 sps:$4 sm:$0xff]  }
 0x1f7   :  { %5260 = vmatpush1.bf16.msra.mxu0 %v7760_v15  ;;  %5793 = vmatpush1.bf16.msra.mxu1 %v7763_v11  ;;  %v7855_v15 = vld [vmem:[%s10769_s1 + $0x1188] ss:$16 sps:$4 sm:$0xff]   ;;  %v7860_v11 = vld [vmem:[%s10769_s1 + $0x11a4] ss:$16 sps:$4 sm:$0xff]  }
 0x1f8   :  { %5261 = vmatprep.subr.bf16.mxu0 %v7768_v17  ;;  %5794 = vmatprep.subr.bf16.mxu1 %v7771_v14  ;;  %v7863_v17 = vld [vmem:[%s10769_s1 + $0x11ac] ss:$16 sps:$4 sm:$0xff]   ;;  %v7858_v14 = vld [vmem:[%s10769_s1 + $0x11a0] ss:$16 sps:$4 sm:$0xff]  }
 0x1fb   :  { %5262 = vmatpush1.bf16.msra.mxu0 %v7766_v19  ;;  %5795 = vmatpush1.bf16.msra.mxu1 %v7769_v20  ;;  %v7861_v19 = vld [vmem:[%s10769_s1 + $0x11a8] ss:$16 sps:$4 sm:$0xff]   ;;  %v7866_v20 = vld [vmem:[%s10769_s1 + $0x11c4] ss:$16 sps:$4 sm:$0xff]  }
 0x1fc   :  { %5263 = vmatprep.subr.bf16.mxu0 %v7774_v16  ;;  %5796 = vmatprep.subr.bf16.mxu1 %v7777_v22  ;;  %v7869_v16 = vld [vmem:[%s10769_s1 + $0x11cc] ss:$16 sps:$4 sm:$0xff]   ;;  %v7864_v22 = vld [vmem:[%s10769_s1 + $0x11c0] ss:$16 sps:$4 sm:$0xff]  }
 0x1ff   :  { %5264 = vmatpush1.bf16.msra.mxu0 %v7772_v23  ;;  %5797 = vmatpush1.bf16.msra.mxu1 %v7775_v18  ;;  %v7867_v23 = vld [vmem:[%s10769_s1 + $0x11c8] ss:$16 sps:$4 sm:$0xff]   ;;  %v7872_v18 = vld [vmem:[%s10769_s1 + $0x11e4] ss:$16 sps:$4 sm:$0xff]  }
 0x200   :  { %5274 = vmatprep.subr.bf16.mxu0 %v7782_v25  ;;  %5807 = vmatprep.subr.bf16.mxu1 %v7785_v26  ;;  %v7875_v25 = vld [vmem:[%s10769_s1 + $0x11ec] ss:$16 sps:$4 sm:$0xff]   ;;  %v7870_v26 = vld [vmem:[%s10769_s1 + $0x11e0] ss:$16 sps:$4 sm:$0xff]  }
 0x202   :  { %5266 = vmatmul.mubr.bf16.vlgmr.msra.gmra.mrb[0].mxu0 %v6083_v27  ;;  %5799 = vmatmul.mubr.bf16.vlgmr.msra.gmra.mrb[0].mxu1 %v6083_v27  ;;  %v7873_v27 = vld [vmem:[%s10769_s1 + $0x11e8] ss:$16 sps:$4 sm:$0xff]  }
 0x203   :  { %5275 = vmatpush1.bf16.msra.mxu0 %v7780_v28  ;;  %5808 = vmatpush1.bf16.msra.mxu1 %v7783_v29  ;;  %v7880_v28 = vld [vmem:[%s10769_s1 + $0x1204] ss:$16 sps:$4 sm:$0xff]   ;;  %v7883_v29 = vld [vmem:[%s10769_s1 + $0x120c] ss:$16 sps:$4 sm:$0xff]  }
 0x204   :  { %5276 = vmatprep.subr.bf16.mxu0 %v7788_v24  ;;  %5809 = vmatprep.subr.bf16.mxu1 %v7791_v30  ;;  %v6085_v24 = vcombine.low %v9863_v21, %v9863_v21  ;;  %v10064_v30 = vld [vmem:[%s10770_s0 + $0x48] sm:$0xff]  ;;  %v7886_v21 = vld [vmem:[%s10769_s1 + $0x1224] ss:$16 sps:$4 sm:$0xff]  }
 0x205   :  { %5306 = vmatprep.mubr.bf16.mxu0 %v6086_v31  ;;  %5839 = vmatprep.mubr.bf16.mxu1 %v6086_v31  ;;  %v7878_v31 = vld [vmem:[%s10769_s1 + $0x1200] ss:$16 sps:$4 sm:$0xff]  }
 0x207   :  { %5277 = vmatpush1.bf16.msra.mxu0 %v7786_v32  ;;  %5810 = vmatpush1.bf16.msra.mxu1 %v7789_v33  ;;  %v7881_v32 = vld [vmem:[%s10769_s1 + $0x1208] ss:$16 sps:$4 sm:$0xff]   ;;  %v7889_v33 = vld [vmem:[%s10769_s1 + $0x122c] ss:$16 sps:$4 sm:$0xff]  }
 0x208   :  { %5278 = vmatprep.subr.bf16.mxu0 %v7794_v34  ;;  %5811 = vmatprep.subr.bf16.mxu1 %v7797_v35  ;;  %v6088_v34 = vcombine.high %v10064_v30, %v10064_v30  ;;  %v7884_v35 = vld [vmem:[%s10769_s1 + $0x1220] ss:$16 sps:$4 sm:$0xff]  }
 0x20b   :  { %5279 = vmatpush1.bf16.msra.mxu0 %v7792_v36  ;;  %5812 = vmatpush1.bf16.msra.mxu1 %v7795_v37  ;;  %v7887_v36 = vld [vmem:[%s10769_s1 + $0x1228] ss:$16 sps:$4 sm:$0xff]   ;;  %v7892_v37 = vld [vmem:[%s10769_s1 + $0x1244] ss:$16 sps:$4 sm:$0xff]  }
 0x20c   :  { %5280 = vmatprep.subr.bf16.mxu0 %v7800_v38  ;;  %5813 = vmatprep.subr.bf16.mxu1 %v7803_v39  ;;  %v7895_v38 = vld [vmem:[%s10769_s1 + $0x124c] ss:$16 sps:$4 sm:$0xff]   ;;  %v7890_v39 = vld [vmem:[%s10769_s1 + $0x1240] ss:$16 sps:$4 sm:$0xff]  }
 0x20f   :  { %5281 = vmatpush1.bf16.msra.mxu0 %v7798_v40  ;;  %5814 = vmatpush1.bf16.msra.mxu1 %v7801_v41  ;;  %v7893_v40 = vld [vmem:[%s10769_s1 + $0x1248] ss:$16 sps:$4 sm:$0xff]   ;;  %v7898_v41 = vld [vmem:[%s10769_s1 + $0x1264] ss:$16 sps:$4 sm:$0xff]  }
 0x210   :  { %5282 = vmatprep.subr.bf16.mxu0 %v7806_v42  ;;  %5815 = vmatprep.subr.bf16.mxu1 %v7809_v43  ;;  %v7901_v42 = vld [vmem:[%s10769_s1 + $0x126c] ss:$16 sps:$4 sm:$0xff]   ;;  %v7896_v43 = vld [vmem:[%s10769_s1 + $0x1260] ss:$16 sps:$4 sm:$0xff]  }
 0x213   :  { %5283 = vmatpush1.bf16.msra.mxu0 %v7804_v44  ;;  %5816 = vmatpush1.bf16.msra.mxu1 %v7807_v45  ;;  %v7899_v44 = vld [vmem:[%s10769_s1 + $0x1268] ss:$16 sps:$4 sm:$0xff]   ;;  %v7904_v45 = vld [vmem:[%s10769_s1 + $0x1284] ss:$16 sps:$4 sm:$0xff]  }
 0x214   :  { %5284 = vmatprep.subr.bf16.mxu0 %v7812_v46  ;;  %5817 = vmatprep.subr.bf16.mxu1 %v7815_v47  ;;  %v7907_v46 = vld [vmem:[%s10769_s1 + $0x128c] ss:$16 sps:$4 sm:$0xff]   ;;  %v7902_v47 = vld [vmem:[%s10769_s1 + $0x1280] ss:$16 sps:$4 sm:$0xff]  }
 0x217   :  { %5285 = vmatpush1.bf16.msra.mxu0 %v7810_v48  ;;  %5818 = vmatpush1.bf16.msra.mxu1 %v7813_v49  ;;  %v7905_v48 = vld [vmem:[%s10769_s1 + $0x1288] ss:$16 sps:$4 sm:$0xff]   ;;  %v7910_v49 = vld [vmem:[%s10769_s1 + $0x12a4] ss:$16 sps:$4 sm:$0xff]  }
 0x218   :  { %5286 = vmatprep.subr.bf16.mxu0 %v7818_v50  ;;  %5819 = vmatprep.subr.bf16.mxu1 %v7821_v51  ;;  %v7913_v50 = vld [vmem:[%s10769_s1 + $0x12ac] ss:$16 sps:$4 sm:$0xff]   ;;  %v7908_v51 = vld [vmem:[%s10769_s1 + $0x12a0] ss:$16 sps:$4 sm:$0xff]  }
 0x21b   :  { %5287 = vmatpush1.bf16.msra.mxu0 %v7816_v52  ;;  %5820 = vmatpush1.bf16.msra.mxu1 %v7819_v53  ;;  %v7911_v52 = vld [vmem:[%s10769_s1 + $0x12a8] ss:$16 sps:$4 sm:$0xff]   ;;  %v7916_v53 = vld [vmem:[%s10769_s1 + $0x12c4] ss:$16 sps:$4 sm:$0xff]  }
 0x21c   :  { %5288 = vmatprep.subr.bf16.mxu0 %v7824_v54  ;;  %5821 = vmatprep.subr.bf16.mxu1 %v7827_v55  ;;  %v7919_v54 = vld [vmem:[%s10769_s1 + $0x12cc] ss:$16 sps:$4 sm:$0xff]   ;;  %v7914_v55 = vld [vmem:[%s10769_s1 + $0x12c0] ss:$16 sps:$4 sm:$0xff]  }
 0x21f   :  { %5289 = vmatpush1.bf16.msra.mxu0 %v7822_v56  ;;  %5822 = vmatpush1.bf16.msra.mxu1 %v7825_v57  ;;  %v7917_v56 = vld [vmem:[%s10769_s1 + $0x12c8] ss:$16 sps:$4 sm:$0xff]   ;;  %v7922_v57 = vld [vmem:[%s10769_s1 + $0x12e4] ss:$16 sps:$4 sm:$0xff]  }
 0x220   :  { %5290 = vmatprep.subr.bf16.mxu0 %v7830_v58  ;;  %5823 = vmatprep.subr.bf16.mxu1 %v7833_v59  ;;  %v7925_v58 = vld [vmem:[%s10769_s1 + $0x12ec] ss:$16 sps:$4 sm:$0xff]   ;;  %v7920_v59 = vld [vmem:[%s10769_s1 + $0x12e0] ss:$16 sps:$4 sm:$0xff]  }
 0x223   :  { %5291 = vmatpush1.bf16.msra.mxu0 %v7828_v60  ;;  %5824 = vmatpush1.bf16.msra.mxu1 %v7831_v61  ;;  %v7923_v60 = vld [vmem:[%s10769_s1 + $0x12e8] ss:$16 sps:$4 sm:$0xff]   ;;  %v7928_v61 = vld [vmem:[%s10769_s1 + $0x1304] ss:$16 sps:$4 sm:$0xff]  }
 0x224   :  { %5292 = vmatprep.subr.bf16.mxu0 %v7836_v62  ;;  %5825 = vmatprep.subr.bf16.mxu1 %v7839_v63  ;;  %v7931_v62 = vld [vmem:[%s10769_s1 + $0x130c] ss:$16 sps:$4 sm:$0xff]   ;;  %v7926_v63 = vld [vmem:[%s10769_s1 + $0x1300] ss:$16 sps:$4 sm:$0xff]  }
 0x227   :  { %5293 = vmatpush1.bf16.msra.mxu0 %v7834_v0  ;;  %5826 = vmatpush1.bf16.msra.mxu1 %v7837_v1  ;;  %v7929_v0 = vld [vmem:[%s10769_s1 + $0x1308] ss:$16 sps:$4 sm:$0xff]   ;;  %v7934_v1 = vld [vmem:[%s10769_s1 + $0x1324] ss:$16 sps:$4 sm:$0xff]  }
 0x228   :  { %5294 = vmatprep.subr.bf16.mxu0 %v7842_v2  ;;  %5827 = vmatprep.subr.bf16.mxu1 %v7845_v3  ;;  %v7937_v2 = vld [vmem:[%s10769_s1 + $0x132c] ss:$16 sps:$4 sm:$0xff]   ;;  %v7932_v3 = vld [vmem:[%s10769_s1 + $0x1320] ss:$16 sps:$4 sm:$0xff]  }
 0x22b   :  { %5295 = vmatpush1.bf16.msra.mxu0 %v7840_v4  ;;  %5828 = vmatpush1.bf16.msra.mxu1 %v7843_v5  ;;  %v7935_v4 = vld [vmem:[%s10769_s1 + $0x1328] ss:$16 sps:$4 sm:$0xff]   ;;  %v7940_v5 = vld [vmem:[%s10769_s1 + $0x1344] ss:$16 sps:$4 sm:$0xff]  }
 0x22c   :  { %5296 = vmatprep.subr.bf16.mxu0 %v7848_v6  ;;  %5829 = vmatprep.subr.bf16.mxu1 %v7851_v7  ;;  %v7943_v6 = vld [vmem:[%s10769_s1 + $0x134c] ss:$16 sps:$4 sm:$0xff]   ;;  %v7938_v7 = vld [vmem:[%s10769_s1 + $0x1340] ss:$16 sps:$4 sm:$0xff]  }
 0x22f   :  { %5297 = vmatpush1.bf16.msra.mxu0 %v7846_v8  ;;  %5830 = vmatpush1.bf16.msra.mxu1 %v7849_v9  ;;  %v7941_v8 = vld [vmem:[%s10769_s1 + $0x1348] ss:$16 sps:$4 sm:$0xff]   ;;  %v7946_v9 = vld [vmem:[%s10769_s1 + $0x1364] ss:$16 sps:$4 sm:$0xff]  }
 0x230   :  { %5298 = vmatprep.subr.bf16.mxu0 %v7854_v10  ;;  %5831 = vmatprep.subr.bf16.mxu1 %v7857_v12  ;;  %v7949_v10 = vld [vmem:[%s10769_s1 + $0x136c] ss:$16 sps:$4 sm:$0xff]   ;;  %v7944_v12 = vld [vmem:[%s10769_s1 + $0x1360] ss:$16 sps:$4 sm:$0xff]  }
 0x233   :  { %5299 = vmatpush1.bf16.msra.mxu0 %v7852_v13  ;;  %5832 = vmatpush1.bf16.msra.mxu1 %v7855_v15  ;;  %v7947_v13 = vld [vmem:[%s10769_s1 + $0x1368] ss:$16 sps:$4 sm:$0xff]   ;;  %v7952_v15 = vld [vmem:[%s10769_s1 + $0x1384] ss:$16 sps:$4 sm:$0xff]  }
 0x234   :  { %5300 = vmatprep.subr.bf16.mxu0 %v7860_v11  ;;  %5833 = vmatprep.subr.bf16.mxu1 %v7863_v17  ;;  %v7955_v11 = vld [vmem:[%s10769_s1 + $0x138c] ss:$16 sps:$4 sm:$0xff]   ;;  %v7950_v17 = vld [vmem:[%s10769_s1 + $0x1380] ss:$16 sps:$4 sm:$0xff]  }
 0x237   :  { %5301 = vmatpush1.bf16.msra.mxu0 %v7858_v14  ;;  %5834 = vmatpush1.bf16.msra.mxu1 %v7861_v19  ;;  %v7953_v14 = vld [vmem:[%s10769_s1 + $0x1388] ss:$16 sps:$4 sm:$0xff]   ;;  %v7958_v19 = vld [vmem:[%s10769_s1 + $0x13a4] ss:$16 sps:$4 sm:$0xff]  }
 0x238   :  { %5302 = vmatprep.subr.bf16.mxu0 %v7866_v20  ;;  %5835 = vmatprep.subr.bf16.mxu1 %v7869_v16  ;;  %v7961_v20 = vld [vmem:[%s10769_s1 + $0x13ac] ss:$16 sps:$4 sm:$0xff]   ;;  %v7956_v16 = vld [vmem:[%s10769_s1 + $0x13a0] ss:$16 sps:$4 sm:$0xff]  }
 0x23b   :  { %5303 = vmatpush1.bf16.msra.mxu0 %v7864_v22  ;;  %5836 = vmatpush1.bf16.msra.mxu1 %v7867_v23  ;;  %v7959_v22 = vld [vmem:[%s10769_s1 + $0x13a8] ss:$16 sps:$4 sm:$0xff]   ;;  %v7964_v23 = vld [vmem:[%s10769_s1 + $0x13c4] ss:$16 sps:$4 sm:$0xff]  }
 0x23c   :  { %5304 = vmatprep.subr.bf16.mxu0 %v7872_v18  ;;  %5837 = vmatprep.subr.bf16.mxu1 %v7875_v25  ;;  %v7967_v18 = vld [vmem:[%s10769_s1 + $0x13cc] ss:$16 sps:$4 sm:$0xff]   ;;  %v7962_v25 = vld [vmem:[%s10769_s1 + $0x13c0] ss:$16 sps:$4 sm:$0xff]  }
 0x23f   :  { %5305 = vmatpush1.bf16.msra.mxu0 %v7870_v26  ;;  %5838 = vmatpush1.bf16.msra.mxu1 %v7873_v27  ;;  %v7965_v26 = vld [vmem:[%s10769_s1 + $0x13c8] ss:$16 sps:$4 sm:$0xff]   ;;  %v7970_v27 = vld [vmem:[%s10769_s1 + $0x13e4] ss:$16 sps:$4 sm:$0xff]  }
 0x240   :  { %5315 = vmatprep.subr.bf16.mxu0 %v7880_v28  ;;  %5848 = vmatprep.subr.bf16.mxu1 %v7883_v29  ;;  %v7973_v28 = vld [vmem:[%s10769_s1 + $0x13ec] ss:$16 sps:$4 sm:$0xff]   ;;  %v7968_v29 = vld [vmem:[%s10769_s1 + $0x13e0] ss:$16 sps:$4 sm:$0xff]  }
 0x242   :  { %5307 = vmatmul.mubr.bf16.vlgmr.msra.gmra.mrb[0].mxu0 %v6085_v24  ;;  %5840 = vmatmul.mubr.bf16.vlgmr.msra.gmra.mrb[0].mxu1 %v6085_v24  ;;  %v7971_v24 = vld [vmem:[%s10769_s1 + $0x13e8] ss:$16 sps:$4 sm:$0xff]  }
 0x243   :  { %5316 = vmatpush1.bf16.msra.mxu0 %v7878_v31  ;;  %5849 = vmatpush1.bf16.msra.mxu1 %v7881_v32  ;;  %v7978_v31 = vld [vmem:[%s10769_s1 + $0x1404] ss:$16 sps:$4 sm:$0xff]   ;;  %v7981_v32 = vld [vmem:[%s10769_s1 + $0x140c] ss:$16 sps:$4 sm:$0xff]  }
 0x244   :  { %5317 = vmatprep.subr.bf16.mxu0 %v7886_v21  ;;  %5850 = vmatprep.subr.bf16.mxu1 %v7889_v33  ;;  %v6087_v21 = vcombine.low %v10064_v30, %v10064_v30  ;;  %v10265_v33 = vld [vmem:[%s10770_s0 + $0x50] sm:$0xff] }
 0x245   :  { %5347 = vmatprep.mubr.bf16.mxu0 %v6088_v34  ;;  %5880 = vmatprep.mubr.bf16.mxu1 %v6088_v34  ;;  %v7976_v34 = vld [vmem:[%s10769_s1 + $0x1400] ss:$16 sps:$4 sm:$0xff]   ;;  %v7984_v30 = vld [vmem:[%s10769_s1 + $0x1424] ss:$16 sps:$4 sm:$0xff]  }
 0x247   :  { %5318 = vmatpush1.bf16.msra.mxu0 %v7884_v35  ;;  %5851 = vmatpush1.bf16.msra.mxu1 %v7887_v36  ;;  %v7979_v35 = vld [vmem:[%s10769_s1 + $0x1408] ss:$16 sps:$4 sm:$0xff]   ;;  %v7987_v36 = vld [vmem:[%s10769_s1 + $0x142c] ss:$16 sps:$4 sm:$0xff]  }
 0x248   :  { %5319 = vmatprep.subr.bf16.mxu0 %v7892_v37  ;;  %5852 = vmatprep.subr.bf16.mxu1 %v7895_v38  ;;  %v6090_v37 = vcombine.high %v10265_v33, %v10265_v33  ;;  %v7982_v38 = vld [vmem:[%s10769_s1 + $0x1420] ss:$16 sps:$4 sm:$0xff]  }
 0x24b   :  { %5320 = vmatpush1.bf16.msra.mxu0 %v7890_v39  ;;  %5853 = vmatpush1.bf16.msra.mxu1 %v7893_v40  ;;  %v7985_v39 = vld [vmem:[%s10769_s1 + $0x1428] ss:$16 sps:$4 sm:$0xff]   ;;  %v7990_v40 = vld [vmem:[%s10769_s1 + $0x1444] ss:$16 sps:$4 sm:$0xff]  }
 0x24c   :  { %5321 = vmatprep.subr.bf16.mxu0 %v7898_v41  ;;  %5854 = vmatprep.subr.bf16.mxu1 %v7901_v42  ;;  %v7993_v41 = vld [vmem:[%s10769_s1 + $0x144c] ss:$16 sps:$4 sm:$0xff]   ;;  %v7988_v42 = vld [vmem:[%s10769_s1 + $0x1440] ss:$16 sps:$4 sm:$0xff]  }
 0x24f   :  { %5322 = vmatpush1.bf16.msra.mxu0 %v7896_v43  ;;  %5855 = vmatpush1.bf16.msra.mxu1 %v7899_v44  ;;  %v7991_v43 = vld [vmem:[%s10769_s1 + $0x1448] ss:$16 sps:$4 sm:$0xff]   ;;  %v7996_v44 = vld [vmem:[%s10769_s1 + $0x1464] ss:$16 sps:$4 sm:$0xff]  }
 0x250   :  { %5323 = vmatprep.subr.bf16.mxu0 %v7904_v45  ;;  %5856 = vmatprep.subr.bf16.mxu1 %v7907_v46  ;;  %v7999_v45 = vld [vmem:[%s10769_s1 + $0x146c] ss:$16 sps:$4 sm:$0xff]   ;;  %v7994_v46 = vld [vmem:[%s10769_s1 + $0x1460] ss:$16 sps:$4 sm:$0xff]  }
 0x253   :  { %5324 = vmatpush1.bf16.msra.mxu0 %v7902_v47  ;;  %5857 = vmatpush1.bf16.msra.mxu1 %v7905_v48  ;;  %v7997_v47 = vld [vmem:[%s10769_s1 + $0x1468] ss:$16 sps:$4 sm:$0xff]   ;;  %v8002_v48 = vld [vmem:[%s10769_s1 + $0x1484] ss:$16 sps:$4 sm:$0xff]  }
 0x254   :  { %5325 = vmatprep.subr.bf16.mxu0 %v7910_v49  ;;  %5858 = vmatprep.subr.bf16.mxu1 %v7913_v50  ;;  %v8005_v49 = vld [vmem:[%s10769_s1 + $0x148c] ss:$16 sps:$4 sm:$0xff]   ;;  %v8000_v50 = vld [vmem:[%s10769_s1 + $0x1480] ss:$16 sps:$4 sm:$0xff]  }
 0x257   :  { %5326 = vmatpush1.bf16.msra.mxu0 %v7908_v51  ;;  %5859 = vmatpush1.bf16.msra.mxu1 %v7911_v52  ;;  %v8003_v51 = vld [vmem:[%s10769_s1 + $0x1488] ss:$16 sps:$4 sm:$0xff]   ;;  %v8008_v52 = vld [vmem:[%s10769_s1 + $0x14a4] ss:$16 sps:$4 sm:$0xff]  }
 0x258   :  { %5327 = vmatprep.subr.bf16.mxu0 %v7916_v53  ;;  %5860 = vmatprep.subr.bf16.mxu1 %v7919_v54  ;;  %v8011_v53 = vld [vmem:[%s10769_s1 + $0x14ac] ss:$16 sps:$4 sm:$0xff]   ;;  %v8006_v54 = vld [vmem:[%s10769_s1 + $0x14a0] ss:$16 sps:$4 sm:$0xff]  }
 0x25b   :  { %5328 = vmatpush1.bf16.msra.mxu0 %v7914_v55  ;;  %5861 = vmatpush1.bf16.msra.mxu1 %v7917_v56  ;;  %v8009_v55 = vld [vmem:[%s10769_s1 + $0x14a8] ss:$16 sps:$4 sm:$0xff]   ;;  %v8014_v56 = vld [vmem:[%s10769_s1 + $0x14c4] ss:$16 sps:$4 sm:$0xff]  }
 0x25c   :  { %5329 = vmatprep.subr.bf16.mxu0 %v7922_v57  ;;  %5862 = vmatprep.subr.bf16.mxu1 %v7925_v58  ;;  %v8017_v57 = vld [vmem:[%s10769_s1 + $0x14cc] ss:$16 sps:$4 sm:$0xff]   ;;  %v8012_v58 = vld [vmem:[%s10769_s1 + $0x14c0] ss:$16 sps:$4 sm:$0xff]  }
 0x25f   :  { %5330 = vmatpush1.bf16.msra.mxu0 %v7920_v59  ;;  %5863 = vmatpush1.bf16.msra.mxu1 %v7923_v60  ;;  %v8015_v59 = vld [vmem:[%s10769_s1 + $0x14c8] ss:$16 sps:$4 sm:$0xff]   ;;  %v8020_v60 = vld [vmem:[%s10769_s1 + $0x14e4] ss:$16 sps:$4 sm:$0xff]  }
 0x260   :  { %5331 = vmatprep.subr.bf16.mxu0 %v7928_v61  ;;  %5864 = vmatprep.subr.bf16.mxu1 %v7931_v62  ;;  %v8023_v61 = vld [vmem:[%s10769_s1 + $0x14ec] ss:$16 sps:$4 sm:$0xff]   ;;  %v8018_v62 = vld [vmem:[%s10769_s1 + $0x14e0] ss:$16 sps:$4 sm:$0xff]  }
 0x263   :  { %5332 = vmatpush1.bf16.msra.mxu0 %v7926_v63  ;;  %5865 = vmatpush1.bf16.msra.mxu1 %v7929_v0  ;;  %v8021_v63 = vld [vmem:[%s10769_s1 + $0x14e8] ss:$16 sps:$4 sm:$0xff]   ;;  %v8026_v0 = vld [vmem:[%s10769_s1 + $0x1504] ss:$16 sps:$4 sm:$0xff]  }
 0x264   :  { %5333 = vmatprep.subr.bf16.mxu0 %v7934_v1  ;;  %5866 = vmatprep.subr.bf16.mxu1 %v7937_v2  ;;  %v8029_v1 = vld [vmem:[%s10769_s1 + $0x150c] ss:$16 sps:$4 sm:$0xff]   ;;  %v8024_v2 = vld [vmem:[%s10769_s1 + $0x1500] ss:$16 sps:$4 sm:$0xff]  }
 0x267   :  { %5334 = vmatpush1.bf16.msra.mxu0 %v7932_v3  ;;  %5867 = vmatpush1.bf16.msra.mxu1 %v7935_v4  ;;  %v8027_v3 = vld [vmem:[%s10769_s1 + $0x1508] ss:$16 sps:$4 sm:$0xff]   ;;  %v8032_v4 = vld [vmem:[%s10769_s1 + $0x1524] ss:$16 sps:$4 sm:$0xff]  }
 0x268   :  { %5335 = vmatprep.subr.bf16.mxu0 %v7940_v5  ;;  %5868 = vmatprep.subr.bf16.mxu1 %v7943_v6  ;;  %v8035_v5 = vld [vmem:[%s10769_s1 + $0x152c] ss:$16 sps:$4 sm:$0xff]   ;;  %v8030_v6 = vld [vmem:[%s10769_s1 + $0x1520] ss:$16 sps:$4 sm:$0xff]  }
 0x26b   :  { %5336 = vmatpush1.bf16.msra.mxu0 %v7938_v7  ;;  %5869 = vmatpush1.bf16.msra.mxu1 %v7941_v8  ;;  %v8033_v7 = vld [vmem:[%s10769_s1 + $0x1528] ss:$16 sps:$4 sm:$0xff]   ;;  %v8038_v8 = vld [vmem:[%s10769_s1 + $0x1544] ss:$16 sps:$4 sm:$0xff]  }
 0x26c   :  { %5337 = vmatprep.subr.bf16.mxu0 %v7946_v9  ;;  %5870 = vmatprep.subr.bf16.mxu1 %v7949_v10  ;;  %v8041_v9 = vld [vmem:[%s10769_s1 + $0x154c] ss:$16 sps:$4 sm:$0xff]   ;;  %v8036_v10 = vld [vmem:[%s10769_s1 + $0x1540] ss:$16 sps:$4 sm:$0xff]  }
 0x26f   :  { %5338 = vmatpush1.bf16.msra.mxu0 %v7944_v12  ;;  %5871 = vmatpush1.bf16.msra.mxu1 %v7947_v13  ;;  %v8039_v12 = vld [vmem:[%s10769_s1 + $0x1548] ss:$16 sps:$4 sm:$0xff]   ;;  %v8044_v13 = vld [vmem:[%s10769_s1 + $0x1564] ss:$16 sps:$4 sm:$0xff]  }
 0x270   :  { %5339 = vmatprep.subr.bf16.mxu0 %v7952_v15  ;;  %5872 = vmatprep.subr.bf16.mxu1 %v7955_v11  ;;  %v8047_v15 = vld [vmem:[%s10769_s1 + $0x156c] ss:$16 sps:$4 sm:$0xff]   ;;  %v8042_v11 = vld [vmem:[%s10769_s1 + $0x1560] ss:$16 sps:$4 sm:$0xff]  }
 0x273   :  { %5340 = vmatpush1.bf16.msra.mxu0 %v7950_v17  ;;  %5873 = vmatpush1.bf16.msra.mxu1 %v7953_v14  ;;  %v8045_v17 = vld [vmem:[%s10769_s1 + $0x1568] ss:$16 sps:$4 sm:$0xff]   ;;  %v8050_v14 = vld [vmem:[%s10769_s1 + $0x1584] ss:$16 sps:$4 sm:$0xff]  }
 0x274   :  { %5341 = vmatprep.subr.bf16.mxu0 %v7958_v19  ;;  %5874 = vmatprep.subr.bf16.mxu1 %v7961_v20  ;;  %v8053_v19 = vld [vmem:[%s10769_s1 + $0x158c] ss:$16 sps:$4 sm:$0xff]   ;;  %v8048_v20 = vld [vmem:[%s10769_s1 + $0x1580] ss:$16 sps:$4 sm:$0xff]  }
 0x277   :  { %5342 = vmatpush1.bf16.msra.mxu0 %v7956_v16  ;;  %5875 = vmatpush1.bf16.msra.mxu1 %v7959_v22  ;;  %v8051_v16 = vld [vmem:[%s10769_s1 + $0x1588] ss:$16 sps:$4 sm:$0xff]   ;;  %v8056_v22 = vld [vmem:[%s10769_s1 + $0x15a4] ss:$16 sps:$4 sm:$0xff]  }
 0x278   :  { %5343 = vmatprep.subr.bf16.mxu0 %v7964_v23  ;;  %5876 = vmatprep.subr.bf16.mxu1 %v7967_v18  ;;  %v8059_v23 = vld [vmem:[%s10769_s1 + $0x15ac] ss:$16 sps:$4 sm:$0xff]   ;;  %v8054_v18 = vld [vmem:[%s10769_s1 + $0x15a0] ss:$16 sps:$4 sm:$0xff]  }
 0x27b   :  { %5344 = vmatpush1.bf16.msra.mxu0 %v7962_v25  ;;  %5877 = vmatpush1.bf16.msra.mxu1 %v7965_v26  ;;  %v8057_v25 = vld [vmem:[%s10769_s1 + $0x15a8] ss:$16 sps:$4 sm:$0xff]   ;;  %v8062_v26 = vld [vmem:[%s10769_s1 + $0x15c4] ss:$16 sps:$4 sm:$0xff]  }
 0x27c   :  { %5345 = vmatprep.subr.bf16.mxu0 %v7970_v27  ;;  %5878 = vmatprep.subr.bf16.mxu1 %v7973_v28  ;;  %v8065_v27 = vld [vmem:[%s10769_s1 + $0x15cc] ss:$16 sps:$4 sm:$0xff]   ;;  %v8060_v28 = vld [vmem:[%s10769_s1 + $0x15c0] ss:$16 sps:$4 sm:$0xff]  }
 0x27f   :  { %5346 = vmatpush1.bf16.msra.mxu0 %v7968_v29  ;;  %5879 = vmatpush1.bf16.msra.mxu1 %v7971_v24  ;;  %v8063_v29 = vld [vmem:[%s10769_s1 + $0x15c8] ss:$16 sps:$4 sm:$0xff]   ;;  %v8068_v24 = vld [vmem:[%s10769_s1 + $0x15e4] ss:$16 sps:$4 sm:$0xff]  }
 0x280   :  { %5356 = vmatprep.subr.bf16.mxu0 %v7978_v31  ;;  %5889 = vmatprep.subr.bf16.mxu1 %v7981_v32  ;;  %v8071_v31 = vld [vmem:[%s10769_s1 + $0x15ec] ss:$16 sps:$4 sm:$0xff]   ;;  %v8066_v32 = vld [vmem:[%s10769_s1 + $0x15e0] ss:$16 sps:$4 sm:$0xff]  }
 0x282   :  { %5348 = vmatmul.mubr.bf16.vlgmr.msra.gmra.mrb[0].mxu0 %v6087_v21  ;;  %5881 = vmatmul.mubr.bf16.vlgmr.msra.gmra.mrb[0].mxu1 %v6087_v21  ;;  %v8069_v21 = vld [vmem:[%s10769_s1 + $0x15e8] ss:$16 sps:$4 sm:$0xff]  }
 0x283   :  { %5357 = vmatpush1.bf16.msra.mxu0 %v7976_v34  ;;  %5890 = vmatpush1.bf16.msra.mxu1 %v7979_v35  ;;  %v8076_v34 = vld [vmem:[%s10769_s1 + $0x1604] ss:$16 sps:$4 sm:$0xff]   ;;  %v8079_v35 = vld [vmem:[%s10769_s1 + $0x160c] ss:$16 sps:$4 sm:$0xff]  }
 0x284   :  { %5358 = vmatprep.subr.bf16.mxu0 %v7984_v30  ;;  %5891 = vmatprep.subr.bf16.mxu1 %v7987_v36  ;;  %v6089_v30 = vcombine.low %v10265_v33, %v10265_v33  ;;  %v10466_v36 = vld [vmem:[%s10770_s0 + $0x58] sm:$0xff]  ;;  %v8082_v33 = vld [vmem:[%s10769_s1 + $0x1624] ss:$16 sps:$4 sm:$0xff]  }
 0x285   :  { %5388 = vmatprep.mubr.bf16.mxu0 %v6090_v37  ;;  %5921 = vmatprep.mubr.bf16.mxu1 %v6090_v37  ;;  %v8074_v37 = vld [vmem:[%s10769_s1 + $0x1600] ss:$16 sps:$4 sm:$0xff]  }
 0x287   :  { %5359 = vmatpush1.bf16.msra.mxu0 %v7982_v38  ;;  %5892 = vmatpush1.bf16.msra.mxu1 %v7985_v39  ;;  %v8077_v38 = vld [vmem:[%s10769_s1 + $0x1608] ss:$16 sps:$4 sm:$0xff]   ;;  %v8085_v39 = vld [vmem:[%s10769_s1 + $0x162c] ss:$16 sps:$4 sm:$0xff]  }
 0x288   :  { %5360 = vmatprep.subr.bf16.mxu0 %v7990_v40  ;;  %5893 = vmatprep.subr.bf16.mxu1 %v7993_v41  ;;  %v6092_v40 = vcombine.high %v10466_v36, %v10466_v36  ;;  %v8080_v41 = vld [vmem:[%s10769_s1 + $0x1620] ss:$16 sps:$4 sm:$0xff]  }
 0x28b   :  { %5361 = vmatpush1.bf16.msra.mxu0 %v7988_v42  ;;  %5894 = vmatpush1.bf16.msra.mxu1 %v7991_v43  ;;  %v8083_v42 = vld [vmem:[%s10769_s1 + $0x1628] ss:$16 sps:$4 sm:$0xff]   ;;  %v8088_v43 = vld [vmem:[%s10769_s1 + $0x1644] ss:$16 sps:$4 sm:$0xff]  }
 0x28c   :  { %5362 = vmatprep.subr.bf16.mxu0 %v7996_v44  ;;  %5895 = vmatprep.subr.bf16.mxu1 %v7999_v45  ;;  %v8091_v44 = vld [vmem:[%s10769_s1 + $0x164c] ss:$16 sps:$4 sm:$0xff]   ;;  %v8086_v45 = vld [vmem:[%s10769_s1 + $0x1640] ss:$16 sps:$4 sm:$0xff]  }
 0x28f   :  { %5363 = vmatpush1.bf16.msra.mxu0 %v7994_v46  ;;  %5896 = vmatpush1.bf16.msra.mxu1 %v7997_v47  ;;  %v8089_v46 = vld [vmem:[%s10769_s1 + $0x1648] ss:$16 sps:$4 sm:$0xff]   ;;  %v8094_v47 = vld [vmem:[%s10769_s1 + $0x1664] ss:$16 sps:$4 sm:$0xff]  }
 0x290   :  { %5364 = vmatprep.subr.bf16.mxu0 %v8002_v48  ;;  %5897 = vmatprep.subr.bf16.mxu1 %v8005_v49  ;;  %v8097_v48 = vld [vmem:[%s10769_s1 + $0x166c] ss:$16 sps:$4 sm:$0xff]   ;;  %v8092_v49 = vld [vmem:[%s10769_s1 + $0x1660] ss:$16 sps:$4 sm:$0xff]  }
 0x293   :  { %5365 = vmatpush1.bf16.msra.mxu0 %v8000_v50  ;;  %5898 = vmatpush1.bf16.msra.mxu1 %v8003_v51  ;;  %v8095_v50 = vld [vmem:[%s10769_s1 + $0x1668] ss:$16 sps:$4 sm:$0xff]   ;;  %v8100_v51 = vld [vmem:[%s10769_s1 + $0x1684] ss:$16 sps:$4 sm:$0xff]  }
 0x294   :  { %5366 = vmatprep.subr.bf16.mxu0 %v8008_v52  ;;  %5899 = vmatprep.subr.bf16.mxu1 %v8011_v53  ;;  %v8103_v52 = vld [vmem:[%s10769_s1 + $0x168c] ss:$16 sps:$4 sm:$0xff]   ;;  %v8098_v53 = vld [vmem:[%s10769_s1 + $0x1680] ss:$16 sps:$4 sm:$0xff]  }
 0x297   :  { %5367 = vmatpush1.bf16.msra.mxu0 %v8006_v54  ;;  %5900 = vmatpush1.bf16.msra.mxu1 %v8009_v55  ;;  %v8101_v54 = vld [vmem:[%s10769_s1 + $0x1688] ss:$16 sps:$4 sm:$0xff]   ;;  %v8106_v55 = vld [vmem:[%s10769_s1 + $0x16a4] ss:$16 sps:$4 sm:$0xff]  }
 0x298   :  { %5368 = vmatprep.subr.bf16.mxu0 %v8014_v56  ;;  %5901 = vmatprep.subr.bf16.mxu1 %v8017_v57  ;;  %v8109_v56 = vld [vmem:[%s10769_s1 + $0x16ac] ss:$16 sps:$4 sm:$0xff]   ;;  %v8104_v57 = vld [vmem:[%s10769_s1 + $0x16a0] ss:$16 sps:$4 sm:$0xff]  }
 0x29b   :  { %5369 = vmatpush1.bf16.msra.mxu0 %v8012_v58  ;;  %5902 = vmatpush1.bf16.msra.mxu1 %v8015_v59  ;;  %v8107_v58 = vld [vmem:[%s10769_s1 + $0x16a8] ss:$16 sps:$4 sm:$0xff]   ;;  %v8112_v59 = vld [vmem:[%s10769_s1 + $0x16c4] ss:$16 sps:$4 sm:$0xff]  }
 0x29c   :  { %5370 = vmatprep.subr.bf16.mxu0 %v8020_v60  ;;  %5903 = vmatprep.subr.bf16.mxu1 %v8023_v61  ;;  %v8115_v60 = vld [vmem:[%s10769_s1 + $0x16cc] ss:$16 sps:$4 sm:$0xff]   ;;  %v8110_v61 = vld [vmem:[%s10769_s1 + $0x16c0] ss:$16 sps:$4 sm:$0xff]  }
 0x29f   :  { %5371 = vmatpush1.bf16.msra.mxu0 %v8018_v62  ;;  %5904 = vmatpush1.bf16.msra.mxu1 %v8021_v63  ;;  %v8113_v62 = vld [vmem:[%s10769_s1 + $0x16c8] ss:$16 sps:$4 sm:$0xff]   ;;  %v8118_v63 = vld [vmem:[%s10769_s1 + $0x16e4] ss:$16 sps:$4 sm:$0xff]  }
 0x2a0   :  { %5372 = vmatprep.subr.bf16.mxu0 %v8026_v0  ;;  %5905 = vmatprep.subr.bf16.mxu1 %v8029_v1  ;;  %v8121_v0 = vld [vmem:[%s10769_s1 + $0x16ec] ss:$16 sps:$4 sm:$0xff]   ;;  %v8116_v1 = vld [vmem:[%s10769_s1 + $0x16e0] ss:$16 sps:$4 sm:$0xff]  }
 0x2a3   :  { %5373 = vmatpush1.bf16.msra.mxu0 %v8024_v2  ;;  %5906 = vmatpush1.bf16.msra.mxu1 %v8027_v3  ;;  %v8119_v2 = vld [vmem:[%s10769_s1 + $0x16e8] ss:$16 sps:$4 sm:$0xff]   ;;  %v8124_v3 = vld [vmem:[%s10769_s1 + $0x1704] ss:$16 sps:$4 sm:$0xff]  }
 0x2a4   :  { %5374 = vmatprep.subr.bf16.mxu0 %v8032_v4  ;;  %5907 = vmatprep.subr.bf16.mxu1 %v8035_v5  ;;  %v8127_v4 = vld [vmem:[%s10769_s1 + $0x170c] ss:$16 sps:$4 sm:$0xff]   ;;  %v8122_v5 = vld [vmem:[%s10769_s1 + $0x1700] ss:$16 sps:$4 sm:$0xff]  }
 0x2a7   :  { %5375 = vmatpush1.bf16.msra.mxu0 %v8030_v6  ;;  %5908 = vmatpush1.bf16.msra.mxu1 %v8033_v7  ;;  %v8125_v6 = vld [vmem:[%s10769_s1 + $0x1708] ss:$16 sps:$4 sm:$0xff]   ;;  %v8130_v7 = vld [vmem:[%s10769_s1 + $0x1724] ss:$16 sps:$4 sm:$0xff]  }
 0x2a8   :  { %5376 = vmatprep.subr.bf16.mxu0 %v8038_v8  ;;  %5909 = vmatprep.subr.bf16.mxu1 %v8041_v9  ;;  %v8133_v8 = vld [vmem:[%s10769_s1 + $0x172c] ss:$16 sps:$4 sm:$0xff]   ;;  %v8128_v9 = vld [vmem:[%s10769_s1 + $0x1720] ss:$16 sps:$4 sm:$0xff]  }
 0x2ab   :  { %5377 = vmatpush1.bf16.msra.mxu0 %v8036_v10  ;;  %5910 = vmatpush1.bf16.msra.mxu1 %v8039_v12  ;;  %v8131_v10 = vld [vmem:[%s10769_s1 + $0x1728] ss:$16 sps:$4 sm:$0xff]   ;;  %v8136_v12 = vld [vmem:[%s10769_s1 + $0x1744] ss:$16 sps:$4 sm:$0xff]  }
 0x2ac   :  { %5378 = vmatprep.subr.bf16.mxu0 %v8044_v13  ;;  %5911 = vmatprep.subr.bf16.mxu1 %v8047_v15  ;;  %v8139_v13 = vld [vmem:[%s10769_s1 + $0x174c] ss:$16 sps:$4 sm:$0xff]   ;;  %v8134_v15 = vld [vmem:[%s10769_s1 + $0x1740] ss:$16 sps:$4 sm:$0xff]  }
 0x2af   :  { %5379 = vmatpush1.bf16.msra.mxu0 %v8042_v11  ;;  %5912 = vmatpush1.bf16.msra.mxu1 %v8045_v17  ;;  %v8137_v11 = vld [vmem:[%s10769_s1 + $0x1748] ss:$16 sps:$4 sm:$0xff]   ;;  %v8142_v17 = vld [vmem:[%s10769_s1 + $0x1764] ss:$16 sps:$4 sm:$0xff]  }
 0x2b0   :  { %5380 = vmatprep.subr.bf16.mxu0 %v8050_v14  ;;  %5913 = vmatprep.subr.bf16.mxu1 %v8053_v19  ;;  %v8145_v14 = vld [vmem:[%s10769_s1 + $0x176c] ss:$16 sps:$4 sm:$0xff]   ;;  %v8140_v19 = vld [vmem:[%s10769_s1 + $0x1760] ss:$16 sps:$4 sm:$0xff]  }
 0x2b3   :  { %5381 = vmatpush1.bf16.msra.mxu0 %v8048_v20  ;;  %5914 = vmatpush1.bf16.msra.mxu1 %v8051_v16  ;;  %v8143_v20 = vld [vmem:[%s10769_s1 + $0x1768] ss:$16 sps:$4 sm:$0xff]   ;;  %v8148_v16 = vld [vmem:[%s10769_s1 + $0x1784] ss:$16 sps:$4 sm:$0xff]  }
 0x2b4   :  { %5382 = vmatprep.subr.bf16.mxu0 %v8056_v22  ;;  %5915 = vmatprep.subr.bf16.mxu1 %v8059_v23  ;;  %v8151_v22 = vld [vmem:[%s10769_s1 + $0x178c] ss:$16 sps:$4 sm:$0xff]   ;;  %v8146_v23 = vld [vmem:[%s10769_s1 + $0x1780] ss:$16 sps:$4 sm:$0xff]  }
 0x2b7   :  { %5383 = vmatpush1.bf16.msra.mxu0 %v8054_v18  ;;  %5916 = vmatpush1.bf16.msra.mxu1 %v8057_v25  ;;  %v8149_v18 = vld [vmem:[%s10769_s1 + $0x1788] ss:$16 sps:$4 sm:$0xff]   ;;  %v8154_v25 = vld [vmem:[%s10769_s1 + $0x17a4] ss:$16 sps:$4 sm:$0xff]  }
 0x2b8   :  { %5384 = vmatprep.subr.bf16.mxu0 %v8062_v26  ;;  %5917 = vmatprep.subr.bf16.mxu1 %v8065_v27  ;;  %v8157_v26 = vld [vmem:[%s10769_s1 + $0x17ac] ss:$16 sps:$4 sm:$0xff]   ;;  %v8152_v27 = vld [vmem:[%s10769_s1 + $0x17a0] ss:$16 sps:$4 sm:$0xff]  }
 0x2bb   :  { %5385 = vmatpush1.bf16.msra.mxu0 %v8060_v28  ;;  %5918 = vmatpush1.bf16.msra.mxu1 %v8063_v29  ;;  %v8155_v28 = vld [vmem:[%s10769_s1 + $0x17a8] ss:$16 sps:$4 sm:$0xff]   ;;  %v8160_v29 = vld [vmem:[%s10769_s1 + $0x17c4] ss:$16 sps:$4 sm:$0xff]  }
 0x2bc   :  { %5386 = vmatprep.subr.bf16.mxu0 %v8068_v24  ;;  %5919 = vmatprep.subr.bf16.mxu1 %v8071_v31  ;;  %v8163_v24 = vld [vmem:[%s10769_s1 + $0x17cc] ss:$16 sps:$4 sm:$0xff]   ;;  %v8158_v31 = vld [vmem:[%s10769_s1 + $0x17c0] ss:$16 sps:$4 sm:$0xff]  }
 0x2bf   :  { %5387 = vmatpush1.bf16.msra.mxu0 %v8066_v32  ;;  %5920 = vmatpush1.bf16.msra.mxu1 %v8069_v21  ;;  %v8161_v32 = vld [vmem:[%s10769_s1 + $0x17c8] ss:$16 sps:$4 sm:$0xff]   ;;  %v8166_v21 = vld [vmem:[%s10769_s1 + $0x17e4] ss:$16 sps:$4 sm:$0xff]  }
 0x2c0   :  { %5397 = vmatprep.subr.bf16.mxu0 %v8076_v34  ;;  %5930 = vmatprep.subr.bf16.mxu1 %v8079_v35  ;;  %v8169_v34 = vld [vmem:[%s10769_s1 + $0x17ec] ss:$16 sps:$4 sm:$0xff]   ;;  %v8164_v35 = vld [vmem:[%s10769_s1 + $0x17e0] ss:$16 sps:$4 sm:$0xff]  }
 0x2c2   :  { %5389 = vmatmul.mubr.bf16.vlgmr.msra.gmra.mrb[0].mxu0 %v6089_v30  ;;  %5922 = vmatmul.mubr.bf16.vlgmr.msra.gmra.mrb[0].mxu1 %v6089_v30  ;;  %v8167_v30 = vld [vmem:[%s10769_s1 + $0x17e8] ss:$16 sps:$4 sm:$0xff]  }
 0x2c3   :  { %5398 = vmatpush1.bf16.msra.mxu0 %v8074_v37  ;;  %5931 = vmatpush1.bf16.msra.mxu1 %v8077_v38  ;;  %v8174_v37 = vld [vmem:[%s10769_s1 + $0x1804] ss:$16 sps:$4 sm:$0xff]   ;;  %v8177_v38 = vld [vmem:[%s10769_s1 + $0x180c] ss:$16 sps:$4 sm:$0xff]  }
 0x2c4   :  { %5399 = vmatprep.subr.bf16.mxu0 %v8082_v33  ;;  %5932 = vmatprep.subr.bf16.mxu1 %v8085_v39  ;;  %v6091_v33 = vcombine.low %v10466_v36, %v10466_v36  ;;  %v8172_v39 = vld [vmem:[%s10769_s1 + $0x1800] ss:$16 sps:$4 sm:$0xff]   ;;  %v8183_v36 = vld [vmem:[%s10769_s1 + $0x182c] ss:$16 sps:$4 sm:$0xff]  }
 0x2c5   :  { %5429 = vmatprep.mubr.bf16.mxu0 %v6092_v40  ;;  %5962 = vmatprep.mubr.bf16.mxu1 %v6092_v40  ;;  %v8175_v40 = vld [vmem:[%s10769_s1 + $0x1808] ss:$16 sps:$4 sm:$0xff]  }
 0x2c7   :  { %5400 = vmatpush1.bf16.msra.mxu0 %v8080_v41  ;;  %5933 = vmatpush1.bf16.msra.mxu1 %v8083_v42  ;;  %v8180_v41 = vld [vmem:[%s10769_s1 + $0x1824] ss:$16 sps:$4 sm:$0xff]   ;;  %v8178_v42 = vld [vmem:[%s10769_s1 + $0x1820] ss:$16 sps:$4 sm:$0xff]  }
 0x2c8   :  { %5401 = vmatprep.subr.bf16.mxu0 %v8088_v43  ;;  %5934 = vmatprep.subr.bf16.mxu1 %v8091_v44  ;;  %v8181_v43 = vld [vmem:[%s10769_s1 + $0x1828] ss:$16 sps:$4 sm:$0xff]   ;;  %v8186_v44 = vld [vmem:[%s10769_s1 + $0x1844] ss:$16 sps:$4 sm:$0xff]  }
 0x2cb   :  { %5402 = vmatpush1.bf16.msra.mxu0 %v8086_v45  ;;  %5935 = vmatpush1.bf16.msra.mxu1 %v8089_v46  ;;  %v8189_v45 = vld [vmem:[%s10769_s1 + $0x184c] ss:$16 sps:$4 sm:$0xff]   ;;  %v8221_v46 = vmov 0  }
 0x2cc   :  { %5403 = vmatprep.subr.bf16.mxu0 %v8094_v47  ;;  %5936 = vmatprep.subr.bf16.mxu1 %v8097_v48  ;;  %v8184_v47 = vld [vmem:[%s10769_s1 + $0x1840] ss:$16 sps:$4 sm:$0xff]   ;;  %v8187_v48 = vld [vmem:[%s10769_s1 + $0x1848] ss:$16 sps:$4 sm:$0xff]  }
 0x2cf   :  { %5404 = vmatpush1.bf16.msra.mxu0 %v8092_v49  ;;  %5937 = vmatpush1.bf16.msra.mxu1 %v8095_v50  ;;  %v8192_v49 = vld [vmem:[%s10769_s1 + $0x1864] ss:$16 sps:$4 sm:$0xff]   ;;  %v8195_v50 = vld [vmem:[%s10769_s1 + $0x186c] ss:$16 sps:$4 sm:$0xff]  }
 0x2d0   :  { %5405 = vmatprep.subr.bf16.mxu0 %v8100_v51  ;;  %5938 = vmatprep.subr.bf16.mxu1 %v8103_v52  ;;  %v8190_v51 = vld [vmem:[%s10769_s1 + $0x1860] ss:$16 sps:$4 sm:$0xff]   ;;  %v8193_v52 = vld [vmem:[%s10769_s1 + $0x1868] ss:$16 sps:$4 sm:$0xff]  }
 0x2d3   :  { %5406 = vmatpush1.bf16.msra.mxu0 %v8098_v53  ;;  %5939 = vmatpush1.bf16.msra.mxu1 %v8101_v54  ;;  %v8198_v53 = vld [vmem:[%s10769_s1 + $0x1884] ss:$16 sps:$4 sm:$0xff]   ;;  %v8201_v54 = vld [vmem:[%s10769_s1 + $0x188c] ss:$16 sps:$4 sm:$0xff]  }
 0x2d4   :  { %5407 = vmatprep.subr.bf16.mxu0 %v8106_v55  ;;  %5940 = vmatprep.subr.bf16.mxu1 %v8109_v56  ;;  %v8196_v55 = vld [vmem:[%s10769_s1 + $0x1880] ss:$16 sps:$4 sm:$0xff]   ;;  %v8199_v56 = vld [vmem:[%s10769_s1 + $0x1888] ss:$16 sps:$4 sm:$0xff]  }
 0x2d7   :  { %5408 = vmatpush1.bf16.msra.mxu0 %v8104_v57  ;;  %5941 = vmatpush1.bf16.msra.mxu1 %v8107_v58  ;;  %v8204_v57 = vld [vmem:[%s10769_s1 + $0x18a4] ss:$16 sps:$4 sm:$0xff]   ;;  %v8207_v58 = vld [vmem:[%s10769_s1 + $0x18ac] ss:$16 sps:$4 sm:$0xff]  }
 0x2d8   :  { %5409 = vmatprep.subr.bf16.mxu0 %v8112_v59  ;;  %5942 = vmatprep.subr.bf16.mxu1 %v8115_v60  ;;  %v8202_v59 = vld [vmem:[%s10769_s1 + $0x18a0] ss:$16 sps:$4 sm:$0xff]   ;;  %v8205_v60 = vld [vmem:[%s10769_s1 + $0x18a8] ss:$16 sps:$4 sm:$0xff]  }
 0x2db   :  { %5410 = vmatpush1.bf16.msra.mxu0 %v8110_v61  ;;  %5943 = vmatpush1.bf16.msra.mxu1 %v8113_v62  ;;  %v8210_v61 = vld [vmem:[%s10769_s1 + $0x18c4] ss:$16 sps:$4 sm:$0xff]   ;;  %v8213_v62 = vld [vmem:[%s10769_s1 + $0x18cc] ss:$16 sps:$4 sm:$0xff]  }
 0x2dc   :  { %5411 = vmatprep.subr.bf16.mxu0 %v8118_v63  ;;  %5944 = vmatprep.subr.bf16.mxu1 %v8121_v0  ;;  %v8208_v63 = vld [vmem:[%s10769_s1 + $0x18c0] ss:$16 sps:$4 sm:$0xff]   ;;  %v8211_v0 = vld [vmem:[%s10769_s1 + $0x18c8] ss:$16 sps:$4 sm:$0xff]  }
 0x2df   :  { %5412 = vmatpush1.bf16.msra.mxu0 %v8116_v1  ;;  %5945 = vmatpush1.bf16.msra.mxu1 %v8119_v2  ;;  %v8216_v1 = vld [vmem:[%s10769_s1 + $0x18e4] ss:$16 sps:$4 sm:$0xff]   ;;  %v8219_v2 = vld [vmem:[%s10769_s1 + $0x18ec] ss:$16 sps:$4 sm:$0xff]  }
 0x2e0   :  { %5413 = vmatprep.subr.bf16.mxu0 %v8124_v3  ;;  %5946 = vmatprep.subr.bf16.mxu1 %v8127_v4  ;;  %v8214_v3 = vld [vmem:[%s10769_s1 + $0x18e0] ss:$16 sps:$4 sm:$0xff]   ;;  %v8217_v4 = vld [vmem:[%s10769_s1 + $0x18e8] ss:$16 sps:$4 sm:$0xff]  }
 0x2e3   :  { %5414 = vmatpush1.bf16.msra.mxu0 %v8122_v5  ;;  %5947 = vmatpush1.bf16.msra.mxu1 %v8125_v6  ;;  %v8220_v5 = vld [vmem:[%s10770_s0 + $0x60] ss:$0 sps:$4 sm:$0xff]   ;;  %v10_v6 = vstv %s10771_s4 }
 0x2e4   :  { %5415 = vmatprep.subr.bf16.mxu0 %v8130_v7  ;;  %5948 = vmatprep.subr.bf16.mxu1 %v8133_v8  ;;  %11 = vst [vmem:[#allocation2] sm:$0x1] %v10_v6  ;;  %v838_v7 = vlaneseq }
 0x2e6   :  { %v839_v8 = vshrl.u32 %v838_v7, 7 }
 0x2e7   :  { %5416 = vmatpush1.bf16.msra.mxu0 %v8128_v9  ;;  %5949 = vmatpush1.bf16.msra.mxu1 %v8131_v10 }
 0x2e8   :  { %5417 = vmatprep.subr.bf16.mxu0 %v8136_v12  ;;  %5950 = vmatprep.subr.bf16.mxu1 %v8139_v13  ;;  %v840_v9 = vsub.s32 0, %v839_v8  ;;  %v848_v10 = vsub.s32 2, %v839_v8  ;;  %v836_v12 = vld [vmem:[%s10772_s2] sm:$0xf]  ;;  %v844_v13 = vsub.s32 1, %v839_v8 }
 0x2eb   :  { %5418 = vmatpush1.bf16.msra.mxu0 %v8134_v15  ;;  %5951 = vmatpush1.bf16.msra.mxu1 %v8137_v11  ;;  %v852_v15 = vsub.s32 3, %v839_v8  ;;  %v841_v11 = vrot.slane %v836_v12, %v840_v9 }
 0x2ec   :  { %5419 = vmatprep.subr.bf16.mxu0 %v8142_v17  ;;  %5952 = vmatprep.subr.bf16.mxu1 %v8145_v14  ;;  %v849_v17 = vrot.slane %v836_v12, %v848_v10  ;;  %v845_v14 = vrot.slane %v836_v12, %v844_v13 }
 0x2ef   :  { %5420 = vmatpush1.bf16.msra.mxu0 %v8140_v19  ;;  %5953 = vmatpush1.bf16.msra.mxu1 %v8143_v20  ;;  %v853_v19 = vrot.slane %v836_v12, %v852_v15  ;;  %v6024_v20 = vld [vmem:[%s10773_s3] sm:$0xf] }
 0x2f0   :  { %5421 = vmatprep.subr.bf16.mxu0 %v8148_v16  ;;  %5954 = vmatprep.subr.bf16.mxu1 %v8151_v22 }
 0x2f3   :  { %5422 = vmatpush1.bf16.msra.mxu0 %v8146_v23  ;;  %5955 = vmatpush1.bf16.msra.mxu1 %v8149_v18 }
 0x2f4   :  { %5423 = vmatprep.subr.bf16.mxu0 %v8154_v25  ;;  %5956 = vmatprep.subr.bf16.mxu1 %v8157_v26 }
 0x2f7   :  { %5424 = vmatpush1.bf16.msra.mxu0 %v8152_v27  ;;  %5957 = vmatpush1.bf16.msra.mxu1 %v8155_v28  ;;  %v6029_v27 = vrot.slane %v6024_v20, %v840_v9 }
 0x2f8   :  { %5425 = vmatprep.subr.bf16.mxu0 %v8160_v29  ;;  %5958 = vmatprep.subr.bf16.mxu1 %v8163_v24  ;;  %v6033_v29 = vrot.slane %v6024_v20, %v844_v13 }
 0x2fb   :  { %5426 = vmatpush1.bf16.msra.mxu0 %v8158_v31  ;;  %5959 = vmatpush1.bf16.msra.mxu1 %v8161_v32 }
 0x2fc   :  { %5427 = vmatprep.subr.bf16.mxu0 %v8166_v21  ;;  %5960 = vmatprep.subr.bf16.mxu1 %v8169_v34 }
 0x2ff   :  { %5428 = vmatpush1.bf16.msra.mxu0 %v8164_v35  ;;  %5961 = vmatpush1.bf16.msra.mxu1 %v8167_v30 }
 0x300   :  { %5438 = vmatprep.subr.bf16.mxu0 %v8174_v37  ;;  %5971 = vmatprep.subr.bf16.mxu1 %v8177_v38 }
 0x302   :  { %5430 = vmatmul.mubr.bf16.vlgmr.msra.gmra.mrb[0].mxu0 %v6091_v33  ;;  %5963 = vmatmul.mubr.bf16.vlgmr.msra.gmra.mrb[0].mxu1 %v6091_v33 }
 0x303   :  { %5439 = vmatpush1.bf16.msra.mxu0 %v8172_v39  ;;  %5972 = vmatpush1.bf16.msra.mxu1 %v8175_v40  ;;  %v6037_v39 = vrot.slane %v6024_v20, %v848_v10 }
 0x304   :  { %5440 = vmatprep.subr.bf16.mxu0 %v8180_v41  ;;  %5973 = vmatprep.subr.bf16.mxu1 %v8183_v36 }
 0x305   :  { %5470 = vmatprep.mubr.bf16.mxu0 %v8221_v46  ;;  %6003 = vmatprep.mubr.bf16.mxu1 %v8221_v46 }
 0x307   :  { %5441 = vmatpush1.bf16.msra.mxu0 %v8178_v42  ;;  %5974 = vmatpush1.bf16.msra.mxu1 %v8181_v43  ;;  %v6041_v42 = vrot.slane %v6024_v20, %v852_v15 }
 0x308   :  { %5442 = vmatprep.subr.bf16.mxu0 %v8186_v44  ;;  %5975 = vmatprep.subr.bf16.mxu1 %v8189_v45 }
 0x30b   :  { %5443 = vmatpush1.bf16.msra.mxu0 %v8184_v47  ;;  %5976 = vmatpush1.bf16.msra.mxu1 %v8187_v48 }
 0x30c   :  { %5444 = vmatprep.subr.bf16.mxu0 %v8192_v49  ;;  %5977 = vmatprep.subr.bf16.mxu1 %v8195_v50  ;;  %v6894_v50 = vld [vmem:[#allocation2] ss:$0 sm:$0xff] }
 0x30f   :  { %5445 = vmatpush1.bf16.msra.mxu0 %v8190_v51  ;;  %5978 = vmatpush1.bf16.msra.mxu1 %v8193_v52 }
 0x310   :  { %5446 = vmatprep.subr.bf16.mxu0 %v8198_v53  ;;  %5979 = vmatprep.subr.bf16.mxu1 %v8201_v54 }
 0x313   :  { %5447 = vmatpush1.bf16.msra.mxu0 %v8196_v55  ;;  %5980 = vmatpush1.bf16.msra.mxu1 %v8199_v56 }
 0x314   :  { %5448 = vmatprep.subr.bf16.mxu0 %v8204_v57  ;;  %5981 = vmatprep.subr.bf16.mxu1 %v8207_v58 }
 0x317   :  { %5449 = vmatpush1.bf16.msra.mxu0 %v8202_v59  ;;  %5982 = vmatpush1.bf16.msra.mxu1 %v8205_v60 }
 0x318   :  { %5450 = vmatprep.subr.bf16.mxu0 %v8210_v61  ;;  %5983 = vmatprep.subr.bf16.mxu1 %v8213_v62 }
 0x31b   :  { %5451 = vmatpush1.bf16.msra.mxu0 %v8208_v63  ;;  %5984 = vmatpush1.bf16.msra.mxu1 %v8211_v0 }
 0x31c   :  { %5452 = vmatprep.subr.bf16.mxu0 %v8216_v1  ;;  %5985 = vmatprep.subr.bf16.mxu1 %v8219_v2 }
 0x31f   :  { %5453 = vmatpush1.bf16.msra.mxu0 %v8214_v3  ;;  %5986 = vmatpush1.bf16.msra.mxu1 %v8217_v4 }
 0x322   :  { %5471 = vmatmul.mubr.bf16.vlgmr.msra.gmra.mrb[0].mxu0 %v8220_v5  ;;  %6004 = vmatmul.mubr.bf16.vlgmr.msra.gmra.mrb[0].mxu1 %v8220_v5 }
 0x3f5   :  { %v5472_v16 = vpop.f32.mrb[0].mxu0  ;;  %v6005_v22 = vpop.f32.mrb[0].mxu1 }
 0x3f6   :  { %v6895_v23 = vadd.f32 %v5472_v16, %v841_v11  ;;  %v6897_v18 = vadd.f32 %v6005_v22, %v849_v17  ;;  %v5474_v25 = vpop.f32.mrb[1].mxu0  ;;  %v6007_v26 = vpop.f32.mrb[1].mxu1 }
 0x3f7   :  { %v6896_v28 = vadd.f32 %v5474_v25, %v845_v14  ;;  %v6898_v24 = vadd.f32 %v6007_v26, %v853_v19  ;;  %v5476_v31 = vpop.f32.mrb[2].mxu0  ;;  %v6009_v32 = vpop.f32.mrb[2].mxu1 }
 0x3f8   :  { %vm6012_vm0 = vcmp.ge.f32.partialorder %v6895_v23, 0.0  ;;  %v6016_v21 = vmul.f32 0.1, %v6895_v23  ;;  %vm6014_vm1 = vcmp.ge.f32.partialorder %v6897_v18, 0.0  ;;  %v6018_v34 = vmul.f32 0.1, %v6897_v18 }
 0x3f9   :  { %vm6013_vm2 = vcmp.ge.f32.partialorder %v6896_v28, 0.0  ;;  %v6017_v35 = vmul.f32 0.1, %v6896_v28  ;;  %v6019_v30 = vmul.f32 0.1, %v6898_v24  ;;  %vm6015_vm3 = vcmp.ge.f32.partialorder %v6898_v24, 0.0 }
 0x3fa   :  { %v6020_v37 = vsel %vm6012_vm0, %v6895_v23, %v6016_v21  ;;  %v5477_v38 = vpop.f32.mrb[3].mxu0  ;;  %v6010_v33 = vpop.f32.mrb[3].mxu1  ;;  %v6022_v41 = vsel %vm6014_vm1, %v6897_v18, %v6018_v34 }
 0x3fb   :  { %v6021_v40 = vsel %vm6013_vm2, %v6896_v28, %v6017_v35  ;;  %v6046_v36 = vmul.f32 %v6029_v27, %v6020_v37  ;;  %v6023_v44 = vsel %vm6015_vm3, %v6898_v24, %v6019_v30  ;;  %v6048_v45 = vmul.f32 %v6037_v39, %v6022_v41 }
 0x3fc   :  { %v6047_v43 = vmul.f32 %v6033_v29, %v6021_v40  ;;  %v6049_v47 = vmul.f32 %v6041_v42, %v6023_v44 }
 0x3fe   :  { %v6050_v46 = vadd.f32 %v6047_v43, %v6046_v36 }
 0x400   :  { %v6051_v48 = vadd.f32 %v6050_v46, %v6048_v45 }
 0x402   :  { %v6052_v49 = vadd.f32 %v6051_v48, %v6049_v47 }
 0x404   :  { %6053 = vadd.xlane.f32.xlu0 %v6052_v49 }
 0x491   :  { %v6054_v51 = vpop.xlane.xlu0 %6053 }
 0x492   :  { %v6062_v52 = vadd.f32 %v6894_v50, %v6054_v51 }
 0x494   :  { %6064 = vst.msk [vmem:[%s10774_s5] sm:$0xff] %vm6063_vm4, %v6062_v52 }

</bundles_post_ra>
